<compile_context>
chip_gen: v5e
topology: v5e:2x2
jax: 0.10.0
libtpu: 0.0.40
codegen_flags: <defaults>
</compile_context>

<pallas_src>
import jax
import jax.numpy as jnp
from jax.experimental import pallas as pl
from jax.experimental.pallas import tpu as pltpu

N, C_IN_EACH, H, W = 1, 192, 12, 12     # four inputs of [1,192,12,12]
C_IN = 4 * C_IN_EACH                    # 768 after channel concat
C_OUT = 192
HW = H * W                              # 144
EPS = 1e-3


def _fused_kernel(x0_ref, x1_ref, x2_ref, x3_ref, w_ref, g_ref, b_ref, o_ref):
    # Fused concat + 1x1 conv: four accumulating MXU matmuls, one per concat
    # slab.  w_ref is (4, 192, 192) bf16 (pre-split per slab in the wrapper so
    # every slice is a contiguous first-axis index, no unaligned lane slicing);
    # activations are f32, weight is upcast so the matmul accumulates in f32.
    acc = jnp.dot(w_ref[0].astype(jnp.float32), x0_ref[...],
                  preferred_element_type=jnp.float32)            # (192, 144)
    acc += jnp.dot(w_ref[1].astype(jnp.float32), x1_ref[...],
                   preferred_element_type=jnp.float32)
    acc += jnp.dot(w_ref[2].astype(jnp.float32), x2_ref[...],
                   preferred_element_type=jnp.float32)
    acc += jnp.dot(w_ref[3].astype(jnp.float32), x3_ref[...],
                   preferred_element_type=jnp.float32)

    # BatchNorm2d, training mode: per-channel (row) mean / biased variance over
    # the N*H*W axis, computed from sum and sum-of-squares (single pass over
    # acc), then folded into one scale/shift + ReLU pass.
    mean = jnp.mean(acc, axis=1, keepdims=True)                   # (192, 1)
    mean_sq = jnp.mean(acc * acc, axis=1, keepdims=True)          # (192, 1)
    var = jnp.maximum(mean_sq - mean * mean, 0.0)                 # biased var
    scale = jax.lax.rsqrt(var + EPS) * g_ref[...]                 # (192, 1)
    shift = b_ref[...] - mean * scale                             # (192, 1)

    o_ref[...] = jnp.maximum(acc * scale + shift, 0.0).astype(o_ref.dtype)


def fused_cat_conv_bn_relu(x116, x125, x140, x144, weight, gamma, beta):
    """x*: [1, 192, 12, 12] f32 (NCHW). weight: [192, 768] (C_out, C_in).
    gamma/beta: [192].  Returns [1, 192, 12, 12] f32."""
    # Pure reshapes (N == 1), no transposes on the activations.
    x0 = x116.reshape(C_IN_EACH, HW)
    x1 = x125.reshape(C_IN_EACH, HW)
    x2 = x140.reshape(C_IN_EACH, HW)
    x3 = x144.reshape(C_IN_EACH, HW)

    # Weight: split per concat slab -> (4, C_out, C_in_each) and store as bf16.
    # In a real model this cast/reorder is a one-time hoistable op on a
    # constant; it halves the weight's HBM footprint (the dominant HBM term).
    w = jnp.transpose(weight.reshape(C_OUT, 4, C_IN_EACH), (1, 0, 2))
    w = w.astype(jnp.bfloat16)                                    # (4,192,192)

    g = gamma.reshape(C_OUT, 1).astype(jnp.float32)
    b = beta.reshape(C_OUT, 1).astype(jnp.float32)

    vmem = pl.BlockSpec(memory_space=pltpu.MemorySpace.VMEM)
    bytes_accessed = (4 * C_IN_EACH * HW * 4      # activations (f32 in HBM)
                      + C_OUT * C_IN * 2          # weight (bf16 in HBM)
                      + 2 * C_OUT * 4             # gamma / beta
                      + C_OUT * HW * 4)           # output
    out = pl.pallas_call(
        _fused_kernel,
        out_shape=jax.ShapeDtypeStruct((C_OUT, HW), jnp.float32),
        in_specs=[vmem] * 7,
        out_specs=vmem,
        cost_estimate=pl.CostEstimate(
            flops=2 * C_OUT * C_IN * HW,
            transcendentals=C_OUT,
            bytes_accessed=bytes_accessed),
    )(x0, x1, x2, x3, w, g, b)

    # (C_out, H*W) -> NCHW, again a pure reshape.
    return out.reshape(N, C_OUT, H, W)


def _reference(x116, x125, x140, x144, weight, gamma, beta):
    xcat = jnp.concatenate([x116, x125, x140, x144], axis=1)      # (1,768,12,12)
    conv = jnp.einsum('oc,nchw->nohw', weight, xcat,
                      precision=jax.lax.Precision.HIGHEST)
    mean = conv.mean(axis=(0, 2, 3), keepdims=True)
    var = ((conv - mean) ** 2).mean(axis=(0, 2, 3), keepdims=True)
    y = (conv - mean) * jax.lax.rsqrt(var + EPS) \
        * gamma.reshape(1, -1, 1, 1) + beta.reshape(1, -1, 1, 1)
    return jnp.maximum(y, 0.0)


if __name__ == "__main__":
    key = jax.random.PRNGKey(0)
    k116, k125, k140, k144, kw, kg, kb = jax.random.split(key, 7)

    x116 = jax.random.normal(k116, (N, C_IN_EACH, H, W), dtype=jnp.float32)
    x125 = jax.random.normal(k125, (N, C_IN_EACH, H, W), dtype=jnp.float32)
    x140 = jax.random.normal(k140, (N, C_IN_EACH, H, W), dtype=jnp.float32)
    x144 = jax.random.normal(k144, (N, C_IN_EACH, H, W), dtype=jnp.float32)

    # Conv2d(768, 192, 1x1, bias=False): weight [192, 768, 1, 1] -> [192, 768]
    weight = jax.random.normal(kw, (C_OUT, C_IN), dtype=jnp.float32) * 0.02
    # BatchNorm2d(192) affine params
    gamma = 1.0 + 0.1 * jax.random.normal(kg, (C_OUT,), dtype=jnp.float32)
    beta = 0.1 * jax.random.normal(kb, (C_OUT,), dtype=jnp.float32)

    fused = jax.jit(fused_cat_conv_bn_relu)
    out = fused(x116, x125, x140, x144, weight, gamma, beta)
    jax.block_until_ready(out)
    assert out.shape == (N, C_OUT, H, W), out.shape

    # Check 1: against the exact numerical intent (bf16-stored weight, f32
    # activations/accumulation) -> tight tolerance.
    w_bf16_as_f32 = weight.astype(jnp.bfloat16).astype(jnp.float32)
    ref_bf16w = _reference(x116, x125, x140, x144, w_bf16_as_f32, gamma, beta)
    err_kernel = float(jnp.max(jnp.abs(out - ref_bf16w)))
    assert err_kernel < 2e-3, f"kernel error vs bf16-weight reference: {err_kernel}"

    # Check 2: against the full-f32 PyTorch-style reference (weight rounding is
    # the only approximation; post-BN it stays small).
    ref = _reference(x116, x125, x140, x144, weight, gamma, beta)
    max_err = float(jnp.max(jnp.abs(out - ref)))
    assert max_err < 2e-2, f"max abs error vs f32 reference: {max_err}"

    print("KERNEL_OK")
</pallas_src>

<mosaic_0001>
module attributes {stable_mosaic.version = 11 : i64} {
  func.func @_fused_kernel(%arg0: memref<192x144xf32, #tpu.memory_space<vmem>>, %arg1: memref<192x144xf32, #tpu.memory_space<vmem>>, %arg2: memref<192x144xf32, #tpu.memory_space<vmem>>, %arg3: memref<192x144xf32, #tpu.memory_space<vmem>>, %arg4: memref<4x192x192xbf16, #tpu.memory_space<vmem>>, %arg5: memref<192x1xf32, #tpu.memory_space<vmem>>, %arg6: memref<192x1xf32, #tpu.memory_space<vmem>>, %arg7: memref<192x144xf32, #tpu.memory_space<vmem>>) attributes {dimension_semantics = [], scalar_prefetch = 0 : i64, scratch_operands = 0 : i64, tpu.core_type = #tpu.core_type<tc>} {
    %c0 = arith.constant 0 : index
    %c0_0 = arith.constant 0 : index
    %c0_1 = arith.constant 0 : index
    %0 = vector.load %arg4[%c0, %c0_0, %c0_1] : memref<4x192x192xbf16, #tpu.memory_space<vmem>>, vector<1x192x192xbf16>
    %1 = vector.shape_cast %0 : vector<1x192x192xbf16> to vector<192x192xbf16>
    %2 = arith.extf %1 : vector<192x192xbf16> to vector<192x192xf32>
    %c0_2 = arith.constant 0 : index
    %c0_3 = arith.constant 0 : index
    %3 = vector.load %arg0[%c0_2, %c0_3] : memref<192x144xf32, #tpu.memory_space<vmem>>, vector<192x144xf32>
    %cst = arith.constant dense<0.000000e+00> : vector<192x144xf32>
    %4 = tpu.matmul %2, %3, %cst {dimension_numbers = #tpu.dot_dimension_numbers<[1], [0], [0], [1], [0, 0, 1, 1], [], []>} : vector<192x192xf32>, vector<192x144xf32>, vector<192x144xf32> -> vector<192x144xf32>
    %c1 = arith.constant 1 : index
    %c0_4 = arith.constant 0 : index
    %c0_5 = arith.constant 0 : index
    %5 = vector.load %arg4[%c1, %c0_4, %c0_5] : memref<4x192x192xbf16, #tpu.memory_space<vmem>>, vector<1x192x192xbf16>
    %6 = vector.shape_cast %5 : vector<1x192x192xbf16> to vector<192x192xbf16>
    %7 = arith.extf %6 : vector<192x192xbf16> to vector<192x192xf32>
    %c0_6 = arith.constant 0 : index
    %c0_7 = arith.constant 0 : index
    %8 = vector.load %arg1[%c0_6, %c0_7] : memref<192x144xf32, #tpu.memory_space<vmem>>, vector<192x144xf32>
    %cst_8 = arith.constant dense<0.000000e+00> : vector<192x144xf32>
    %9 = tpu.matmul %7, %8, %cst_8 {dimension_numbers = #tpu.dot_dimension_numbers<[1], [0], [0], [1], [0, 0, 1, 1], [], []>} : vector<192x192xf32>, vector<192x144xf32>, vector<192x144xf32> -> vector<192x144xf32>
    %10 = arith.addf %4, %9 : vector<192x144xf32>
    %c2 = arith.constant 2 : index
    %c0_9 = arith.constant 0 : index
    %c0_10 = arith.constant 0 : index
    %11 = vector.load %arg4[%c2, %c0_9, %c0_10] : memref<4x192x192xbf16, #tpu.memory_space<vmem>>, vector<1x192x192xbf16>
    %12 = vector.shape_cast %11 : vector<1x192x192xbf16> to vector<192x192xbf16>
    %13 = arith.extf %12 : vector<192x192xbf16> to vector<192x192xf32>
    %c0_11 = arith.constant 0 : index
    %c0_12 = arith.constant 0 : index
    %14 = vector.load %arg2[%c0_11, %c0_12] : memref<192x144xf32, #tpu.memory_space<vmem>>, vector<192x144xf32>
    %cst_13 = arith.constant dense<0.000000e+00> : vector<192x144xf32>
    %15 = tpu.matmul %13, %14, %cst_13 {dimension_numbers = #tpu.dot_dimension_numbers<[1], [0], [0], [1], [0, 0, 1, 1], [], []>} : vector<192x192xf32>, vector<192x144xf32>, vector<192x144xf32> -> vector<192x144xf32>
    %16 = arith.addf %10, %15 : vector<192x144xf32>
    %c3 = arith.constant 3 : index
    %c0_14 = arith.constant 0 : index
    %c0_15 = arith.constant 0 : index
    %17 = vector.load %arg4[%c3, %c0_14, %c0_15] : memref<4x192x192xbf16, #tpu.memory_space<vmem>>, vector<1x192x192xbf16>
    %18 = vector.shape_cast %17 : vector<1x192x192xbf16> to vector<192x192xbf16>
    %19 = arith.extf %18 : vector<192x192xbf16> to vector<192x192xf32>
    %c0_16 = arith.constant 0 : index
    %c0_17 = arith.constant 0 : index
    %20 = vector.load %arg3[%c0_16, %c0_17] : memref<192x144xf32, #tpu.memory_space<vmem>>, vector<192x144xf32>
    %cst_18 = arith.constant dense<0.000000e+00> : vector<192x144xf32>
    %21 = tpu.matmul %19, %20, %cst_18 {dimension_numbers = #tpu.dot_dimension_numbers<[1], [0], [0], [1], [0, 0, 1, 1], [], []>} : vector<192x192xf32>, vector<192x144xf32>, vector<192x144xf32> -> vector<192x144xf32>
    %22 = arith.addf %16, %21 : vector<192x144xf32>
    %cst_19 = arith.constant dense<0.000000e+00> : vector<192xf32>
    %23 = vector.multi_reduction <add>, %22, %cst_19 [1] : vector<192x144xf32> to vector<192xf32>
    %24 = vector.shape_cast %23 : vector<192xf32> to vector<192x1xf32>
    %cst_20 = arith.constant 1.440000e+02 : f32
    %25 = vector.broadcast %cst_20 : f32 to vector<192x1xf32>
    %26 = arith.divf %24, %25 : vector<192x1xf32>
    %27 = arith.mulf %22, %22 : vector<192x144xf32>
    %cst_21 = arith.constant dense<0.000000e+00> : vector<192xf32>
    %28 = vector.multi_reduction <add>, %27, %cst_21 [1] : vector<192x144xf32> to vector<192xf32>
    %29 = vector.shape_cast %28 : vector<192xf32> to vector<192x1xf32>
    %cst_22 = arith.constant 1.440000e+02 : f32
    %30 = vector.broadcast %cst_22 : f32 to vector<192x1xf32>
    %31 = arith.divf %29, %30 : vector<192x1xf32>
    %32 = arith.mulf %26, %26 : vector<192x1xf32>
    %33 = arith.subf %31, %32 : vector<192x1xf32>
    %cst_23 = arith.constant 0.000000e+00 : f32
    %34 = vector.broadcast %cst_23 : f32 to vector<192x1xf32>
    %35 = arith.maximumf %33, %34 : vector<192x1xf32>
    %cst_24 = arith.constant 1.000000e-03 : f32
    %36 = vector.broadcast %cst_24 : f32 to vector<192x1xf32>
    %37 = arith.addf %35, %36 : vector<192x1xf32>
    %38 = math.rsqrt %37 : vector<192x1xf32>
    %c0_25 = arith.constant 0 : index
    %c0_26 = arith.constant 0 : index
    %39 = vector.load %arg5[%c0_25, %c0_26] : memref<192x1xf32, #tpu.memory_space<vmem>>, vector<192x1xf32>
    %40 = arith.mulf %38, %39 : vector<192x1xf32>
    %c0_27 = arith.constant 0 : index
    %c0_28 = arith.constant 0 : index
    %41 = vector.load %arg6[%c0_27, %c0_28] : memref<192x1xf32, #tpu.memory_space<vmem>>, vector<192x1xf32>
    %42 = arith.mulf %26, %40 : vector<192x1xf32>
    %43 = arith.subf %41, %42 : vector<192x1xf32>
    %44 = vector.broadcast %40 : vector<192x1xf32> to vector<192x144xf32>
    %45 = arith.mulf %22, %44 : vector<192x144xf32>
    %46 = vector.broadcast %43 : vector<192x1xf32> to vector<192x144xf32>
    %47 = arith.addf %45, %46 : vector<192x144xf32>
    %cst_29 = arith.constant 0.000000e+00 : f32
    %48 = vector.broadcast %cst_29 : f32 to vector<192x144xf32>
    %49 = arith.maximumf %47, %48 : vector<192x144xf32>
    %c0_30 = arith.constant 0 : index
    %c0_31 = arith.constant 0 : index
    %50 = vector.load %arg7[%c0_30, %c0_31] : memref<192x144xf32, #tpu.memory_space<vmem>>, vector<192x144xf32>
    tpu.vector_store %arg7[%c0_30, %c0_31], %49 {strides = array<i32>} : memref<192x144xf32, #tpu.memory_space<vmem>>, vector<192x144xf32>,
    return
  }
}

</mosaic_0001>

<bundles_post_ra>
// kernel: fused_cat_conv_bn_relu.1
= control target key start
LH: loop header
LB: loop body
LE: loop exit
PB: predicated region body
PF: predicated region fallthrough
CT: control target
= control target key end

     0   :  { %vm267_vm0 = vcmask 523264   ;;  %vm2318_vm1 = vcmask 130048   ;;  %s6694_s1 = inlined_call_operand.vmem [shape: f32[192,144], index: 1, kind: input, shape index: {}]   ;;  %s6695_s4 = inlined_call_operand.vmem [shape: bf16[4,192,192], index: 4, kind: input, shape index: {}]   ;;  %s6696_s0 = inlined_call_operand.vmem [shape: f32[192,144], index: 0, kind: input, shape index: {}]   ;;  %s6697_s2 = inlined_call_operand.vmem [shape: f32[192,144], index: 2, kind: input, shape index: {}]   ;;  %s6698_s3 = inlined_call_operand.vmem [shape: f32[192,144], index: 3, kind: input, shape index: {}]   ;;  %s6699_s5 = inlined_call_operand.vmem [shape: f32[192,1], index: 5, kind: input, shape index: {}]   ;;  %s6700_s6 = inlined_call_operand.vmem [shape: f32[192,1], index: 6, kind: input, shape index: {}]   ;;  %s6701_s7 = inlined_call_operand.vmem [shape: f32[192,144], index: 7, kind: output, shape index: {}]  }
   0x1   :  { %v249_v0 = vld [vmem:[%s6694_s1 + $0xf0] sm:$0xff]  ;;  %v250_v2 = vld [vmem:[%s6694_s1 + $0xf8] sm:$0xff]  ;;  %v247_v4 = vld [vmem:[%s6694_s1 + $0xe0] sm:$0xff] }
   0x2   :  { %v265_v1 = vld [vmem:[%s6694_s1 + $0x170] sm:$0xff]  ;;  %340 = vmatpush.msra.mxu0 %v249_v0  ;;  %v266_v3 = vld [vmem:[%s6694_s1 + $0x178] sm:$0xff]  ;;  %v263_v5 = vld [vmem:[%s6694_s1 + $0x160] sm:$0xff]  ;;  %518 = vmatpush.msra.mxu2 %v250_v2 }
   0x3   :  { %437 = vmatpush.msra.mxu1 %v265_v1  ;;  %615 = vmatpush.msra.mxu3 %v266_v3  ;;  %v248_v6 = vld [vmem:[%s6694_s1 + $0xe8] sm:$0xff]  ;;  %v245_v8 = vld [vmem:[%s6694_s1 + $0xd0] sm:$0xff]  ;;  %v246_v10 = vld [vmem:[%s6694_s1 + $0xd8] sm:$0xff] }
   0x4   :  { %v264_v7 = vld [vmem:[%s6694_s1 + $0x168] sm:$0xff]  ;;  %341 = vmatpush.msra.mxu0 %v247_v4  ;;  %v261_v9 = vld [vmem:[%s6694_s1 + $0x150] sm:$0xff]  ;;  %v262_v11 = vld [vmem:[%s6694_s1 + $0x158] sm:$0xff]  ;;  %519 = vmatpush.msra.mxu2 %v248_v6 }
   0x5   :  { %438 = vmatpush.msra.mxu1 %v263_v5  ;;  %616 = vmatpush.msra.mxu3 %v264_v7  ;;  %v243_v12 = vld [vmem:[%s6694_s1 + $0xc0] sm:$0xff]  ;;  %v244_v14 = vld [vmem:[%s6694_s1 + $0xc8] sm:$0xff]  ;;  %v241_v16 = vld [vmem:[%s6694_s1 + $0xb0] sm:$0xff] }
   0x6   :  { %v259_v13 = vld [vmem:[%s6694_s1 + $0x140] sm:$0xff]  ;;  %342 = vmatpush.msra.mxu0 %v245_v8  ;;  %v260_v15 = vld [vmem:[%s6694_s1 + $0x148] sm:$0xff]  ;;  %520 = vmatpush.msra.mxu2 %v246_v10  ;;  %v257_v17 = vld [vmem:[%s6694_s1 + $0x130] sm:$0xff] }
   0x7   :  { %439 = vmatpush.msra.mxu1 %v261_v9  ;;  %617 = vmatpush.msra.mxu3 %v262_v11  ;;  %v242_v18 = vld [vmem:[%s6694_s1 + $0xb8] sm:$0xff]  ;;  %v239_v20 = vld [vmem:[%s6694_s1 + $0xa0] sm:$0xff]  ;;  %v240_v22 = vld [vmem:[%s6694_s1 + $0xa8] sm:$0xff] }
   0x8   :  { %343 = vmatpush.msra.mxu0 %v243_v12  ;;  %v258_v19 = vld [vmem:[%s6694_s1 + $0x138] sm:$0xff]  ;;  %521 = vmatpush.msra.mxu2 %v244_v14  ;;  %v255_v21 = vld [vmem:[%s6694_s1 + $0x120] sm:$0xff]  ;;  %v256_v23 = vld [vmem:[%s6694_s1 + $0x128] sm:$0xff] }
   0x9   :  { %440 = vmatpush.msra.mxu1 %v259_v13  ;;  %618 = vmatpush.msra.mxu3 %v260_v15  ;;  %v237_v24 = vld [vmem:[%s6694_s1 + $0x90] sm:$0xff]  ;;  %v3972_v26 = vld [vmem:[%s6695_s4 + $0xc0] sm:$0xff]  ;;  %v238_v27 = vld [vmem:[%s6694_s1 + $0x98] sm:$0xff] }
   0xa   :  { %344 = vmatpush.msra.mxu0 %v241_v16  ;;  %522 = vmatpush.msra.mxu2 %v242_v18  ;;  %v253_v25 = vld [vmem:[%s6694_s1 + $0x110] sm:$0xff]  ;;  %v254_v28 = vld [vmem:[%s6694_s1 + $0x118] sm:$0xff]  ;;  %v235_v29 = vld [vmem:[%s6694_s1 + $0x80] sm:$0xff]  ;;  %v172_v33 = vunpack.c.h.bf16 %v3972_v26  ;;  %v171_v58 = vunpack.c.l.bf16 %v3972_v26 }
   0xb   :  { %441 = vmatpush.msra.mxu1 %v257_v17  ;;  %619 = vmatpush.msra.mxu3 %v258_v19  ;;  %v251_v30 = vld [vmem:[%s6694_s1 + $0x100] sm:$0xff]  ;;  %v236_v31 = vld [vmem:[%s6694_s1 + $0x88] sm:$0xff]  ;;  %v233_v34 = vld [vmem:[%s6694_s1 + $0x70] sm:$0xff] }
   0xc   :  { %345 = vmatpush.msra.mxu0 %v239_v20  ;;  %523 = vmatpush.msra.mxu2 %v240_v22  ;;  %v252_v32 = vld [vmem:[%s6694_s1 + $0x108] sm:$0xff]  ;;  %v234_v35 = vld [vmem:[%s6694_s1 + $0x78] sm:$0xff]  ;;  %v231_v36 = vld [vmem:[%s6694_s1 + $0x60] sm:$0xff] }
   0xd   :  { %442 = vmatpush.msra.mxu1 %v255_v21  ;;  %620 = vmatpush.msra.mxu3 %v256_v23  ;;  %v232_v37 = vld [vmem:[%s6694_s1 + $0x68] sm:$0xff]  ;;  %v144_v38 = vld [vmem:[%s6696_s0 + $0x170] sm:$0xff]  ;;  %v230_v42 = vld [vmem:[%s6694_s1 + $0x58] sm:$0xff] }
   0xe   :  { %346 = vmatpush.msra.mxu0 %v237_v24  ;;  %524 = vmatpush.msra.mxu2 %v238_v27  ;;  %v3507_v39 = vld [vmem:[%s6695_s4 + $0xc8] sm:$0xff]  ;;  %v128_v40 = vld [vmem:[%s6696_s0 + $0xf0] sm:$0xff]  ;;  %v126_v43 = vld [vmem:[%s6696_s0 + $0xe0] sm:$0xff] }
   0xf   :  { %443 = vmatpush.msra.mxu1 %v253_v25  ;;  %621 = vmatpush.msra.mxu3 %v254_v28  ;;  %v229_v41 = vld [vmem:[%s6694_s1 + $0x50] sm:$0xff]  ;;  %v227_v44 = vld [vmem:[%s6694_s1 + $0x40] sm:$0xff]  ;;  %v228_v45 = vld [vmem:[%s6694_s1 + $0x48] sm:$0xff]  ;;  %v174_v46 = vunpack.c.h.bf16 %v3507_v39  ;;  %v173_v2 = vunpack.c.l.bf16 %v3507_v39 }
  0x10   :  { %347 = vmatpush.msra.mxu0 %v235_v29  ;;  %525 = vmatpush.msra.mxu2 %v236_v31  ;;  %v225_v47 = vld [vmem:[%s6694_s1 + $0x30] sm:$0xff]  ;;  %v226_v48 = vld [vmem:[%s6694_s1 + $0x38] sm:$0xff]  ;;  %v223_v49 = vld [vmem:[%s6694_s1 + $0x20] sm:$0xff] }
  0x11   :  { %444 = vmatpush.msra.mxu1 %v251_v30  ;;  %622 = vmatpush.msra.mxu3 %v252_v32  ;;  %v224_v50 = vld [vmem:[%s6694_s1 + $0x28] sm:$0xff]  ;;  %v3508_v51 = vld [vmem:[%s6695_s4 + $0xd0] sm:$0xff]  ;;  %v142_v52 = vld [vmem:[%s6696_s0 + $0x160] sm:$0xff] }
  0x12   :  { %3530 = vmatmul.msk.f32.vlgmr.msra.gmra.mxu1 %vm267_vm0, %v172_v33  ;;  %3554 = vmatmul.msk.f32.vlgmr.msra.gmra.mxu3 %vm267_vm0, %v172_v33  ;;  %v221_v53 = vld [vmem:[%s6694_s1 + $0x10] sm:$0xff]  ;;  %v222_v54 = vld [vmem:[%s6694_s1 + $0x18] sm:$0xff]  ;;  %v219_v56 = vld [vmem:[%s6694_s1] sm:$0xff]  ;;  %v176_v59 = vunpack.c.h.bf16 %v3508_v51  ;;  %v175_v7 = vunpack.c.l.bf16 %v3508_v51 }
  0x13   :  { %348 = vmatpush.msra.mxu0 %v233_v34  ;;  %526 = vmatpush.msra.mxu2 %v234_v35  ;;  %v124_v55 = vld [vmem:[%s6696_s0 + $0xd0] sm:$0xff]  ;;  %v220_v57 = vld [vmem:[%s6694_s1 + $0x8] sm:$0xff]  ;;  %v145_v60 = vld [vmem:[%s6696_s0 + $0x178] sm:$0xff] }
  0x14   :  { %865 = vmatpush.msrb.mxu3 %v144_v38  ;;  %768 = vmatpush.msrb.mxu1 %v128_v40  ;;  %v129_v61 = vld [vmem:[%s6696_s0 + $0xf8] sm:$0xff]  ;;  %v127_v63 = vld [vmem:[%s6696_s0 + $0xe8] sm:$0xff]  ;;  %v3510_v4 = vld [vmem:[%s6695_s4 + $0xe0] sm:$0xff] }
  0x15   :  { %349 = vmatpush.msra.mxu0 %v231_v36  ;;  %527 = vmatpush.msra.mxu2 %v232_v37  ;;  %v3509_v62 = vld [vmem:[%s6695_s4 + $0xd8] sm:$0xff]  ;;  %v143_v0 = vld [vmem:[%s6696_s0 + $0x168] sm:$0xff]  ;;  %v122_v6 = vld [vmem:[%s6696_s0 + $0xc0] sm:$0xff]  ;;  %v180_v8 = vunpack.c.h.bf16 %v3510_v4  ;;  %v179_v17 = vunpack.c.l.bf16 %v3510_v4 }
  0x16   :  { %769 = vmatpush.msrb.mxu1 %v126_v43  ;;  %866 = vmatpush.msrb.mxu3 %v142_v52  ;;  %v125_v1 = vld [vmem:[%s6696_s0 + $0xd8] sm:$0xff]  ;;  %v178_v3 = vunpack.c.h.bf16 %v3509_v62  ;;  %v123_v5 = vld [vmem:[%s6696_s0 + $0xc8] sm:$0xff]  ;;  %v140_v11 = vld [vmem:[%s6696_s0 + $0x150] sm:$0xff]  ;;  %v177_v14 = vunpack.c.l.bf16 %v3509_v62 }
  0x17   :  { %350 = vmatpush.msra.mxu0 %v229_v41  ;;  %528 = vmatpush.msra.mxu2 %v230_v42  ;;  %v3511_v9 = vld [vmem:[%s6695_s4 + $0xe8] sm:$0xff]  ;;  %v141_v10 = vld [vmem:[%s6696_s0 + $0x158] sm:$0xff]  ;;  %v120_v13 = vld [vmem:[%s6696_s0 + $0xb0] sm:$0xff] }
  0x18   :  { %770 = vmatpush.msrb.mxu1 %v124_v55  ;;  %v121_v12 = vld [vmem:[%s6696_s0 + $0xb8] sm:$0xff]  ;;  %867 = vmatpush.msrb.mxu3 %v140_v11  ;;  %v182_v15 = vunpack.c.h.bf16 %v3511_v9  ;;  %v3512_v16 = vld [vmem:[%s6695_s4 + $0xf0] sm:$0xff]  ;;  %v119_v20 = vld [vmem:[%s6696_s0 + $0xa8] sm:$0xff]  ;;  %v181_v22 = vunpack.c.l.bf16 %v3511_v9 }
  0x19   :  { %351 = vmatpush.msra.mxu0 %v227_v44  ;;  %529 = vmatpush.msra.mxu2 %v228_v45  ;;  %v184_v18 = vunpack.c.h.bf16 %v3512_v16  ;;  %v3513_v19 = vld [vmem:[%s6695_s4 + $0xf8] sm:$0xff]  ;;  %v118_v21 = vld [vmem:[%s6696_s0 + $0xa0] sm:$0xff]  ;;  %v139_v25 = vld [vmem:[%s6696_s0 + $0x148] sm:$0xff]  ;;  %v183_v29 = vunpack.c.l.bf16 %v3512_v16 }
  0x1a   :  { %3531 = vmatmul.msk.f32.gmra.mxu1 %vm267_vm0, %v174_v46  ;;  %3555 = vmatmul.msk.f32.gmra.mxu3 %vm267_vm0, %v174_v46  ;;  %v186_v23 = vunpack.c.h.bf16 %v3513_v19  ;;  %v3514_v24 = vld [vmem:[%s6695_s4 + $0x100] sm:$0xff]  ;;  %v117_v27 = vld [vmem:[%s6696_s0 + $0x98] sm:$0xff]  ;;  %v116_v28 = vld [vmem:[%s6696_s0 + $0x90] sm:$0xff]  ;;  %v185_v32 = vunpack.c.l.bf16 %v3513_v19 }
  0x1b   :  { %352 = vmatpush.msra.mxu0 %v225_v47  ;;  %530 = vmatpush.msra.mxu2 %v226_v48  ;;  %v138_v26 = vld [vmem:[%s6696_s0 + $0x140] sm:$0xff]  ;;  %v188_v30 = vunpack.c.h.bf16 %v3514_v24  ;;  %v3515_v31 = vld [vmem:[%s6695_s4 + $0x108] sm:$0xff]  ;;  %v3516_v34 = vld [vmem:[%s6695_s4 + $0x110] sm:$0xff]  ;;  %v187_v37 = vunpack.c.l.bf16 %v3514_v24 }
  0x1c   :  { %771 = vmatpush.msrb.mxu1 %v122_v6  ;;  %868 = vmatpush.msrb.mxu3 %v138_v26  ;;  %v190_v33 = vunpack.c.h.bf16 %v3515_v31  ;;  %v115_v35 = vld [vmem:[%s6696_s0 + $0x88] sm:$0xff]  ;;  %v114_v36 = vld [vmem:[%s6696_s0 + $0x80] sm:$0xff]  ;;  %v192_v38 = vunpack.c.h.bf16 %v3516_v34  ;;  %v3517_v39 = vld [vmem:[%s6695_s4 + $0x118] sm:$0xff]  ;;  %v189_v44 = vunpack.c.l.bf16 %v3515_v31  ;;  %v191_v47 = vunpack.c.l.bf16 %v3516_v34 }
  0x1d   :  { %353 = vmatpush.msra.mxu0 %v223_v49  ;;  %531 = vmatpush.msra.mxu2 %v224_v50  ;;  %v137_v40 = vld [vmem:[%s6696_s0 + $0x138] sm:$0xff]  ;;  %v136_v41 = vld [vmem:[%s6696_s0 + $0x130] sm:$0xff]  ;;  %v194_v45 = vunpack.c.h.bf16 %v3517_v39  ;;  %v3518_v46 = vld [vmem:[%s6695_s4 + $0x120] sm:$0xff]  ;;  %v193_v52 = vunpack.c.l.bf16 %v3517_v39 }
  0x1e   :  { %772 = vmatpush.msrb.mxu1 %v120_v13  ;;  %v113_v42 = vld [vmem:[%s6696_s0 + $0x78] sm:$0xff]  ;;  %869 = vmatpush.msrb.mxu3 %v136_v41  ;;  %v112_v43 = vld [vmem:[%s6696_s0 + $0x70] sm:$0xff]  ;;  %v196_v48 = vunpack.c.h.bf16 %v3518_v46  ;;  %v3519_v49 = vld [vmem:[%s6695_s4 + $0x128] sm:$0xff] }
  0x1f   :  { %354 = vmatpush.msra.mxu0 %v221_v53  ;;  %532 = vmatpush.msra.mxu2 %v222_v54  ;;  %v111_v50 = vld [vmem:[%s6696_s0 + $0x68] sm:$0xff]  ;;  %v110_v51 = vld [vmem:[%s6696_s0 + $0x60] sm:$0xff]  ;;  %v198_v53 = vunpack.c.h.bf16 %v3519_v49  ;;  %v3520_v54 = vld [vmem:[%s6695_s4 + $0x130] sm:$0xff]  ;;  %v197_v62 = vunpack.c.l.bf16 %v3519_v49 }
  0x20   :  { %773 = vmatpush.msrb.mxu1 %v118_v21  ;;  %v135_v55 = vld [vmem:[%s6696_s0 + $0x128] sm:$0xff]  ;;  %v105_v13 = vld [vmem:[%s6696_s0 + $0x38] sm:$0xff]  ;;  %v3526_v31 = vld [vmem:[%s6695_s4 + $0x160] sm:$0xff] }
  0x21   :  { %355 = vmatpush.msra.mxu0 %v219_v56  ;;  %533 = vmatpush.msra.mxu2 %v220_v57  ;;  %v134_v56 = vld [vmem:[%s6696_s0 + $0x120] sm:$0xff]  ;;  %v195_v57 = vunpack.c.l.bf16 %v3518_v46  ;;  %v3523_v6 = vld [vmem:[%s6695_s4 + $0x148] sm:$0xff]  ;;  %v3525_v21 = vld [vmem:[%s6695_s4 + $0x158] sm:$0xff] }
  0x22   :  { %356 = vmatmul.f32.vlgmr.msra.gmra.mxu0 %v171_v58  ;;  %3532 = vmatmul.msk.f32.gmra.mxu1 %vm267_vm0, %v176_v59  ;;  %v206_v11 = vunpack.c.h.bf16 %v3523_v6  ;;  %v210_v26 = vunpack.c.h.bf16 %v3525_v21  ;;  %v100_v41 = vld [vmem:[%s6696_s0 + $0x10] sm:$0xff] }
  0x23   :  { %534 = vmatmul.f32.vlgmr.msra.gmra.mxu2 %v171_v58  ;;  %3556 = vmatmul.msk.f32.gmra.mxu3 %vm267_vm0, %v176_v59  ;;  %v200_v58 = vunpack.c.h.bf16 %v3520_v54  ;;  %v109_v59 = vld [vmem:[%s6696_s0 + $0x58] sm:$0xff] }
  0x24   :  { %1043 = vmatpush.msrb.mxu2 %v145_v60  ;;  %946 = vmatpush.msrb.mxu0 %v129_v61  ;;  %v108_v60 = vld [vmem:[%s6696_s0 + $0x50] sm:$0xff]  ;;  %v3521_v61 = vld [vmem:[%s6695_s4 + $0x138] sm:$0xff] }
  0x25   :  { %774 = vmatpush.msrb.mxu1 %v116_v28  ;;  %870 = vmatpush.msrb.mxu3 %v134_v56  ;;  %v211_v56 = vunpack.c.l.bf16 %v3526_v31 }
  0x26   :  { %947 = vmatpush.msrb.mxu0 %v127_v63  ;;  %1044 = vmatpush.msrb.mxu2 %v143_v0  ;;  %v202_v63 = vunpack.c.h.bf16 %v3521_v61  ;;  %v3522_v0 = vld [vmem:[%s6695_s4 + $0x140] sm:$0xff] }
  0x27   :  { %775 = vmatpush.msrb.mxu1 %v114_v36 }
  0x28   :  { %948 = vmatpush.msrb.mxu0 %v125_v1  ;;  %1045 = vmatpush.msrb.mxu2 %v141_v10  ;;  %v107_v1 = vld [vmem:[%s6696_s0 + $0x48] sm:$0xff]  ;;  %v201_v10 = vunpack.c.l.bf16 %v3521_v61  ;;  %v3529_v61 = vld [vmem:[%s6695_s4 + $0x178] sm:$0xff] }
  0x29   :  { %776 = vmatpush.msrb.mxu1 %v112_v43  ;;  %v98_v43 = vld [vmem:[%s6696_s0] sm:$0xff] }
  0x2a   :  { %359 = vmatmul.f32.gmra.mxu0 %v173_v2  ;;  %3533 = vmatmul.msk.f32.gmra.mxu1 %vm267_vm0, %v178_v3 }
  0x2b   :  { %537 = vmatmul.f32.gmra.mxu2 %v173_v2  ;;  %3557 = vmatmul.msk.f32.gmra.mxu3 %vm267_vm0, %v178_v3  ;;  %v199_v2 = vunpack.c.l.bf16 %v3520_v54  ;;  %v204_v3 = vunpack.c.h.bf16 %v3522_v0 }
  0x2c   :  { %949 = vmatpush.msrb.mxu0 %v123_v5  ;;  %1046 = vmatpush.msrb.mxu2 %v139_v25  ;;  %v106_v5 = vld [vmem:[%s6696_s0 + $0x40] sm:$0xff]  ;;  %v205_v25 = vunpack.c.l.bf16 %v3523_v6 }
  0x2d   :  { %777 = vmatpush.msrb.mxu1 %v110_v51 }
  0x2e   :  { %950 = vmatpush.msrb.mxu0 %v121_v12  ;;  %1047 = vmatpush.msrb.mxu2 %v137_v40 }
  0x2f   :  { %778 = vmatpush.msrb.mxu1 %v108_v60 }
  0x30   :  { %951 = vmatpush.msrb.mxu0 %v119_v20  ;;  %1048 = vmatpush.msrb.mxu2 %v135_v55 }
  0x31   :  { %779 = vmatpush.msrb.mxu1 %v106_v5 }
  0x32   :  { %362 = vmatmul.f32.gmra.mxu0 %v175_v7  ;;  %3534 = vmatmul.msk.f32.gmra.mxu1 %vm267_vm0, %v180_v8 }
  0x33   :  { %540 = vmatmul.f32.gmra.mxu2 %v175_v7  ;;  %3558 = vmatmul.msk.f32.gmra.mxu3 %vm267_vm0, %v180_v8  ;;  %v133_v7 = vld [vmem:[%s6696_s0 + $0x118] sm:$0xff]  ;;  %v132_v8 = vld [vmem:[%s6696_s0 + $0x110] sm:$0xff] }
  0x34   :  { %952 = vmatpush.msrb.mxu0 %v117_v27  ;;  %1049 = vmatpush.msrb.mxu2 %v133_v7 }
  0x35   :  { %871 = vmatpush.msrb.mxu3 %v132_v8  ;;  %v1228_v8 = vld [vmem:[%s6697_s2 + $0xf8] sm:$0xff] }
  0x36   :  { %953 = vmatpush.msrb.mxu0 %v115_v35 }
  0x38   :  { %954 = vmatpush.msrb.mxu0 %v113_v42  ;;  %v101_v42 = vld [vmem:[%s6696_s0 + $0x18] sm:$0xff] }
  0x3a   :  { %365 = vmatmul.f32.gmra.mxu0 %v177_v14  ;;  %3535 = vmatmul.msk.f32.gmra.mxu1 %vm267_vm0, %v182_v15 }
  0x3b   :  { %543 = vmatmul.f32.gmra.mxu2 %v177_v14  ;;  %3559 = vmatmul.msk.f32.gmra.mxu3 %vm267_vm0, %v182_v15  ;;  %v104_v14 = vld [vmem:[%s6696_s0 + $0x30] sm:$0xff] }
  0x3c   :  { %955 = vmatpush.msrb.mxu0 %v111_v50  ;;  %780 = vmatpush.msrb.mxu1 %v104_v14  ;;  %v3524_v15 = vld [vmem:[%s6695_s4 + $0x150] sm:$0xff] }
  0x3d   :  { %v207_v36 = vunpack.c.l.bf16 %v3524_v15 }
  0x3e   :  { %956 = vmatpush.msrb.mxu0 %v109_v59 }
  0x40   :  { %957 = vmatpush.msrb.mxu0 %v107_v1 }
  0x42   :  { %368 = vmatmul.f32.gmra.mxu0 %v179_v17  ;;  %3536 = vmatmul.msk.f32.gmra.mxu1 %vm267_vm0, %v184_v18 }
  0x43   :  { %546 = vmatmul.f32.gmra.mxu2 %v179_v17  ;;  %3560 = vmatmul.msk.f32.gmra.mxu3 %vm267_vm0, %v184_v18  ;;  %v203_v17 = vunpack.c.l.bf16 %v3522_v0  ;;  %v208_v18 = vunpack.c.h.bf16 %v3524_v15 }
  0x44   :  { %958 = vmatpush.msrb.mxu0 %v105_v13 }
  0x4a   :  { %371 = vmatmul.f32.gmra.mxu0 %v181_v22  ;;  %3537 = vmatmul.msk.f32.gmra.mxu1 %vm267_vm0, %v186_v23 }
  0x4b   :  { %549 = vmatmul.f32.gmra.mxu2 %v181_v22  ;;  %3561 = vmatmul.msk.f32.gmra.mxu3 %vm267_vm0, %v186_v23  ;;  %v103_v22 = vld [vmem:[%s6696_s0 + $0x28] sm:$0xff] }
  0x4c   :  { %959 = vmatpush.msrb.mxu0 %v103_v22  ;;  %v27_v22 = vld [vmem:[%s6695_s4 + $0x8] sm:$0xff] }
  0x4e   :  { %960 = vmatpush.msrb.mxu0 %v101_v42 }
  0x52   :  { %374 = vmatmul.f32.gmra.mxu0 %v183_v29  ;;  %3538 = vmatmul.msk.f32.gmra.mxu1 %vm267_vm0, %v188_v30 }
  0x53   :  { %552 = vmatmul.f32.gmra.mxu2 %v183_v29  ;;  %3562 = vmatmul.msk.f32.gmra.mxu3 %vm267_vm0, %v188_v30  ;;  %v102_v30 = vld [vmem:[%s6696_s0 + $0x20] sm:$0xff] }
  0x54   :  { %781 = vmatpush.msrb.mxu1 %v102_v30  ;;  %v52_v30 = vunpack.c.l.bf16 %v27_v22 }
  0x56   :  { %782 = vmatpush.msrb.mxu1 %v100_v41  ;;  %v1241_v41 = vld [vmem:[%s6697_s2 + $0x160] sm:$0xff] }
  0x58   :  { %783 = vmatpush.msrb.mxu1 %v98_v43 }
  0x5a   :  { %377 = vmatmul.f32.gmra.mxu0 %v185_v32  ;;  %3539 = vmatmul.msk.f32.gmra.mxu1 %vm267_vm0, %v190_v33 }
  0x5b   :  { %555 = vmatmul.f32.gmra.mxu2 %v185_v32  ;;  %3563 = vmatmul.msk.f32.gmra.mxu3 %vm267_vm0, %v190_v33  ;;  %v131_v32 = vld [vmem:[%s6696_s0 + $0x108] sm:$0xff]  ;;  %v130_v33 = vld [vmem:[%s6696_s0 + $0x100] sm:$0xff] }
  0x5c   :  { %1050 = vmatpush.msrb.mxu2 %v131_v32  ;;  %872 = vmatpush.msrb.mxu3 %v130_v33 }
  0x62   :  { %380 = vmatmul.f32.gmra.mxu0 %v187_v37  ;;  %3540 = vmatmul.msk.f32.gmra.mxu1 %vm267_vm0, %v192_v38 }
  0x63   :  { %558 = vmatmul.f32.gmra.mxu2 %v187_v37  ;;  %3564 = vmatmul.msk.f32.gmra.mxu3 %vm267_vm0, %v192_v38  ;;  %v212_v37 = vunpack.c.h.bf16 %v3526_v31 }
  0x6a   :  { %383 = vmatmul.f32.gmra.mxu0 %v189_v44  ;;  %3541 = vmatmul.msk.f32.gmra.mxu1 %vm267_vm0, %v194_v45 }
  0x6b   :  { %561 = vmatmul.f32.gmra.mxu2 %v189_v44  ;;  %3565 = vmatmul.msk.f32.gmra.mxu3 %vm267_vm0, %v194_v45  ;;  %v3527_v44 = vld [vmem:[%s6695_s4 + $0x168] sm:$0xff] }
  0x72   :  { %386 = vmatmul.f32.gmra.mxu0 %v191_v47  ;;  %3542 = vmatmul.msk.f32.gmra.mxu1 %vm267_vm0, %v196_v48 }
  0x73   :  { %564 = vmatmul.f32.gmra.mxu2 %v191_v47  ;;  %3566 = vmatmul.msk.f32.gmra.mxu3 %vm267_vm0, %v196_v48  ;;  %v209_v47 = vunpack.c.l.bf16 %v3525_v21  ;;  %v214_v48 = vunpack.c.h.bf16 %v3527_v44 }
  0x7a   :  { %389 = vmatmul.f32.gmra.mxu0 %v193_v52  ;;  %3543 = vmatmul.msk.f32.gmra.mxu1 %vm267_vm0, %v198_v53 }
  0x7b   :  { %567 = vmatmul.f32.gmra.mxu2 %v193_v52  ;;  %3567 = vmatmul.msk.f32.gmra.mxu3 %vm267_vm0, %v198_v53  ;;  %v3528_v52 = vld [vmem:[%s6695_s4 + $0x170] sm:$0xff]  ;;  %v99_v53 = vld [vmem:[%s6696_s0 + $0x8] sm:$0xff] }
  0x7c   :  { %961 = vmatpush.msrb.mxu0 %v99_v53  ;;  %v215_v14 = vunpack.c.l.bf16 %v3528_v52  ;;  %v1223_v53 = vld [vmem:[%s6697_s2 + $0xd0] sm:$0xff] }
  0x7e   :  { %1495 = vmatpush.msra.mxu0 %v1228_v8 }
  0x82   :  { %392 = vmatmul.f32.gmra.mxu0 %v195_v57  ;;  %3544 = vmatmul.msk.f32.gmra.mxu1 %vm267_vm0, %v200_v58 }
  0x83   :  { %570 = vmatmul.f32.gmra.mxu2 %v195_v57  ;;  %3568 = vmatmul.msk.f32.gmra.mxu3 %vm267_vm0, %v200_v58  ;;  %v216_v57 = vunpack.c.h.bf16 %v3528_v52  ;;  %v1224_v52 = vld [vmem:[%s6697_s2 + $0xd8] sm:$0xff] }
  0x8a   :  { %395 = vmatmul.f32.gmra.mxu0 %v197_v62  ;;  %3545 = vmatmul.msk.f32.gmra.mxu1 %vm267_vm0, %v202_v63 }
  0x8b   :  { %573 = vmatmul.f32.gmra.mxu2 %v197_v62  ;;  %3569 = vmatmul.msk.f32.gmra.mxu3 %vm267_vm0, %v202_v63  ;;  %v1244_v62 = vld [vmem:[%s6697_s2 + $0x178] sm:$0xff]  ;;  %v1243_v63 = vld [vmem:[%s6697_s2 + $0x170] sm:$0xff] }
  0x8c   :  { %1592 = vmatpush.msra.mxu2 %v1244_v62  ;;  %1414 = vmatpush.msra.mxu3 %v1243_v63 }
  0x8e   :  { %1415 = vmatpush.msra.mxu3 %v1241_v41  ;;  %v1219_v41 = vld [vmem:[%s6697_s2 + $0xb0] sm:$0xff] }
  0x8f   :  { %v4227_v4 = vpop.f32.mrf.mxu1 }
  0x92   :  { %398 = vmatmul.f32.gmra.mxu0 %v199_v2  ;;  %3546 = vmatmul.msk.f32.gmra.mxu1 %vm267_vm0, %v204_v3 }
  0x93   :  { %576 = vmatmul.f32.gmra.mxu2 %v199_v2  ;;  %3570 = vmatmul.msk.f32.gmra.mxu3 %vm267_vm0, %v204_v3  ;;  %v213_v2 = vunpack.c.l.bf16 %v3527_v44  ;;  %v218_v3 = vunpack.c.h.bf16 %v3529_v61 }
  0x95   :  { %v624_v9 = vpop.f32.mrf.mxu3 }
  0x97   :  { %v4243_v12 = vpop.f32.mrf.mxu1 }
  0x9a   :  { %401 = vmatmul.f32.gmra.mxu0 %v201_v10  ;;  %3547 = vmatmul.msk.f32.gmra.mxu1 %vm267_vm0, %v206_v11 }
  0x9b   :  { %579 = vmatmul.f32.gmra.mxu2 %v201_v10  ;;  %3571 = vmatmul.msk.f32.gmra.mxu3 %vm267_vm0, %v206_v11  ;;  %v26_v10 = vld [vmem:[%s6695_s4] sm:$0xff] }
  0x9c   :  { %v50_v15 = vunpack.c.l.bf16 %v26_v10  ;;  %v51_v21 = vunpack.c.h.bf16 %v26_v10 }
  0x9d   :  { %v627_v16 = vpop.f32.mrf.mxu3 }
  0x9f   :  { %v4256_v19 = vpop.f32.mrf.mxu0  ;;  %v4258_v20 = vpop.f32.mrf.mxu1 }
  0xa2   :  { %404 = vmatmul.f32.gmra.mxu0 %v203_v17  ;;  %3548 = vmatmul.msk.f32.gmra.mxu1 %vm267_vm0, %v208_v18 }
  0xa3   :  { %582 = vmatmul.f32.gmra.mxu2 %v203_v17  ;;  %3572 = vmatmul.msk.f32.gmra.mxu3 %vm267_vm0, %v208_v18 }
  0xa6   :  { %v535_v23 = vpop.f32.mrf.mxu2  ;;  %v630_v24 = vpop.f32.mrf.mxu3 }
  0xa7   :  { %v4268_v27 = vadd.f32 %v624_v9, %v535_v23  ;;  %v4270_v28 = vpop.f32.mrf.mxu0  ;;  %v4272_v29 = vpop.f32.mrf.mxu1  ;;  %v1227_v9 = vld [vmem:[%s6697_s2 + $0xf0] sm:$0xff]  ;;  %v1226_v23 = vld [vmem:[%s6697_s2 + $0xe8] sm:$0xff] }
  0xa8   :  { %1317 = vmatpush.msra.mxu1 %v1227_v9  ;;  %1496 = vmatpush.msra.mxu0 %v1226_v23  ;;  %v1239_v23 = vld [vmem:[%s6697_s2 + $0x150] sm:$0xff] }
  0xa9   :  { %1416 = vmatpush.msra.mxu3 %v1239_v23  ;;  %v1237_v23 = vld [vmem:[%s6697_s2 + $0x140] sm:$0xff] }
  0xaa   :  { %407 = vmatmul.f32.gmra.mxu0 %v205_v25  ;;  %3549 = vmatmul.msk.f32.gmra.mxu1 %vm267_vm0, %v210_v26 }
  0xab   :  { %585 = vmatmul.f32.gmra.mxu2 %v205_v25  ;;  %3573 = vmatmul.msk.f32.gmra.mxu3 %vm267_vm0, %v210_v26  ;;  %v217_v26 = vunpack.c.l.bf16 %v3529_v61 }
  0xac   :  { %1497 = vmatpush.msra.mxu0 %v1224_v52  ;;  %1417 = vmatpush.msra.mxu3 %v1237_v23 }
  0xae   :  { %v538_v34 = vpop.f32.mrf.mxu2  ;;  %v633_v35 = vpop.f32.mrf.mxu3 }
  0xaf   :  { %v4288_v38 = vadd.f32 %v627_v16, %v538_v34  ;;  %v4290_v39 = vpop.f32.mrf.mxu0  ;;  %v4292_v40 = vpop.f32.mrf.mxu1  ;;  %v53_v34 = vunpack.c.h.bf16 %v27_v22  ;;  %v1240_v22 = vld [vmem:[%s6697_s2 + $0x158] sm:$0xff] }
  0xb2   :  { %410 = vmatmul.f32.gmra.mxu0 %v207_v36  ;;  %3550 = vmatmul.msk.f32.gmra.mxu1 %vm267_vm0, %v212_v37 }
  0xb3   :  { %588 = vmatmul.f32.gmra.mxu2 %v207_v36  ;;  %3574 = vmatmul.msk.f32.gmra.mxu3 %vm267_vm0, %v212_v37  ;;  %v28_v36 = vld [vmem:[%s6695_s4 + $0x10] sm:$0xff]  ;;  %v1242_v37 = vld [vmem:[%s6697_s2 + $0x168] sm:$0xff] }
  0xb4   :  { %1593 = vmatpush.msra.mxu2 %v1242_v37  ;;  %v54_v44 = vunpack.c.l.bf16 %v28_v36  ;;  %v1220_v37 = vld [vmem:[%s6697_s2 + $0xb8] sm:$0xff] }
  0xb6   :  { %v541_v45 = vpop.f32.mrf.mxu2  ;;  %v636_v46 = vpop.f32.mrf.mxu3  ;;  %1594 = vmatpush.msra.mxu2 %v1240_v22  ;;  %v1238_v22 = vld [vmem:[%s6697_s2 + $0x148] sm:$0xff] }
  0xb7   :  { %v4308_v49 = vadd.f32 %v630_v24, %v541_v45  ;;  %v4310_v50 = vpop.f32.mrf.mxu0  ;;  %v4312_v51 = vpop.f32.mrf.mxu1 }
  0xb8   :  { %1595 = vmatpush.msra.mxu2 %v1238_v22 }
  0xba   :  { %413 = vmatmul.f32.gmra.mxu0 %v209_v47  ;;  %3551 = vmatmul.msk.f32.gmra.mxu1 %vm267_vm0, %v214_v48 }
  0xbb   :  { %591 = vmatmul.f32.gmra.mxu2 %v209_v47  ;;  %3575 = vmatmul.msk.f32.gmra.mxu3 %vm267_vm0, %v214_v48  ;;  %v55_v48 = vunpack.c.h.bf16 %v28_v36 }
  0xbe   :  { %v544_v54 = vpop.f32.mrf.mxu2  ;;  %v639_v55 = vpop.f32.mrf.mxu3 }
  0xbf   :  { %v4322_v58 = vadd.f32 %v633_v35, %v544_v54  ;;  %v4324_v59 = vpop.f32.mrf.mxu0  ;;  %v4326_v60 = vpop.f32.mrf.mxu1  ;;  %v1225_v35 = vld [vmem:[%s6697_s2 + $0xe0] sm:$0xff]  ;;  %v29_v54 = vld [vmem:[%s6695_s4 + $0x18] sm:$0xff] }
  0xc0   :  { %1318 = vmatpush.msra.mxu1 %v1225_v35 }
  0xc2   :  { %416 = vmatmul.f32.gmra.mxu0 %v211_v56  ;;  %3552 = vmatmul.msk.f32.gmra.mxu1 %vm267_vm0, %v216_v57 }
  0xc3   :  { %594 = vmatmul.f32.gmra.mxu2 %v211_v56  ;;  %3576 = vmatmul.msk.f32.gmra.mxu3 %vm267_vm0, %v216_v57  ;;  %v56_v57 = vunpack.c.l.bf16 %v29_v54 }
  0xc4   :  { %1319 = vmatpush.msra.mxu1 %v1223_v53 }
  0xc6   :  { %v547_v0 = vpop.f32.mrf.mxu2  ;;  %v642_v1 = vpop.f32.mrf.mxu3 }
  0xc7   :  { %v4339_v5 = vadd.f32 %v636_v46, %v547_v0  ;;  %v4341_v6 = vpop.f32.mrf.mxu0  ;;  %v4343_v7 = vpop.f32.mrf.mxu1  ;;  %v57_v0 = vunpack.c.h.bf16 %v29_v54 }
  0xca   :  { %419 = vmatmul.f32.gmra.mxu0 %v213_v2  ;;  %3553 = vmatmul.msk.f32.gmra.mxu1 %vm267_vm0, %v218_v3 }
  0xcb   :  { %597 = vmatmul.f32.gmra.mxu2 %v213_v2  ;;  %3577 = vmatmul.msk.f32.gmra.mxu3 %vm267_vm0, %v218_v3  ;;  %v1222_v2 = vld [vmem:[%s6697_s2 + $0xc8] sm:$0xff] }
  0xcc   :  { %1498 = vmatpush.msra.mxu0 %v1222_v2 }
  0xce   :  { %v550_v11 = vpop.f32.mrf.mxu2  ;;  %v645_v13 = vpop.f32.mrf.mxu3  ;;  %1499 = vmatpush.msra.mxu0 %v1220_v37 }
  0xcf   :  { %v4356_v16 = vadd.f32 %v639_v55, %v550_v11  ;;  %v4358_v17 = vpop.f32.mrf.mxu0  ;;  %v4360_v18 = vpop.f32.mrf.mxu1 }
  0xd2   :  { %422 = vmatmul.f32.gmra.mxu0 %v215_v14  ;;  %784 = vmatmul.f32.vlgmr.msrb.gmra.mxu1 %v50_v15 }
  0xd3   :  { %600 = vmatmul.f32.gmra.mxu2 %v215_v14  ;;  %3578 = vmatmul.msk.f32.vlgmr.msrb.gmra.mxu3 %vm267_vm0, %v51_v21 }
  0xd6   :  { %v553_v24 = vpop.f32.mrf.mxu2  ;;  %v648_v25 = vpop.f32.mrf.mxu3 }
  0xd7   :  { %v4369_v31 = vadd.f32 %v642_v1, %v553_v24  ;;  %v4371_v32 = vpop.f32.mrf.mxu0  ;;  %v4373_v33 = vpop.f32.mrf.mxu1  ;;  %v30_v1 = vld [vmem:[%s6695_s4 + $0x20] sm:$0xff] }
  0xd8   :  { %v58_v9 = vunpack.c.l.bf16 %v30_v1  ;;  %v59_v14 = vunpack.c.h.bf16 %v30_v1 }
  0xda   :  { %425 = vmatmul.f32.gmra.mxu0 %v217_v26  ;;  %787 = vmatmul.f32.gmra.mxu1 %v52_v30 }
  0xdb   :  { %603 = vmatmul.f32.gmra.mxu2 %v217_v26  ;;  %3579 = vmatmul.msk.f32.gmra.mxu3 %vm267_vm0, %v53_v34 }
  0xde   :  { %v556_v42 = vpop.f32.mrf.mxu2  ;;  %v651_v43 = vpop.f32.mrf.mxu3 }
  0xdf   :  { %v4388_v45 = vadd.f32 %v645_v13, %v556_v42  ;;  %v4390_v46 = vpop.f32.mrf.mxu0  ;;  %v4392_v47 = vpop.f32.mrf.mxu1  ;;  %v32_v42 = vld [vmem:[%s6695_s4 + $0x30] sm:$0xff] }
  0xe2   :  { %790 = vmatmul.f32.gmra.mxu1 %v54_v44  ;;  %962 = vmatmul.f32.vlgmr.msrb.gmra.mxu0 %v50_v15  ;;  %v1221_v15 = vld [vmem:[%s6697_s2 + $0xc0] sm:$0xff] }
  0xe3   :  { %3580 = vmatmul.msk.f32.gmra.mxu3 %vm267_vm0, %v55_v48  ;;  %3602 = vmatmul.msk.f32.vlgmr.msrb.gmra.mxu2 %vm267_vm0, %v51_v21  ;;  %v31_v21 = vld [vmem:[%s6695_s4 + $0x28] sm:$0xff] }
  0xe4   :  { %1320 = vmatpush.msra.mxu1 %v1221_v15  ;;  %v60_v26 = vunpack.c.l.bf16 %v31_v21  ;;  %v61_v36 = vunpack.c.h.bf16 %v31_v21  ;;  %v34_v21 = vld [vmem:[%s6695_s4 + $0x40] sm:$0xff] }
  0xe6   :  { %v559_v55 = vpop.f32.mrf.mxu2  ;;  %v654_v56 = vpop.f32.mrf.mxu3  ;;  %1321 = vmatpush.msra.mxu1 %v1219_v41 }
  0xe7   :  { %v4405_v61 = vadd.f32 %v648_v25, %v559_v55  ;;  %v4407_v62 = vpop.f32.mrf.mxu0  ;;  %v4409_v63 = vpop.f32.mrf.mxu1  ;;  %v63_v55 = vunpack.c.h.bf16 %v32_v42 }
  0xea   :  { %793 = vmatmul.f32.gmra.mxu1 %v56_v57  ;;  %965 = vmatmul.f32.gmra.mxu0 %v52_v30 }
  0xeb   :  { %3581 = vmatmul.msk.f32.gmra.mxu3 %vm267_vm0, %v57_v0  ;;  %3603 = vmatmul.msk.f32.gmra.mxu2 %vm267_vm0, %v53_v34 }
  0xee   :  { %v562_v3 = vpop.f32.mrf.mxu2  ;;  %v657_v8 = vpop.f32.mrf.mxu3 }
  0xef   :  { %v4419_v10 = vadd.f32 %v651_v43, %v562_v3  ;;  %v4421_v11 = vpop.f32.mrf.mxu0  ;;  %v4423_v13 = vpop.f32.mrf.mxu1 }
  0xf2   :  { %796 = vmatmul.f32.gmra.mxu1 %v58_v9  ;;  %968 = vmatmul.f32.gmra.mxu0 %v54_v44 }
  0xf3   :  { %3582 = vmatmul.msk.f32.gmra.mxu3 %vm267_vm0, %v59_v14  ;;  %3604 = vmatmul.msk.f32.gmra.mxu2 %vm267_vm0, %v55_v48  ;;  %v62_v48 = vunpack.c.l.bf16 %v32_v42  ;;  %v67_v42 = vunpack.c.h.bf16 %v34_v21 }
  0xf6   :  { %v565_v24 = vpop.f32.mrf.mxu2  ;;  %v660_v25 = vpop.f32.mrf.mxu3 }
  0xf7   :  { %v4439_v30 = vadd.f32 %v654_v56, %v565_v24  ;;  %v4441_v34 = vpop.f32.mrf.mxu0  ;;  %v4443_v35 = vpop.f32.mrf.mxu1  ;;  %v33_v56 = vld [vmem:[%s6695_s4 + $0x38] sm:$0xff] }
  0xf8   :  { %v64_v2 = vunpack.c.l.bf16 %v33_v56  ;;  %v65_v15 = vunpack.c.h.bf16 %v33_v56  ;;  %v1215_v56 = vld [vmem:[%s6697_s2 + $0x90] sm:$0xff] }
  0xfa   :  { %799 = vmatmul.f32.gmra.mxu1 %v60_v26  ;;  %971 = vmatmul.f32.gmra.mxu0 %v56_v57  ;;  %v1218_v57 = vld [vmem:[%s6697_s2 + $0xa8] sm:$0xff] }
  0xfb   :  { %3583 = vmatmul.msk.f32.gmra.mxu3 %vm267_vm0, %v61_v36  ;;  %3605 = vmatmul.msk.f32.gmra.mxu2 %vm267_vm0, %v57_v0 }
  0xfc   :  { %1500 = vmatpush.msra.mxu0 %v1218_v57 }
  0xfe   :  { %v568_v43 = vpop.f32.mrf.mxu2  ;;  %v663_v44 = vpop.f32.mrf.mxu3 }
  0xff   :  { %v4456_v52 = vadd.f32 %v657_v8, %v568_v43  ;;  %v4458_v53 = vpop.f32.mrf.mxu0  ;;  %v4460_v54 = vpop.f32.mrf.mxu1  ;;  %v1216_v43 = vld [vmem:[%s6697_s2 + $0x98] sm:$0xff] }
 0x100   :  { %1501 = vmatpush.msra.mxu0 %v1216_v43 }
 0x102   :  { %802 = vmatmul.f32.gmra.mxu1 %v62_v48  ;;  %974 = vmatmul.f32.gmra.mxu0 %v58_v9 }
 0x103   :  { %3584 = vmatmul.msk.f32.gmra.mxu3 %vm267_vm0, %v63_v55  ;;  %3606 = vmatmul.msk.f32.gmra.mxu2 %vm267_vm0, %v59_v14  ;;  %v1217_v14 = vld [vmem:[%s6697_s2 + $0xa0] sm:$0xff] }
 0x104   :  { %1322 = vmatpush.msra.mxu1 %v1217_v14 }
 0x106   :  { %v571_v0 = vpop.f32.mrf.mxu2  ;;  %v666_v1 = vpop.f32.mrf.mxu3  ;;  %1323 = vmatpush.msra.mxu1 %v1215_v56 }
 0x107   :  { %v4470_v3 = vadd.f32 %v660_v25, %v571_v0  ;;  %v4472_v8 = vpop.f32.mrf.mxu0  ;;  %v4474_v9 = vpop.f32.mrf.mxu1 }
 0x10a   :  { %805 = vmatmul.f32.gmra.mxu1 %v64_v2  ;;  %977 = vmatmul.f32.gmra.mxu0 %v60_v26  ;;  %v66_v26 = vunpack.c.l.bf16 %v34_v21 }
 0x10b   :  { %3585 = vmatmul.msk.f32.gmra.mxu3 %vm267_vm0, %v65_v15  ;;  %3607 = vmatmul.msk.f32.gmra.mxu2 %vm267_vm0, %v61_v36 }
 0x10e   :  { %v574_v24 = vpop.f32.mrf.mxu2  ;;  %v669_v25 = vpop.f32.mrf.mxu3 }
 0x10f   :  { %v4490_v37 = vadd.f32 %v663_v44, %v574_v24  ;;  %v4492_v36 = vpop.f32.mrf.mxu0  ;;  %v4494_v41 = vpop.f32.mrf.mxu1  ;;  %v35_v44 = vld [vmem:[%s6695_s4 + $0x48] sm:$0xff] }
 0x110   :  { %6739 = vst [vmem:[#allocation3_spill] sm:$0xff] %v4494_v41  ;;  %v68_v14 = vunpack.c.l.bf16 %v35_v44  ;;  %v69_v24 = vunpack.c.h.bf16 %v35_v44  ;;  %v1212_v41 = vld [vmem:[%s6697_s2 + $0x78] sm:$0xff] }
 0x111   :  { %6738 = vst [vmem:[#allocation2_spill] sm:$0xff] %v4490_v37  ;;  %v1204_v37 = vld [vmem:[%s6697_s2 + $0x38] sm:$0xff] }
 0x112   :  { %808 = vmatmul.f32.gmra.mxu1 %v66_v26  ;;  %980 = vmatmul.f32.gmra.mxu0 %v62_v48  ;;  %v36_v48 = vld [vmem:[%s6695_s4 + $0x50] sm:$0xff] }
 0x113   :  { %3586 = vmatmul.msk.f32.gmra.mxu3 %vm267_vm0, %v67_v42  ;;  %3608 = vmatmul.msk.f32.gmra.mxu2 %vm267_vm0, %v63_v55  ;;  %v1214_v55 = vld [vmem:[%s6697_s2 + $0x88] sm:$0xff]  ;;  %v70_v56 = vunpack.c.l.bf16 %v36_v48 }
 0x114   :  { %1502 = vmatpush.msra.mxu0 %v1214_v55  ;;  %v1236_v55 = vld [vmem:[%s6697_s2 + $0x138] sm:$0xff] }
 0x115   :  { %1596 = vmatpush.msra.mxu2 %v1236_v55 }
 0x116   :  { %v577_v57 = vpop.f32.mrf.mxu2  ;;  %v672_v0 = vpop.f32.mrf.mxu3  ;;  %1503 = vmatpush.msra.mxu0 %v1212_v41 }
 0x117   :  { %v4507_v21 = vadd.f32 %v666_v1, %v577_v57  ;;  %v4509_v22 = vpop.f32.mrf.mxu0  ;;  %v4511_v23 = vpop.f32.mrf.mxu1 }
 0x118   :  { %6741 = vst [vmem:[#allocation5_spill] sm:$0xff] %v4511_v23  ;;  %v71_v23 = vunpack.c.h.bf16 %v36_v48  ;;  %v1235_v48 = vld [vmem:[%s6697_s2 + $0x130] sm:$0xff] }
 0x119   :  { %6740 = vst [vmem:[#allocation4_spill] sm:$0xff] %v4507_v21  ;;  %1418 = vmatpush.msra.mxu3 %v1235_v48 }
 0x11a   :  { %811 = vmatmul.f32.gmra.mxu1 %v68_v14  ;;  %983 = vmatmul.f32.gmra.mxu0 %v64_v2 }
 0x11b   :  { %3587 = vmatmul.msk.f32.gmra.mxu3 %vm267_vm0, %v69_v24  ;;  %3609 = vmatmul.msk.f32.gmra.mxu2 %vm267_vm0, %v65_v15  ;;  %v1213_v15 = vld [vmem:[%s6697_s2 + $0x80] sm:$0xff] }
 0x11c   :  { %1324 = vmatpush.msra.mxu1 %v1213_v15 }
 0x11e   :  { %v580_v1 = vpop.f32.mrf.mxu2  ;;  %v675_v43 = vpop.f32.mrf.mxu3 }
 0x11f   :  { %v4521_v57 = vadd.f32 %v669_v25, %v580_v1  ;;  %v4523_v44 = vpop.f32.mrf.mxu0  ;;  %v4525_v2 = vpop.f32.mrf.mxu1  ;;  %v37_v25 = vld [vmem:[%s6695_s4 + $0x58] sm:$0xff] }
 0x120   :  { %6743 = vst [vmem:[#allocation7_spill] sm:$0xff] %v4523_v44  ;;  %v72_v15 = vunpack.c.l.bf16 %v37_v25  ;;  %v73_v21 = vunpack.c.h.bf16 %v37_v25  ;;  %v1211_v44 = vld [vmem:[%s6697_s2 + $0x70] sm:$0xff] }
 0x121   :  { %6742 = vst [vmem:[#allocation6_spill] sm:$0xff] %v4521_v57  ;;  %1325 = vmatpush.msra.mxu1 %v1211_v44 }
 0x122   :  { %6744 = vst [vmem:[#allocation8_spill] sm:$0xff] %v4525_v2  ;;  %814 = vmatmul.f32.gmra.mxu1 %v70_v56  ;;  %986 = vmatmul.f32.gmra.mxu0 %v66_v26 }
 0x123   :  { %3588 = vmatmul.msk.f32.gmra.mxu3 %vm267_vm0, %v71_v23  ;;  %3610 = vmatmul.msk.f32.gmra.mxu2 %vm267_vm0, %v67_v42 }
 0x126   :  { %v583_v1 = vpop.f32.mrf.mxu2  ;;  %v678_v26 = vpop.f32.mrf.mxu3 }
 0x127   :  { %v4541_v2 = vadd.f32 %v672_v0, %v583_v1  ;;  %v4543_v42 = vpop.f32.mrf.mxu0  ;;  %v4545_v57 = vpop.f32.mrf.mxu1  ;;  %v38_v0 = vld [vmem:[%s6695_s4 + $0x60] sm:$0xff] }
 0x128   :  { %6746 = vst [vmem:[#allocation10_spill] sm:$0xff] %v4543_v42  ;;  %v74_v48 = vunpack.c.l.bf16 %v38_v0  ;;  %v75_v41 = vunpack.c.h.bf16 %v38_v0  ;;  %v1207_v42 = vld [vmem:[%s6697_s2 + $0x50] sm:$0xff] }
 0x129   :  { %6745 = vst [vmem:[#allocation9_spill] sm:$0xff] %v4541_v2 }
 0x12a   :  { %6747 = vst [vmem:[#allocation11_spill] sm:$0xff] %v4545_v57  ;;  %817 = vmatmul.f32.gmra.mxu1 %v72_v15  ;;  %989 = vmatmul.f32.gmra.mxu0 %v68_v14  ;;  %v39_v14 = vld [vmem:[%s6695_s4 + $0x68] sm:$0xff] }
 0x12b   :  { %3589 = vmatmul.msk.f32.gmra.mxu3 %vm267_vm0, %v73_v21  ;;  %3611 = vmatmul.msk.f32.gmra.mxu2 %vm267_vm0, %v69_v24  ;;  %v1210_v24 = vld [vmem:[%s6697_s2 + $0x68] sm:$0xff] }
 0x12c   :  { %1504 = vmatpush.msra.mxu0 %v1210_v24  ;;  %v1234_v24 = vld [vmem:[%s6697_s2 + $0x128] sm:$0xff] }
 0x12d   :  { %1597 = vmatpush.msra.mxu2 %v1234_v24 }
 0x12e   :  { %v586_v25 = vpop.f32.mrf.mxu2  ;;  %v681_v55 = vpop.f32.mrf.mxu3 }
 0x12f   :  { %v4558_v1 = vadd.f32 %v675_v43, %v586_v25  ;;  %v4560_v57 = vpop.f32.mrf.mxu0  ;;  %v4562_v2 = vpop.f32.mrf.mxu1  ;;  %v76_v25 = vunpack.c.l.bf16 %v39_v14 }
 0x130   :  { %6749 = vst [vmem:[#allocation13_spill] sm:$0xff] %v4560_v57  ;;  %v1208_v57 = vld [vmem:[%s6697_s2 + $0x58] sm:$0xff] }
 0x131   :  { %6748 = vst [vmem:[#allocation12_spill] sm:$0xff] %v4558_v1  ;;  %v77_v1 = vunpack.c.h.bf16 %v39_v14  ;;  %v1233_v14 = vld [vmem:[%s6697_s2 + $0x120] sm:$0xff]  ;;  %1505 = vmatpush.msra.mxu0 %v1208_v57 }
 0x132   :  { %6750 = vst [vmem:[#allocation14_spill] sm:$0xff] %v4562_v2  ;;  %820 = vmatmul.f32.gmra.mxu1 %v74_v48  ;;  %992 = vmatmul.f32.gmra.mxu0 %v70_v56 }
 0x133   :  { %3590 = vmatmul.msk.f32.gmra.mxu3 %vm267_vm0, %v75_v41  ;;  %3612 = vmatmul.msk.f32.gmra.mxu2 %vm267_vm0, %v71_v23  ;;  %v1209_v23 = vld [vmem:[%s6697_s2 + $0x60] sm:$0xff] }
 0x134   :  { %1326 = vmatpush.msra.mxu1 %v1209_v23  ;;  %1419 = vmatpush.msra.mxu3 %v1233_v14 }
 0x136   :  { %v589_v43 = vpop.f32.mrf.mxu2  ;;  %v684_v44 = vpop.f32.mrf.mxu3  ;;  %1327 = vmatpush.msra.mxu1 %v1207_v42  ;;  %v42_v42 = vld [vmem:[%s6695_s4 + $0x80] sm:$0xff] }
 0x137   :  { %v4572_v2 = vadd.f32 %v678_v26, %v589_v43  ;;  %v4574_v0 = vpop.f32.mrf.mxu0  ;;  %v4576_v56 = vpop.f32.mrf.mxu1  ;;  %v40_v26 = vld [vmem:[%s6695_s4 + $0x70] sm:$0xff] }
 0x138   :  { %6752 = vst [vmem:[#allocation16_spill] sm:$0xff] %v4574_v0  ;;  %v78_v23 = vunpack.c.l.bf16 %v40_v26  ;;  %v79_v0 = vunpack.c.h.bf16 %v40_v26 }
 0x139   :  { %6751 = vst [vmem:[#allocation15_spill] sm:$0xff] %v4572_v2 }
 0x13a   :  { %6753 = vst [vmem:[#allocation17_spill] sm:$0xff] %v4576_v56  ;;  %823 = vmatmul.f32.gmra.mxu1 %v76_v25  ;;  %995 = vmatmul.f32.gmra.mxu0 %v72_v15 }
 0x13b   :  { %3591 = vmatmul.msk.f32.gmra.mxu3 %vm267_vm0, %v77_v1  ;;  %3613 = vmatmul.msk.f32.gmra.mxu2 %vm267_vm0, %v73_v21 }
 0x13e   :  { %v592_v43 = vpop.f32.mrf.mxu2  ;;  %v687_v15 = vpop.f32.mrf.mxu3 }
 0x13f   :  { %v4592_v56 = vadd.f32 %v681_v55, %v592_v43  ;;  %v4594_v21 = vpop.f32.mrf.mxu0  ;;  %v4596_v2 = vpop.f32.mrf.mxu1  ;;  %v41_v55 = vld [vmem:[%s6695_s4 + $0x78] sm:$0xff] }
 0x140   :  { %6755 = vst [vmem:[#allocation19_spill] sm:$0xff] %v4594_v21  ;;  %v80_v14 = vunpack.c.l.bf16 %v41_v55  ;;  %v81_v57 = vunpack.c.h.bf16 %v41_v55 }
 0x141   :  { %6754 = vst [vmem:[#allocation18_spill] sm:$0xff] %v4592_v56 }
 0x142   :  { %6756 = vst [vmem:[#allocation20_spill] sm:$0xff] %v4596_v2  ;;  %826 = vmatmul.f32.gmra.mxu1 %v78_v23  ;;  %998 = vmatmul.f32.gmra.mxu0 %v74_v48  ;;  %v1206_v48 = vld [vmem:[%s6697_s2 + $0x48] sm:$0xff] }
 0x143   :  { %3592 = vmatmul.msk.f32.gmra.mxu3 %vm267_vm0, %v79_v0  ;;  %3614 = vmatmul.msk.f32.gmra.mxu2 %vm267_vm0, %v75_v41 }
 0x144   :  { %1506 = vmatpush.msra.mxu0 %v1206_v48  ;;  %v1231_v48 = vld [vmem:[%s6697_s2 + $0x110] sm:$0xff] }
 0x145   :  { %1420 = vmatpush.msra.mxu3 %v1231_v48 }
 0x146   :  { %v595_v26 = vpop.f32.mrf.mxu2  ;;  %v690_v24 = vpop.f32.mrf.mxu3  ;;  %1507 = vmatpush.msra.mxu0 %v1204_v37 }
 0x147   :  { %v4609_v43 = vadd.f32 %v684_v44, %v595_v26  ;;  %v4611_v2 = vpop.f32.mrf.mxu0  ;;  %v4613_v56 = vpop.f32.mrf.mxu1  ;;  %v82_v26 = vunpack.c.l.bf16 %v42_v42 }
 0x148   :  { %6758 = vst [vmem:[#allocation22_spill] sm:$0xff] %v4611_v2  ;;  %v447_v2 = vadd.f32 %v4227_v4, %v4256_v19 }
 0x149   :  { %6757 = vst [vmem:[#allocation21_spill] sm:$0xff] %v4609_v43  ;;  %v83_v43 = vunpack.c.h.bf16 %v42_v42  ;;  %v1232_v42 = vld [vmem:[%s6697_s2 + $0x118] sm:$0xff] }
 0x14a   :  { %6759 = vst [vmem:[#allocation23_spill] sm:$0xff] %v4613_v56  ;;  %829 = vmatmul.f32.gmra.mxu1 %v80_v14  ;;  %1001 = vmatmul.f32.gmra.mxu0 %v76_v25 }
 0x14b   :  { %3593 = vmatmul.msk.f32.gmra.mxu3 %vm267_vm0, %v81_v57  ;;  %3615 = vmatmul.msk.f32.gmra.mxu2 %vm267_vm0, %v77_v1  ;;  %v1205_v1 = vld [vmem:[%s6697_s2 + $0x40] sm:$0xff] }
 0x14c   :  { %1328 = vmatpush.msra.mxu1 %v1205_v1  ;;  %1598 = vmatpush.msra.mxu2 %v1232_v42  ;;  %v1203_v42 = vld [vmem:[%s6697_s2 + $0x30] sm:$0xff] }
 0x14e   :  { %v598_v41 = vpop.f32.mrf.mxu2  ;;  %v693_v44 = vpop.f32.mrf.mxu3  ;;  %1329 = vmatpush.msra.mxu1 %v1203_v42 }
 0x14f   :  { %v4623_v56 = vadd.f32 %v687_v15, %v598_v41  ;;  %v4625_v55 = vpop.f32.mrf.mxu0  ;;  %v785_v25 = vpop.f32.mrf.mxu1  ;;  %v43_v15 = vld [vmem:[%s6695_s4 + $0x88] sm:$0xff] }
 0x150   :  { %6761 = vst [vmem:[#allocation25_spill] sm:$0xff] %v4625_v55  ;;  %v84_v41 = vunpack.c.l.bf16 %v43_v15  ;;  %v85_v21 = vunpack.c.h.bf16 %v43_v15 }
 0x151   :  { %6760 = vst [vmem:[#allocation24_spill] sm:$0xff] %v4623_v56 }
 0x152   :  { %832 = vmatmul.f32.gmra.mxu1 %v82_v26  ;;  %1004 = vmatmul.f32.gmra.mxu0 %v78_v23  ;;  %v786_v23 = vadd.f32 %v785_v25, %v447_v2  ;;  %v450_v2 = vadd.f32 %v4243_v12, %v4270_v28  ;;  %v453_v12 = vadd.f32 %v4258_v20, %v4290_v39  ;;  %v45_v28 = vld [vmem:[%s6695_s4 + $0x98] sm:$0xff] }
 0x153   :  { %3594 = vmatmul.msk.f32.gmra.mxu3 %vm267_vm0, %v83_v43  ;;  %3616 = vmatmul.msk.f32.gmra.mxu2 %vm267_vm0, %v79_v0 }
 0x156   :  { %v601_v4 = vpop.f32.mrf.mxu2  ;;  %v874_v19 = vpop.f32.mrf.mxu3 }
 0x157   :  { %v4643_v1 = vadd.f32 %v690_v24, %v601_v4  ;;  %v4645_v0 = vadd.f32 %v874_v19, %v786_v23  ;;  %v4647_v56 = vpop.f32.mrf.mxu0  ;;  %v788_v55 = vpop.f32.mrf.mxu1  ;;  %v44_v24 = vld [vmem:[%s6695_s4 + $0x90] sm:$0xff] }
 0x158   :  { %v789_v25 = vadd.f32 %v788_v55, %v450_v2  ;;  %v86_v23 = vunpack.c.l.bf16 %v44_v24  ;;  %v87_v42 = vunpack.c.h.bf16 %v44_v24  ;;  %v88_v24 = vunpack.c.l.bf16 %v45_v28 }
 0x15a   :  { %835 = vmatmul.f32.gmra.mxu1 %v84_v41  ;;  %1007 = vmatmul.f32.gmra.mxu0 %v80_v14 }
 0x15b   :  { %3595 = vmatmul.msk.f32.gmra.mxu3 %vm267_vm0, %v85_v21  ;;  %3617 = vmatmul.msk.f32.gmra.mxu2 %vm267_vm0, %v81_v57  ;;  %v1202_v57 = vld [vmem:[%s6697_s2 + $0x28] sm:$0xff] }
 0x15c   :  { %1508 = vmatpush.msra.mxu0 %v1202_v57 }
 0x15e   :  { %v604_v15 = vpop.f32.mrf.mxu2  ;;  %v877_v48 = vpop.f32.mrf.mxu3 }
 0x15f   :  { %v4662_v4 = vadd.f32 %v693_v44, %v604_v15  ;;  %v4664_v37 = vadd.f32 %v877_v48, %v789_v25  ;;  %v791_v14 = vpop.f32.mrf.mxu1  ;;  %v963_v19 = vpop.f32.mrf.mxu0  ;;  %v89_v15 = vunpack.c.h.bf16 %v45_v28  ;;  %v1201_v48 = vld [vmem:[%s6697_s2 + $0x20] sm:$0xff] }
 0x160   :  { %v792_v44 = vadd.f32 %v791_v14, %v453_v12  ;;  %v964_v55 = vadd.f32 %v963_v19, %v4268_v27  ;;  %1330 = vmatpush.msra.mxu1 %v1201_v48  ;;  %v456_v27 = vadd.f32 %v4272_v29, %v4310_v50  ;;  %v46_v14 = vld [vmem:[%s6695_s4 + $0xa0] sm:$0xff]  ;;  %v1230_v19 = vld [vmem:[%s6697_s2 + $0x108] sm:$0xff]  ;;  %v1200_v48 = vld [vmem:[%s6697_s2 + $0x18] sm:$0xff] }
 0x161   :  { %v1229_v12 = vld [vmem:[%s6697_s2 + $0x100] sm:$0xff]  ;;  %1599 = vmatpush.msra.mxu2 %v1230_v19  ;;  %1509 = vmatpush.msra.mxu0 %v1200_v48 }
 0x162   :  { %838 = vmatmul.f32.gmra.mxu1 %v86_v23  ;;  %1010 = vmatmul.f32.gmra.mxu0 %v82_v26 }
 0x163   :  { %3596 = vmatmul.msk.f32.gmra.mxu3 %vm267_vm0, %v87_v42  ;;  %3618 = vmatmul.msk.f32.gmra.mxu2 %vm267_vm0, %v83_v43 }
 0x164   :  { %1421 = vmatpush.msra.mxu3 %v1229_v12 }
 0x166   :  { %v880_v26 = vpop.f32.mrf.mxu3  ;;  %v1052_v2 = vpop.f32.mrf.mxu2 }
 0x167   :  { %v4677_v20 = vadd.f32 %v880_v26, %v792_v44  ;;  %v4679_v39 = vadd.f32 %v1052_v2, %v964_v55  ;;  %v794_v43 = vpop.f32.mrf.mxu1  ;;  %v966_v25 = vpop.f32.mrf.mxu0  ;;  %v91_v2 = vunpack.c.h.bf16 %v46_v14 }
 0x168   :  { %v967_v29 = vadd.f32 %v966_v25, %v4288_v38  ;;  %v459_v38 = vadd.f32 %v4292_v40, %v4324_v59  ;;  %v47_v25 = vld [vmem:[%s6695_s4 + $0xa8] sm:$0xff] }
 0x169   :  { %v93_v59 = vunpack.c.h.bf16 %v47_v25 }
 0x16a   :  { %841 = vmatmul.f32.gmra.mxu1 %v88_v24  ;;  %1013 = vmatmul.f32.gmra.mxu0 %v84_v41  ;;  %v795_v41 = vadd.f32 %v794_v43, %v456_v27  ;;  %v1199_v43 = vld [vmem:[%s6697_s2 + $0x10] sm:$0xff] }
 0x16b   :  { %3597 = vmatmul.msk.f32.gmra.mxu3 %vm267_vm0, %v89_v15  ;;  %3619 = vmatmul.msk.f32.gmra.mxu2 %vm267_vm0, %v85_v21  ;;  %v90_v21 = vunpack.c.l.bf16 %v46_v14 }
 0x16c   :  { %1331 = vmatpush.msra.mxu1 %v1199_v43 }
 0x16e   :  { %v883_v50 = vpop.f32.mrf.mxu3  ;;  %v1055_v28 = vpop.f32.mrf.mxu2 }
 0x16f   :  { %v4698_v57 = vadd.f32 %v883_v50, %v795_v41  ;;  %v4700_v44 = vadd.f32 %v1055_v28, %v967_v29  ;;  %v797_v55 = vpop.f32.mrf.mxu1  ;;  %v969_v26 = vpop.f32.mrf.mxu0  ;;  %v92_v41 = vunpack.c.l.bf16 %v47_v25  ;;  %v48_v28 = vld [vmem:[%s6695_s4 + $0xb0] sm:$0xff] }
 0x170   :  { %v798_v27 = vadd.f32 %v797_v55, %v459_v38  ;;  %v970_v14 = vadd.f32 %v969_v26, %v4308_v49  ;;  %v462_v49 = vadd.f32 %v4312_v51, %v4341_v6  ;;  %v1198_v55 = vld [vmem:[%s6697_s2 + $0x8] sm:$0xff]  ;;  %v94_v38 = vunpack.c.l.bf16 %v48_v28 }
 0x171   :  { %1510 = vmatpush.msra.mxu0 %v1198_v55 }
 0x172   :  { %844 = vmatmul.f32.gmra.mxu1 %v90_v21  ;;  %1016 = vmatmul.f32.gmra.mxu0 %v86_v23 }
 0x173   :  { %3598 = vmatmul.msk.f32.gmra.mxu3 %vm267_vm0, %v91_v2  ;;  %3620 = vmatmul.msk.f32.gmra.mxu2 %vm267_vm0, %v87_v42  ;;  %v1197_v42 = vld [vmem:[%s6697_s2] sm:$0xff] }
 0x174   :  { %1332 = vmatpush.msra.mxu1 %v1197_v42 }
 0x176   :  { %v886_v19 = vpop.f32.mrf.mxu3  ;;  %v1058_v12 = vpop.f32.mrf.mxu2 }
 0x177   :  { %v4716_v29 = vadd.f32 %v886_v19, %v798_v27  ;;  %v4718_v23 = vadd.f32 %v1058_v12, %v970_v14  ;;  %v800_v50 = vpop.f32.mrf.mxu1  ;;  %v972_v40 = vpop.f32.mrf.mxu0  ;;  %v95_v27 = vunpack.c.h.bf16 %v48_v28  ;;  %v465_v14 = vadd.f32 %v4326_v60, %v4358_v17  ;;  %v4748_v19 = vld [vmem:[%s6698_s3 + $0x178] sm:$0xff] }
 0x178   :  { %v801_v26 = vadd.f32 %v800_v50, %v462_v49  ;;  %v973_v48 = vadd.f32 %v972_v40, %v4322_v58  ;;  %v49_v58 = vld [vmem:[%s6695_s4 + $0xb8] sm:$0xff]  ;;  %2189 = vmatpush.msrb.mxu2 %v4748_v19 }
 0x179   :  { %v96_v50 = vunpack.c.l.bf16 %v49_v58  ;;  %v97_v55 = vunpack.c.h.bf16 %v49_v58 }
 0x17a   :  { %847 = vmatmul.f32.gmra.mxu1 %v92_v41  ;;  %1019 = vmatmul.f32.gmra.mxu0 %v88_v24 }
 0x17b   :  { %3599 = vmatmul.msk.f32.gmra.mxu3 %vm267_vm0, %v93_v59  ;;  %3621 = vmatmul.msk.f32.gmra.mxu2 %vm267_vm0, %v89_v15 }
 0x17e   :  { %v889_v24 = vpop.f32.mrf.mxu3  ;;  %v1061_v43 = vpop.f32.mrf.mxu2 }
 0x17f   :  { %v4734_v51 = vadd.f32 %v889_v24, %v801_v26  ;;  %v4736_v6 = vadd.f32 %v1061_v43, %v973_v48  ;;  %v803_v15 = vpop.f32.mrf.mxu1  ;;  %v975_v25 = vpop.f32.mrf.mxu0  ;;  %v4762_v26 = vld [vmem:[%s6698_s3 + $0xf8] sm:$0xff]  ;;  %v1824_v48 = vld [vmem:[%s6698_s3 + $0xf0] sm:$0xff]  ;;  %v3626_v24 = vld [vmem:[%s6695_s4 + $0x180] sm:$0xff] }
 0x180   :  { %v804_v60 = vadd.f32 %v803_v15, %v465_v14  ;;  %v976_v17 = vadd.f32 %v975_v25, %v4339_v5  ;;  %2092 = vmatpush.msrb.mxu0 %v4762_v26  ;;  %1914 = vmatpush.msrb.mxu1 %v1824_v48  ;;  %v468_v5 = vadd.f32 %v4343_v7, %v4371_v32  ;;  %v1149_v58 = vunpack.c.l.bf16 %v3626_v24 }
 0x181   :  { %v1150_v32 = vunpack.c.h.bf16 %v3626_v24  ;;  %v1822_v24 = vld [vmem:[%s6698_s3 + $0xe0] sm:$0xff] }
 0x182   :  { %850 = vmatmul.f32.gmra.mxu1 %v94_v38  ;;  %1022 = vmatmul.f32.gmra.mxu0 %v90_v21  ;;  %v1840_v21 = vld [vmem:[%s6698_s3 + $0x170] sm:$0xff] }
 0x183   :  { %3600 = vmatmul.msk.f32.gmra.mxu3 %vm267_vm0, %v95_v27  ;;  %3622 = vmatmul.msk.f32.gmra.mxu2 %vm267_vm0, %v91_v2 }
 0x184   :  { %2011 = vmatpush.msrb.mxu3 %v1840_v21  ;;  %1915 = vmatpush.msrb.mxu1 %v1822_v24 }
 0x186   :  { %v892_v2 = vpop.f32.mrf.mxu3  ;;  %v1064_v12 = vpop.f32.mrf.mxu2 }
 0x187   :  { %v4755_v40 = vadd.f32 %v892_v2, %v804_v60  ;;  %v4757_v42 = vadd.f32 %v1064_v12, %v976_v17  ;;  %v806_v49 = vpop.f32.mrf.mxu1  ;;  %v978_v28 = vpop.f32.mrf.mxu0  ;;  %v3627_v17 = vld [vmem:[%s6695_s4 + $0x188] sm:$0xff] }
 0x188   :  { %v807_v43 = vadd.f32 %v806_v49, %v468_v5  ;;  %v979_v15 = vadd.f32 %v978_v28, %v4356_v16  ;;  %v4787_v16 = vld [vmem:[%s6698_s3 + $0xe8] sm:$0xff]  ;;  %v1152_v5 = vunpack.c.h.bf16 %v3627_v17 }
 0x189   :  { %2093 = vmatpush.msrb.mxu0 %v4787_v16 }
 0x18a   :  { %853 = vmatmul.f32.gmra.mxu1 %v96_v50  ;;  %1025 = vmatmul.f32.gmra.mxu0 %v92_v41 }
 0x18b   :  { %3601 = vmatmul.msk.f32.gmra.mxu3 %vm267_vm0, %v97_v55  ;;  %3623 = vmatmul.msk.f32.gmra.mxu2 %vm267_vm0, %v93_v59  ;;  %v471_v59 = vadd.f32 %v4360_v18, %v4390_v46  ;;  %v1151_v46 = vunpack.c.l.bf16 %v3627_v17 }
 0x18e   :  { %v895_v25 = vpop.f32.mrf.mxu3  ;;  %v1067_v14 = vpop.f32.mrf.mxu2 }
 0x18f   :  { %v4776_v21 = vadd.f32 %v895_v25, %v807_v43  ;;  %v4778_v41 = vadd.f32 %v1067_v14, %v979_v15  ;;  %v809_v60 = vpop.f32.mrf.mxu1  ;;  %v981_v7 = vpop.f32.mrf.mxu0  ;;  %v4808_v43 = vld [vmem:[%s6698_s3 + $0x168] sm:$0xff]  ;;  %v1838_v15 = vld [vmem:[%s6698_s3 + $0x160] sm:$0xff] }
 0x190   :  { %v982_v2 = vadd.f32 %v981_v7, %v4369_v31  ;;  %v474_v31 = vadd.f32 %v4373_v33, %v4407_v62  ;;  %2190 = vmatpush.msrb.mxu2 %v4808_v43  ;;  %2012 = vmatpush.msrb.mxu3 %v1838_v15 }
 0x192   :  { %1028 = vmatmul.f32.gmra.mxu0 %v94_v38  ;;  %1333 = vmatmul.f32.vlgmr.msra.gmra.mxu1 %v1149_v58  ;;  %v810_v38 = vadd.f32 %v809_v60, %v471_v59 }
 0x193   :  { %3624 = vmatmul.msk.f32.gmra.mxu2 %vm267_vm0, %v95_v27  ;;  %3650 = vmatmul.msk.f32.vlgmr.msra.gmra.mxu3 %vm267_vm0, %v1150_v32 }
 0x196   :  { %v898_v12 = vpop.f32.mrf.mxu3  ;;  %v1070_v18 = vpop.f32.mrf.mxu2 }
 0x197   :  { %v4794_v27 = vadd.f32 %v898_v12, %v810_v38  ;;  %v4796_v49 = vadd.f32 %v1070_v18, %v982_v2  ;;  %v812_v28 = vpop.f32.mrf.mxu1  ;;  %v984_v48 = vpop.f32.mrf.mxu0  ;;  %v4825_v2 = vld [vmem:[%s6698_s3 + $0xd8] sm:$0xff]  ;;  %v1820_v12 = vld [vmem:[%s6698_s3 + $0xd0] sm:$0xff] }
 0x198   :  { %v813_v33 = vadd.f32 %v812_v28, %v474_v31  ;;  %v985_v62 = vadd.f32 %v984_v48, %v4388_v45  ;;  %2094 = vmatpush.msrb.mxu0 %v4825_v2  ;;  %1916 = vmatpush.msrb.mxu1 %v1820_v12  ;;  %v477_v45 = vadd.f32 %v4392_v47, %v4421_v11  ;;  %v3629_v18 = vld [vmem:[%s6695_s4 + $0x198] sm:$0xff] }
 0x199   :  { %v1155_v15 = vunpack.c.l.bf16 %v3629_v18  ;;  %v1156_v11 = vunpack.c.h.bf16 %v3629_v18  ;;  %v1818_v18 = vld [vmem:[%s6698_s3 + $0xc0] sm:$0xff] }
 0x19a   :  { %1031 = vmatmul.f32.gmra.mxu0 %v96_v50  ;;  %1336 = vmatmul.f32.gmra.mxu1 %v1151_v46  ;;  %v3628_v50 = vld [vmem:[%s6695_s4 + $0x190] sm:$0xff] }
 0x19b   :  { %3625 = vmatmul.msk.f32.gmra.mxu2 %vm267_vm0, %v97_v55  ;;  %3651 = vmatmul.msk.f32.gmra.mxu3 %vm267_vm0, %v1152_v5  ;;  %v1153_v14 = vunpack.c.l.bf16 %v3628_v50  ;;  %v1154_v38 = vunpack.c.h.bf16 %v3628_v50 }
 0x19c   :  { %1917 = vmatpush.msrb.mxu1 %v1818_v18 }
 0x19e   :  { %v901_v55 = vpop.f32.mrf.mxu3  ;;  %v1073_v25 = vpop.f32.mrf.mxu2 }
 0x19f   :  { %v4818_v60 = vadd.f32 %v901_v55, %v813_v33  ;;  %v4820_v7 = vadd.f32 %v1073_v25, %v985_v62  ;;  %v815_v59 = vpop.f32.mrf.mxu1  ;;  %v987_v17 = vpop.f32.mrf.mxu0  ;;  %v3630_v62 = vld [vmem:[%s6695_s4 + $0x1a0] sm:$0xff] }
 0x1a0   :  { %v816_v28 = vadd.f32 %v815_v59, %v477_v45  ;;  %v988_v48 = vadd.f32 %v987_v17, %v4405_v61  ;;  %v4850_v61 = vld [vmem:[%s6698_s3 + $0xc8] sm:$0xff]  ;;  %v1158_v45 = vunpack.c.h.bf16 %v3630_v62 }
 0x1a1   :  { %2095 = vmatpush.msrb.mxu0 %v4850_v61 }
 0x1a2   :  { %1339 = vmatmul.f32.gmra.mxu1 %v1153_v14  ;;  %1511 = vmatmul.f32.vlgmr.msra.gmra.mxu0 %v1149_v58 }
 0x1a3   :  { %3652 = vmatmul.msk.f32.gmra.mxu3 %vm267_vm0, %v1154_v38  ;;  %3674 = vmatmul.msk.f32.vlgmr.msra.gmra.mxu2 %vm267_vm0, %v1150_v32  ;;  %v480_v32 = vadd.f32 %v4409_v63, %v4441_v34  ;;  %v1157_v34 = vunpack.c.l.bf16 %v3630_v62 }
 0x1a6   :  { %v904_v24 = vpop.f32.mrf.mxu3  ;;  %v1076_v31 = vpop.f32.mrf.mxu2 }
 0x1a7   :  { %v4839_v50 = vadd.f32 %v904_v24, %v816_v28  ;;  %v4841_v58 = vadd.f32 %v1076_v31, %v988_v48  ;;  %v818_v33 = vpop.f32.mrf.mxu1  ;;  %v990_v47 = vpop.f32.mrf.mxu0  ;;  %v4871_v28 = vld [vmem:[%s6698_s3 + $0x158] sm:$0xff]  ;;  %v1836_v48 = vld [vmem:[%s6698_s3 + $0x150] sm:$0xff] }
 0x1a8   :  { %v819_v55 = vadd.f32 %v818_v33, %v480_v32  ;;  %2191 = vmatpush.msrb.mxu2 %v4871_v28  ;;  %2013 = vmatpush.msrb.mxu3 %v1836_v48 }
 0x1aa   :  { %1342 = vmatmul.f32.gmra.mxu1 %v1155_v15  ;;  %1514 = vmatmul.f32.gmra.mxu0 %v1151_v46  ;;  %v991_v46 = vadd.f32 %v990_v47, %v4419_v10  ;;  %v483_v10 = vadd.f32 %v4423_v13, %v4458_v53 }
 0x1ab   :  { %3653 = vmatmul.msk.f32.gmra.mxu3 %vm267_vm0, %v1156_v11  ;;  %3675 = vmatmul.msk.f32.gmra.mxu2 %vm267_vm0, %v1152_v5 }
 0x1ae   :  { %v907_v25 = vpop.f32.mrf.mxu3  ;;  %v1079_v63 = vpop.f32.mrf.mxu2 }
 0x1af   :  { %v4857_v59 = vadd.f32 %v907_v25, %v819_v55  ;;  %v4859_v5 = vadd.f32 %v1079_v63, %v991_v46  ;;  %v821_v17 = vpop.f32.mrf.mxu1  ;;  %v993_v12 = vpop.f32.mrf.mxu0  ;;  %v4888_v46 = vld [vmem:[%s6698_s3 + $0xb8] sm:$0xff]  ;;  %v1816_v25 = vld [vmem:[%s6698_s3 + $0xb0] sm:$0xff] }
 0x1b0   :  { %v822_v13 = vadd.f32 %v821_v17, %v483_v10  ;;  %v994_v53 = vadd.f32 %v993_v12, %v4439_v30  ;;  %2096 = vmatpush.msrb.mxu0 %v4888_v46  ;;  %1918 = vmatpush.msrb.mxu1 %v1816_v25  ;;  %v486_v30 = vadd.f32 %v4443_v35, %v4472_v8  ;;  %v3632_v63 = vld [vmem:[%s6695_s4 + $0x1b0] sm:$0xff] }
 0x1b1   :  { %v1161_v48 = vunpack.c.l.bf16 %v3632_v63  ;;  %v1162_v8 = vunpack.c.h.bf16 %v3632_v63  ;;  %v1814_v63 = vld [vmem:[%s6698_s3 + $0xa0] sm:$0xff] }
 0x1b2   :  { %1345 = vmatmul.f32.gmra.mxu1 %v1157_v34  ;;  %1517 = vmatmul.f32.gmra.mxu0 %v1153_v14  ;;  %v3631_v14 = vld [vmem:[%s6695_s4 + $0x1a8] sm:$0xff] }
 0x1b3   :  { %3654 = vmatmul.msk.f32.gmra.mxu3 %vm267_vm0, %v1158_v45  ;;  %3676 = vmatmul.msk.f32.gmra.mxu2 %vm267_vm0, %v1154_v38  ;;  %v1159_v31 = vunpack.c.l.bf16 %v3631_v14  ;;  %v1160_v55 = vunpack.c.h.bf16 %v3631_v14 }
 0x1b4   :  { %1919 = vmatpush.msrb.mxu1 %v1814_v63 }
 0x1b6   :  { %v910_v38 = vpop.f32.mrf.mxu3  ;;  %v1082_v24 = vpop.f32.mrf.mxu2 }
 0x1b7   :  { %v4881_v33 = vadd.f32 %v910_v38, %v822_v13  ;;  %v4883_v47 = vadd.f32 %v1082_v24, %v994_v53  ;;  %v824_v32 = vpop.f32.mrf.mxu1  ;;  %v996_v62 = vpop.f32.mrf.mxu0  ;;  %v3633_v53 = vld [vmem:[%s6695_s4 + $0x1b8] sm:$0xff] }
 0x1b8   :  { %v825_v17 = vadd.f32 %v824_v32, %v486_v30  ;;  %v997_v12 = vadd.f32 %v996_v62, %v4456_v52  ;;  %v4913_v52 = vld [vmem:[%s6698_s3 + $0xa8] sm:$0xff]  ;;  %v1164_v30 = vunpack.c.h.bf16 %v3633_v53 }
 0x1b9   :  { %6762 = vst [vmem:[#allocation26_spill] sm:$0xff] %v4881_v33  ;;  %2097 = vmatpush.msrb.mxu0 %v4913_v52 }
 0x1ba   :  { %6763 = vst [vmem:[#allocation27_spill] sm:$0xff] %v4883_v47  ;;  %1348 = vmatmul.f32.gmra.mxu1 %v1159_v31  ;;  %1520 = vmatmul.f32.gmra.mxu0 %v1155_v15  ;;  %v6804_v47 = vld [vmem:[#allocation23_spill] sm:$0xff] }
 0x1bb   :  { %3655 = vmatmul.msk.f32.gmra.mxu3 %vm267_vm0, %v1160_v55  ;;  %3677 = vmatmul.msk.f32.gmra.mxu2 %vm267_vm0, %v1156_v11  ;;  %v489_v11 = vadd.f32 %v4460_v54, %v4492_v36  ;;  %v1163_v36 = vunpack.c.l.bf16 %v3633_v53  ;;  %v516_v33 = vadd.f32 %v6804_v47, %v4647_v56 }
 0x1be   :  { %v913_v18 = vpop.f32.mrf.mxu3  ;;  %v1085_v10 = vpop.f32.mrf.mxu2 }
 0x1bf   :  { %v4902_v14 = vadd.f32 %v913_v18, %v825_v17  ;;  %v4904_v15 = vadd.f32 %v1085_v10, %v997_v12  ;;  %v827_v13 = vpop.f32.mrf.mxu1  ;;  %v999_v35 = vpop.f32.mrf.mxu0  ;;  %v4934_v17 = vld [vmem:[%s6698_s3 + $0x148] sm:$0xff]  ;;  %v1834_v12 = vld [vmem:[%s6698_s3 + $0x140] sm:$0xff] }
 0x1c0   :  { %v828_v38 = vadd.f32 %v827_v13, %v489_v11  ;;  %2192 = vmatpush.msrb.mxu2 %v4934_v17  ;;  %2014 = vmatpush.msrb.mxu3 %v1834_v12 }
 0x1c1   :  { %6764 = vst [vmem:[#allocation28_spill] sm:$0xff] %v4902_v14 }
 0x1c2   :  { %6765 = vst [vmem:[#allocation29_spill] sm:$0xff] %v4904_v15  ;;  %1351 = vmatmul.f32.gmra.mxu1 %v1161_v48  ;;  %1523 = vmatmul.f32.gmra.mxu0 %v1157_v34  ;;  %v1000_v34 = vadd.f32 %v999_v35, %v4470_v3  ;;  %v492_v3 = vadd.f32 %v4474_v9, %v4509_v22  ;;  %v6768_v22 = vld [vmem:[#allocation2_spill] sm:$0xff] }
 0x1c3   :  { %3656 = vmatmul.msk.f32.gmra.mxu3 %vm267_vm0, %v1162_v8  ;;  %3678 = vmatmul.msk.f32.gmra.mxu2 %vm267_vm0, %v1158_v45 }
 0x1c6   :  { %v916_v24 = vpop.f32.mrf.mxu3  ;;  %v1088_v54 = vpop.f32.mrf.mxu2 }
 0x1c7   :  { %v4920_v32 = vadd.f32 %v916_v24, %v828_v38  ;;  %v4922_v45 = vadd.f32 %v1088_v54, %v1000_v34  ;;  %v830_v62 = vpop.f32.mrf.mxu1  ;;  %v1002_v25 = vpop.f32.mrf.mxu0  ;;  %v4951_v24 = vld [vmem:[%s6698_s3 + $0x98] sm:$0xff]  ;;  %v1812_v54 = vld [vmem:[%s6698_s3 + $0x90] sm:$0xff] }
 0x1c8   :  { %v831_v9 = vadd.f32 %v830_v62, %v492_v3  ;;  %v1003_v18 = vadd.f32 %v1002_v25, %v6768_v22  ;;  %2098 = vmatpush.msrb.mxu0 %v4951_v24  ;;  %1920 = vmatpush.msrb.mxu1 %v1812_v54  ;;  %v6771_v62 = vld [vmem:[#allocation7_spill] sm:$0xff] }
 0x1c9   :  { %6766 = vst [vmem:[#allocation30_spill] sm:$0xff] %v4920_v32  ;;  %v6772_v25 = vld [vmem:[#allocation3_spill] sm:$0xff]  ;;  %v6792_v32 = vld [vmem:[#allocation14_spill] sm:$0xff] }
 0x1ca   :  { %6767 = vst [vmem:[#allocation31_spill] sm:$0xff] %v4922_v45  ;;  %1354 = vmatmul.f32.gmra.mxu1 %v1163_v36  ;;  %1526 = vmatmul.f32.gmra.mxu0 %v1159_v31  ;;  %v3634_v31 = vld [vmem:[%s6695_s4 + $0x1c0] sm:$0xff]  ;;  %v495_v63 = vadd.f32 %v6772_v25, %v6771_v62  ;;  %v3635_v3 = vld [vmem:[%s6695_s4 + $0x1c8] sm:$0xff]  ;;  %v5014_v45 = vld [vmem:[%s6698_s3 + $0x78] sm:$0xff] }
 0x1cb   :  { %3657 = vmatmul.msk.f32.gmra.mxu3 %vm267_vm0, %v1164_v30  ;;  %3679 = vmatmul.msk.f32.gmra.mxu2 %vm267_vm0, %v1160_v55  ;;  %v1165_v13 = vunpack.c.l.bf16 %v3634_v31  ;;  %v1166_v34 = vunpack.c.h.bf16 %v3634_v31  ;;  %v6773_v31 = vld [vmem:[#allocation4_spill] sm:$0xff]  ;;  %v1168_v25 = vunpack.c.h.bf16 %v3635_v3 }
 0x1ce   :  { %v919_v55 = vpop.f32.mrf.mxu3  ;;  %v1091_v10 = vpop.f32.mrf.mxu2 }
 0x1cf   :  { %v4944_v35 = vadd.f32 %v919_v55, %v831_v9  ;;  %v4946_v11 = vadd.f32 %v1091_v10, %v1003_v18  ;;  %v833_v53 = vpop.f32.mrf.mxu1  ;;  %v1005_v38 = vpop.f32.mrf.mxu0  ;;  %v1167_v55 = vunpack.c.l.bf16 %v3635_v3 }
 0x1d0   :  { %v834_v12 = vadd.f32 %v833_v53, %v495_v63  ;;  %v1006_v9 = vadd.f32 %v1005_v38, %v6773_v31  ;;  %v4976_v53 = vld [vmem:[%s6698_s3 + $0x88] sm:$0xff]  ;;  %v3636_v38 = vld [vmem:[%s6695_s4 + $0x1d0] sm:$0xff] }
 0x1d1   :  { %6769 = vst [vmem:[#allocation2_spill] sm:$0xff] %v4944_v35  ;;  %2099 = vmatpush.msrb.mxu0 %v4976_v53  ;;  %v1169_v31 = vunpack.c.l.bf16 %v3636_v38 }
 0x1d2   :  { %6770 = vst [vmem:[#allocation32_spill] sm:$0xff] %v4946_v11  ;;  %1357 = vmatmul.f32.gmra.mxu1 %v1165_v13  ;;  %1529 = vmatmul.f32.gmra.mxu0 %v1161_v48  ;;  %v6777_v11 = vld [vmem:[#allocation5_spill] sm:$0xff] }
 0x1d3   :  { %3658 = vmatmul.msk.f32.gmra.mxu3 %vm267_vm0, %v1166_v34  ;;  %3680 = vmatmul.msk.f32.gmra.mxu2 %vm267_vm0, %v1162_v8  ;;  %v6776_v8 = vld [vmem:[#allocation10_spill] sm:$0xff] }
 0x1d4   :  { %v498_v35 = vadd.f32 %v6777_v11, %v6776_v8  ;;  %v1170_v8 = vunpack.c.h.bf16 %v3636_v38  ;;  %v1832_v38 = vld [vmem:[%s6698_s3 + $0x130] sm:$0xff]  ;;  %2100 = vmatpush.msrb.mxu0 %v5014_v45 }
 0x1d5   :  { %2015 = vmatpush.msrb.mxu3 %v1832_v38 }
 0x1d6   :  { %v922_v22 = vpop.f32.mrf.mxu3  ;;  %v1094_v18 = vpop.f32.mrf.mxu2 }
 0x1d7   :  { %v4965_v10 = vadd.f32 %v922_v22, %v834_v12  ;;  %v4967_v48 = vadd.f32 %v1094_v18, %v1006_v9  ;;  %v836_v54 = vpop.f32.mrf.mxu1  ;;  %v1008_v62 = vpop.f32.mrf.mxu0 }
 0x1d8   :  { %v837_v63 = vadd.f32 %v836_v54, %v498_v35  ;;  %v6781_v35 = vld [vmem:[#allocation13_spill] sm:$0xff]  ;;  %v6782_v54 = vld [vmem:[#allocation8_spill] sm:$0xff] }
 0x1d9   :  { %6774 = vst [vmem:[#allocation7_spill] sm:$0xff] %v4965_v10 }
 0x1da   :  { %6775 = vst [vmem:[#allocation3_spill] sm:$0xff] %v4967_v48  ;;  %1360 = vmatmul.f32.gmra.mxu1 %v1167_v55  ;;  %1532 = vmatmul.f32.gmra.mxu0 %v1163_v36  ;;  %v6778_v36 = vld [vmem:[#allocation6_spill] sm:$0xff] }
 0x1db   :  { %3659 = vmatmul.msk.f32.gmra.mxu3 %vm267_vm0, %v1168_v25  ;;  %3681 = vmatmul.msk.f32.gmra.mxu2 %vm267_vm0, %v1164_v30  ;;  %v1009_v3 = vadd.f32 %v1008_v62, %v6778_v36  ;;  %v1810_v48 = vld [vmem:[%s6698_s3 + $0x80] sm:$0xff]  ;;  %v501_v62 = vadd.f32 %v6782_v54, %v6781_v35  ;;  %v6783_v36 = vld [vmem:[#allocation9_spill] sm:$0xff] }
 0x1dc   :  { %1921 = vmatpush.msrb.mxu1 %v1810_v48 }
 0x1de   :  { %v925_v12 = vpop.f32.mrf.mxu3  ;;  %v1097_v11 = vpop.f32.mrf.mxu2 }
 0x1df   :  { %v4983_v9 = vadd.f32 %v925_v12, %v837_v63  ;;  %v4985_v30 = vadd.f32 %v1097_v11, %v1009_v3  ;;  %v839_v22 = vpop.f32.mrf.mxu1  ;;  %v1011_v18 = vpop.f32.mrf.mxu0  ;;  %v4997_v63 = vld [vmem:[%s6698_s3 + $0x138] sm:$0xff] }
 0x1e0   :  { %2193 = vmatpush.msrb.mxu2 %v4997_v63  ;;  %v840_v48 = vadd.f32 %v839_v22, %v501_v62  ;;  %v1012_v3 = vadd.f32 %v1011_v18, %v6783_v36  ;;  %v1808_v22 = vld [vmem:[%s6698_s3 + $0x70] sm:$0xff]  ;;  %v6787_v62 = vld [vmem:[#allocation11_spill] sm:$0xff] }
 0x1e1   :  { %6779 = vst [vmem:[#allocation4_spill] sm:$0xff] %v4983_v9  ;;  %1922 = vmatpush.msrb.mxu1 %v1808_v22  ;;  %v6786_v18 = vld [vmem:[#allocation16_spill] sm:$0xff] }
 0x1e2   :  { %6780 = vst [vmem:[#allocation10_spill] sm:$0xff] %v4985_v30  ;;  %1363 = vmatmul.f32.gmra.mxu1 %v1169_v31  ;;  %1535 = vmatmul.f32.gmra.mxu0 %v1165_v13  ;;  %v3637_v13 = vld [vmem:[%s6695_s4 + $0x1d8] sm:$0xff]  ;;  %v504_v38 = vadd.f32 %v6787_v62, %v6786_v18  ;;  %v6788_v36 = vld [vmem:[#allocation12_spill] sm:$0xff] }
 0x1e3   :  { %3660 = vmatmul.msk.f32.gmra.mxu3 %vm267_vm0, %v1170_v8  ;;  %3682 = vmatmul.msk.f32.gmra.mxu2 %vm267_vm0, %v1166_v34  ;;  %v1171_v11 = vunpack.c.l.bf16 %v3637_v13  ;;  %v1172_v10 = vunpack.c.h.bf16 %v3637_v13  ;;  %v3638_v13 = vld [vmem:[%s6695_s4 + $0x1e0] sm:$0xff] }
 0x1e4   :  { %v1174_v62 = vunpack.c.h.bf16 %v3638_v13 }
 0x1e6   :  { %v928_v34 = vpop.f32.mrf.mxu3  ;;  %v1100_v12 = vpop.f32.mrf.mxu2 }
 0x1e7   :  { %v5007_v35 = vadd.f32 %v928_v34, %v840_v48  ;;  %v5009_v54 = vadd.f32 %v1100_v12, %v1012_v3  ;;  %v842_v30 = vpop.f32.mrf.mxu1  ;;  %v1014_v9 = vpop.f32.mrf.mxu0 }
 0x1e8   :  { %v843_v48 = vadd.f32 %v842_v30, %v504_v38  ;;  %v1015_v3 = vadd.f32 %v1014_v9, %v6788_v36  ;;  %v5039_v9 = vld [vmem:[%s6698_s3 + $0x68] sm:$0xff] }
 0x1e9   :  { %6784 = vst [vmem:[#allocation5_spill] sm:$0xff] %v5007_v35  ;;  %v3639_v30 = vld [vmem:[%s6695_s4 + $0x1e8] sm:$0xff]  ;;  %2101 = vmatpush.msrb.mxu0 %v5039_v9 }
 0x1ea   :  { %6785 = vst [vmem:[#allocation6_spill] sm:$0xff] %v5009_v54  ;;  %1366 = vmatmul.f32.gmra.mxu1 %v1171_v11  ;;  %1538 = vmatmul.f32.gmra.mxu0 %v1167_v55  ;;  %v1173_v54 = vunpack.c.l.bf16 %v3638_v13  ;;  %v1175_v36 = vunpack.c.l.bf16 %v3639_v30 }
 0x1eb   :  { %3661 = vmatmul.msk.f32.gmra.mxu3 %vm267_vm0, %v1172_v10  ;;  %3683 = vmatmul.msk.f32.gmra.mxu2 %vm267_vm0, %v1168_v25  ;;  %v6791_v25 = vld [vmem:[#allocation19_spill] sm:$0xff] }
 0x1ec   :  { %v507_v15 = vadd.f32 %v6792_v32, %v6791_v25  ;;  %v1176_v25 = vunpack.c.h.bf16 %v3639_v30  ;;  %v1830_v30 = vld [vmem:[%s6698_s3 + $0x120] sm:$0xff] }
 0x1ed   :  { %2016 = vmatpush.msrb.mxu3 %v1830_v30 }
 0x1ee   :  { %v931_v34 = vpop.f32.mrf.mxu3  ;;  %v1103_v12 = vpop.f32.mrf.mxu2 }
 0x1ef   :  { %v5028_v22 = vadd.f32 %v931_v34, %v843_v48  ;;  %v5030_v55 = vadd.f32 %v1103_v12, %v1015_v3  ;;  %v845_v35 = vpop.f32.mrf.mxu1  ;;  %v1017_v18 = vpop.f32.mrf.mxu0 }
 0x1f0   :  { %v846_v38 = vadd.f32 %v845_v35, %v507_v15  ;;  %v6797_v15 = vld [vmem:[#allocation17_spill] sm:$0xff] }
 0x1f1   :  { %6789 = vst [vmem:[#allocation13_spill] sm:$0xff] %v5028_v22  ;;  %v6796_v22 = vld [vmem:[#allocation22_spill] sm:$0xff] }
 0x1f2   :  { %6790 = vst [vmem:[#allocation8_spill] sm:$0xff] %v5030_v55  ;;  %1369 = vmatmul.f32.gmra.mxu1 %v1173_v54  ;;  %1541 = vmatmul.f32.gmra.mxu0 %v1169_v31  ;;  %v6793_v31 = vld [vmem:[#allocation15_spill] sm:$0xff]  ;;  %v1806_v55 = vld [vmem:[%s6698_s3 + $0x60] sm:$0xff]  ;;  %v510_v35 = vadd.f32 %v6797_v15, %v6796_v22 }
 0x1f3   :  { %3662 = vmatmul.msk.f32.gmra.mxu3 %vm267_vm0, %v1174_v62  ;;  %3684 = vmatmul.msk.f32.gmra.mxu2 %vm267_vm0, %v1170_v8  ;;  %v1018_v13 = vadd.f32 %v1017_v18, %v6793_v31  ;;  %v5060_v18 = vld [vmem:[%s6698_s3 + $0x128] sm:$0xff] }
 0x1f4   :  { %1923 = vmatpush.msrb.mxu1 %v1806_v55  ;;  %2194 = vmatpush.msrb.mxu2 %v5060_v18  ;;  %v5077_v55 = vld [vmem:[%s6698_s3 + $0x58] sm:$0xff] }
 0x1f5   :  { %2102 = vmatpush.msrb.mxu0 %v5077_v55 }
 0x1f6   :  { %v934_v48 = vpop.f32.mrf.mxu3  ;;  %v1106_v32 = vpop.f32.mrf.mxu2 }
 0x1f7   :  { %v5046_v3 = vadd.f32 %v934_v48, %v846_v38  ;;  %v5048_v8 = vadd.f32 %v1106_v32, %v1018_v13  ;;  %v848_v34 = vpop.f32.mrf.mxu1  ;;  %v1020_v12 = vpop.f32.mrf.mxu0  ;;  %v6798_v38 = vld [vmem:[#allocation18_spill] sm:$0xff] }
 0x1f8   :  { %v849_v22 = vadd.f32 %v848_v34, %v510_v35  ;;  %v1021_v31 = vadd.f32 %v1020_v12, %v6798_v38  ;;  %v1804_v34 = vld [vmem:[%s6698_s3 + $0x50] sm:$0xff]  ;;  %v6801_v12 = vld [vmem:[#allocation25_spill] sm:$0xff] }
 0x1f9   :  { %6794 = vst [vmem:[#allocation9_spill] sm:$0xff] %v5046_v3  ;;  %v6802_v35 = vld [vmem:[#allocation20_spill] sm:$0xff]  ;;  %1924 = vmatpush.msrb.mxu1 %v1804_v34  ;;  %v6803_v38 = vld [vmem:[#allocation21_spill] sm:$0xff] }
 0x1fa   :  { %6795 = vst [vmem:[#allocation16_spill] sm:$0xff] %v5048_v8  ;;  %1372 = vmatmul.f32.gmra.mxu1 %v1175_v36  ;;  %1544 = vmatmul.f32.gmra.mxu0 %v1171_v11  ;;  %v3640_v11 = vld [vmem:[%s6695_s4 + $0x1f0] sm:$0xff]  ;;  %v513_v30 = vadd.f32 %v6802_v35, %v6801_v12 }
 0x1fb   :  { %3663 = vmatmul.msk.f32.gmra.mxu3 %vm267_vm0, %v1176_v25  ;;  %3685 = vmatmul.msk.f32.gmra.mxu2 %vm267_vm0, %v1172_v10  ;;  %v1177_v48 = vunpack.c.l.bf16 %v3640_v11  ;;  %v1178_v14 = vunpack.c.h.bf16 %v3640_v11  ;;  %v3641_v11 = vld [vmem:[%s6695_s4 + $0x1f8] sm:$0xff] }
 0x1fe   :  { %v937_v10 = vpop.f32.mrf.mxu3  ;;  %v1109_v13 = vpop.f32.mrf.mxu2 }
 0x1ff   :  { %v5070_v32 = vadd.f32 %v937_v10, %v849_v22  ;;  %v5072_v15 = vadd.f32 %v1109_v13, %v1021_v31  ;;  %v851_v8 = vpop.f32.mrf.mxu1  ;;  %v1023_v3 = vpop.f32.mrf.mxu0 }
 0x200   :  { %v852_v22 = vadd.f32 %v851_v8, %v513_v30  ;;  %v1024_v31 = vadd.f32 %v1023_v3, %v6803_v38  ;;  %v5102_v3 = vld [vmem:[%s6698_s3 + $0x48] sm:$0xff]  ;;  %v3642_v8 = vld [vmem:[%s6695_s4 + $0x200] sm:$0xff] }
 0x201   :  { %6799 = vst [vmem:[#allocation11_spill] sm:$0xff] %v5070_v32  ;;  %2103 = vmatpush.msrb.mxu0 %v5102_v3  ;;  %v1181_v47 = vunpack.c.l.bf16 %v3642_v8 }
 0x202   :  { %6800 = vst [vmem:[#allocation12_spill] sm:$0xff] %v5072_v15  ;;  %1375 = vmatmul.f32.gmra.mxu1 %v1177_v48  ;;  %1547 = vmatmul.f32.gmra.mxu0 %v1173_v54  ;;  %v1179_v54 = vunpack.c.l.bf16 %v3641_v11 }
 0x203   :  { %3664 = vmatmul.msk.f32.gmra.mxu3 %vm267_vm0, %v1178_v14  ;;  %3686 = vmatmul.msk.f32.gmra.mxu2 %vm267_vm0, %v1174_v62  ;;  %v1180_v62 = vunpack.c.h.bf16 %v3641_v11 }
 0x206   :  { %v940_v10 = vpop.f32.mrf.mxu3  ;;  %v1112_v13 = vpop.f32.mrf.mxu2 }
 0x207   :  { %v5091_v15 = vadd.f32 %v940_v10, %v852_v22  ;;  %v5093_v12 = vadd.f32 %v1112_v13, %v1024_v31  ;;  %v854_v35 = vpop.f32.mrf.mxu1  ;;  %v1026_v32 = vpop.f32.mrf.mxu0  ;;  %v1182_v31 = vunpack.c.h.bf16 %v3642_v8  ;;  %v1802_v13 = vld [vmem:[%s6698_s3 + $0x40] sm:$0xff] }
 0x208   :  { %v855_v34 = vadd.f32 %v854_v35, %v516_v33  ;;  %v5121_v33 = vld [vmem:[%s6698_s3 + $0x118] sm:$0xff]  ;;  %v3643_v35 = vld [vmem:[%s6695_s4 + $0x208] sm:$0xff]  ;;  %1925 = vmatpush.msrb.mxu1 %v1802_v13 }
 0x209   :  { %2195 = vmatpush.msrb.mxu2 %v5121_v33  ;;  %v5139_v13 = vld [vmem:[%s6698_s3 + $0x38] sm:$0xff] }
 0x20a   :  { %1378 = vmatmul.f32.gmra.mxu1 %v1179_v54  ;;  %1550 = vmatmul.f32.gmra.mxu0 %v1175_v36  ;;  %v6805_v36 = vld [vmem:[#allocation24_spill] sm:$0xff] }
 0x20b   :  { %3665 = vmatmul.msk.f32.gmra.mxu3 %vm267_vm0, %v1180_v62  ;;  %3687 = vmatmul.msk.f32.gmra.mxu2 %vm267_vm0, %v1176_v25  ;;  %v1027_v30 = vadd.f32 %v1026_v32, %v6805_v36  ;;  %v1828_v32 = vld [vmem:[%s6698_s3 + $0x110] sm:$0xff] }
 0x20c   :  { %2017 = vmatpush.msrb.mxu3 %v1828_v32  ;;  %2104 = vmatpush.msrb.mxu0 %v5139_v13 }
 0x20e   :  { %v943_v11 = vpop.f32.mrf.mxu3  ;;  %v1115_v56 = vpop.f32.mrf.mxu2 }
 0x20f   :  { %v5109_v22 = vadd.f32 %v943_v11, %v855_v34  ;;  %v5111_v25 = vadd.f32 %v1115_v56, %v1027_v30  ;;  %v1029_v38 = vpop.f32.mrf.mxu0  ;;  %v1334_v10 = vpop.f32.mrf.mxu1  ;;  %v1183_v34 = vunpack.c.l.bf16 %v3643_v35  ;;  %v1184_v56 = vunpack.c.h.bf16 %v3643_v35 }
 0x211   :  { %6806 = vst [vmem:[#allocation19_spill] sm:$0xff] %v5109_v22 }
 0x212   :  { %6807 = vst [vmem:[#allocation14_spill] sm:$0xff] %v5111_v25  ;;  %1381 = vmatmul.f32.gmra.mxu1 %v1181_v47  ;;  %1553 = vmatmul.f32.gmra.mxu0 %v1177_v48  ;;  %v1030_v48 = vadd.f32 %v1029_v38, %v4643_v1  ;;  %v1800_v1 = vld [vmem:[%s6698_s3 + $0x30] sm:$0xff] }
 0x213   :  { %3666 = vmatmul.msk.f32.gmra.mxu3 %vm267_vm0, %v1182_v31  ;;  %3688 = vmatmul.msk.f32.gmra.mxu2 %vm267_vm0, %v1178_v14 }
 0x214   :  { %1926 = vmatpush.msrb.mxu1 %v1800_v1 }
 0x216   :  { %v1118_v14 = vpop.f32.mrf.mxu2  ;;  %v1423_v8 = vpop.f32.mrf.mxu3 }
 0x217   :  { %v5131_v36 = vadd.f32 %v1118_v14, %v1030_v48  ;;  %v1424_v30 = vadd.f32 %v1423_v8, %v1334_v10  ;;  %v1032_v11 = vpop.f32.mrf.mxu0  ;;  %v1337_v25 = vpop.f32.mrf.mxu1 }
 0x218   :  { %v1033_v38 = vadd.f32 %v1032_v11, %v4662_v4  ;;  %v5161_v4 = vld [vmem:[%s6698_s3 + $0x28] sm:$0xff] }
 0x219   :  { %v5134_v22 = vadd.f32 %v1424_v30, %v4645_v0  ;;  %v3644_v0 = vld [vmem:[%s6695_s4 + $0x210] sm:$0xff]  ;;  %2105 = vmatpush.msrb.mxu0 %v5161_v4 }
 0x21a   :  { %1384 = vmatmul.f32.gmra.mxu1 %v1183_v34  ;;  %1556 = vmatmul.f32.gmra.mxu0 %v1179_v54  ;;  %v1185_v35 = vunpack.c.l.bf16 %v3644_v0  ;;  %v1186_v54 = vunpack.c.h.bf16 %v3644_v0 }
 0x21b   :  { %3667 = vmatmul.msk.f32.gmra.mxu3 %vm267_vm0, %v1184_v56  ;;  %3689 = vmatmul.msk.f32.gmra.mxu2 %vm267_vm0, %v1180_v62 }
 0x21e   :  { %v1121_v10 = vpop.f32.mrf.mxu2  ;;  %v1426_v32 = vpop.f32.mrf.mxu3 }
 0x21f   :  { %v5151_v48 = vadd.f32 %v1121_v10, %v1033_v38  ;;  %v1427_v14 = vadd.f32 %v1426_v32, %v1337_v25  ;;  %v1340_v8 = vpop.f32.mrf.mxu1  ;;  %v1512_v30 = vpop.f32.mrf.mxu0  ;;  %v5166_v25 = vld [vmem:[%s6695_s4 + $0x218] sm:$0xff] }
 0x221   :  { %v5154_v62 = vadd.f32 %v1427_v14, %v4664_v37 }
 0x222   :  { %1387 = vmatmul.f32.gmra.mxu1 %v1185_v35  ;;  %1559 = vmatmul.f32.gmra.mxu0 %v1181_v47  ;;  %v1187_v47 = vunpack.c.l.bf16 %v5166_v25 }
 0x223   :  { %6808 = vst [vmem:[#allocation15_spill] sm:$0xff] %v5154_v62  ;;  %3668 = vmatmul.msk.f32.gmra.mxu3 %vm267_vm0, %v1186_v54  ;;  %3690 = vmatmul.msk.f32.gmra.mxu2 %vm267_vm0, %v1182_v31  ;;  %v1188_v31 = vunpack.c.h.bf16 %v5166_v25  ;;  %v1798_v62 = vld [vmem:[%s6698_s3 + $0x20] sm:$0xff] }
 0x224   :  { %1927 = vmatpush.msrb.mxu1 %v1798_v62 }
 0x226   :  { %v1429_v37 = vpop.f32.mrf.mxu3  ;;  %v1601_v11 = vpop.f32.mrf.mxu2 }
 0x227   :  { %v1430_v1 = vadd.f32 %v1429_v37, %v1340_v8  ;;  %v1602_v0 = vadd.f32 %v1601_v11, %v1512_v30  ;;  %v1343_v38 = vpop.f32.mrf.mxu1  ;;  %v1515_v10 = vpop.f32.mrf.mxu0  ;;  %v5185_v8 = vld [vmem:[%s6698_s3 + $0x108] sm:$0xff] }
 0x228   :  { %2196 = vmatpush.msrb.mxu2 %v5185_v8 }
 0x229   :  { %v5172_v32 = vadd.f32 %v1430_v1, %v4677_v20  ;;  %v5175_v14 = vadd.f32 %v1602_v0, %v4679_v39  ;;  %v1826_v20 = vld [vmem:[%s6698_s3 + $0x100] sm:$0xff] }
 0x22a   :  { %1390 = vmatmul.f32.gmra.mxu1 %v1187_v47  ;;  %1562 = vmatmul.f32.gmra.mxu0 %v1183_v34  ;;  %v5193_v39 = vld [vmem:[%s6695_s4 + $0x220] sm:$0xff] }
 0x22b   :  { %6809 = vst [vmem:[#allocation22_spill] sm:$0xff] %v5172_v32  ;;  %3669 = vmatmul.msk.f32.gmra.mxu3 %vm267_vm0, %v1188_v31  ;;  %3691 = vmatmul.msk.f32.gmra.mxu2 %vm267_vm0, %v1184_v56  ;;  %v1189_v30 = vunpack.c.l.bf16 %v5193_v39  ;;  %v1190_v11 = vunpack.c.h.bf16 %v5193_v39 }
 0x22c   :  { %2018 = vmatpush.msrb.mxu3 %v1826_v20  ;;  %v5209_v20 = vld [vmem:[%s6698_s3 + $0x18] sm:$0xff] }
 0x22d   :  { %2106 = vmatpush.msrb.mxu0 %v5209_v20 }
 0x22e   :  { %v1432_v34 = vpop.f32.mrf.mxu3  ;;  %v1604_v56 = vpop.f32.mrf.mxu2  ;;  %3786 = vmatpush.msra.mxu3 %v4748_v19  ;;  %v1796_v19 = vld [vmem:[%s6698_s3 + $0x10] sm:$0xff] }
 0x22f   :  { %v1433_v25 = vadd.f32 %v1432_v34, %v1343_v38  ;;  %v1605_v37 = vadd.f32 %v1604_v56, %v1515_v10  ;;  %v1346_v1 = vpop.f32.mrf.mxu1  ;;  %v1518_v0 = vpop.f32.mrf.mxu0  ;;  %1928 = vmatpush.msrb.mxu1 %v1796_v19  ;;  %v1794_v56 = vld [vmem:[%s6698_s3] sm:$0xff] }
 0x230   :  { %3787 = vmatpush.msra.mxu3 %v4808_v43 }
 0x231   :  { %v5201_v32 = vadd.f32 %v1433_v25, %v4698_v57  ;;  %v5204_v62 = vadd.f32 %v1605_v37, %v4700_v44  ;;  %v5219_v57 = vld [vmem:[%s6695_s4 + $0x228] sm:$0xff]  ;;  %1929 = vmatpush.msrb.mxu1 %v1794_v56 }
 0x232   :  { %1393 = vmatmul.f32.gmra.mxu1 %v1189_v30  ;;  %1565 = vmatmul.f32.gmra.mxu0 %v1185_v35  ;;  %v1191_v38 = vunpack.c.l.bf16 %v5219_v57  ;;  %v1192_v39 = vunpack.c.h.bf16 %v5219_v57 }
 0x233   :  { %3670 = vmatmul.msk.f32.gmra.mxu3 %vm267_vm0, %v1190_v11  ;;  %3692 = vmatmul.msk.f32.gmra.mxu2 %vm267_vm0, %v1186_v54 }
 0x234   :  { %3788 = vmatpush.msra.mxu3 %v4871_v28  ;;  %3770 = vmatpush.msra.mxu1 %v4762_v26 }
 0x236   :  { %v1435_v44 = vpop.f32.mrf.mxu3  ;;  %v1607_v43 = vpop.f32.mrf.mxu2  ;;  %3789 = vmatpush.msra.mxu3 %v4934_v17  ;;  %v5242_v17 = vld [vmem:[%s6698_s3 + $0x8] sm:$0xff]  ;;  %3771 = vmatpush.msra.mxu1 %v4787_v16 }
 0x237   :  { %v1436_v10 = vadd.f32 %v1435_v44, %v1346_v1  ;;  %v1608_v35 = vadd.f32 %v1607_v43, %v1518_v0  ;;  %v1349_v34 = vpop.f32.mrf.mxu1  ;;  %v1521_v54 = vpop.f32.mrf.mxu0  ;;  %2107 = vmatpush.msrb.mxu0 %v5242_v17 }
 0x238   :  { %3790 = vmatpush.msra.mxu3 %v4997_v63  ;;  %3772 = vmatpush.msra.mxu1 %v4825_v2  ;;  %v3649_v2 = vld [vmem:[%s6695_s4 + $0x238] sm:$0xff] }
 0x239   :  { %v5230_v25 = vadd.f32 %v1436_v10, %v4716_v29  ;;  %v5233_v28 = vadd.f32 %v1608_v35, %v4718_v23  ;;  %v3648_v29 = vld [vmem:[%s6695_s4 + $0x230] sm:$0xff] }
 0x23a   :  { %1396 = vmatmul.f32.gmra.mxu1 %v1191_v38  ;;  %1568 = vmatmul.f32.gmra.mxu0 %v1187_v47  ;;  %v1193_v63 = vunpack.c.l.bf16 %v3648_v29  ;;  %v1194_v37 = vunpack.c.h.bf16 %v3648_v29 }
 0x23b   :  { %3671 = vmatmul.msk.f32.gmra.mxu3 %vm267_vm0, %v1192_v39  ;;  %3693 = vmatmul.msk.f32.gmra.mxu2 %vm267_vm0, %v1188_v31 }
 0x23c   :  { %3791 = vmatpush.msra.mxu3 %v5060_v18  ;;  %3773 = vmatpush.msra.mxu1 %v4850_v61  ;;  %v1195_v18 = vunpack.c.l.bf16 %v3649_v2 }
 0x23e   :  { %v1438_v23 = vpop.f32.mrf.mxu3  ;;  %v1610_v26 = vpop.f32.mrf.mxu2  ;;  %3792 = vmatpush.msra.mxu3 %v5121_v33  ;;  %3774 = vmatpush.msra.mxu1 %v4888_v46  ;;  %v3698_v46 = vld [vmem:[%s6695_s4 + $0x240] sm:$0xff] }
 0x23f   :  { %v1439_v47 = vadd.f32 %v1438_v23, %v1349_v34  ;;  %v1611_v31 = vadd.f32 %v1610_v26, %v1521_v54  ;;  %v1352_v1 = vpop.f32.mrf.mxu1  ;;  %v1524_v0 = vpop.f32.mrf.mxu0  ;;  %v1746_v43 = vunpack.c.l.bf16 %v3698_v46  ;;  %v1747_v10 = vunpack.c.h.bf16 %v3698_v46 }
 0x240   :  { %3793 = vmatpush.msra.mxu3 %v5185_v8  ;;  %3775 = vmatpush.msra.mxu1 %v4913_v52  ;;  %v1196_v8 = vunpack.c.h.bf16 %v3649_v2 }
 0x241   :  { %v5254_v19 = vadd.f32 %v1439_v47, %v4734_v51  ;;  %v5257_v16 = vadd.f32 %v1611_v31, %v4736_v6 }
 0x242   :  { %1399 = vmatmul.f32.gmra.mxu1 %v1193_v63  ;;  %1571 = vmatmul.f32.gmra.mxu0 %v1189_v30 }
 0x243   :  { %3672 = vmatmul.msk.f32.gmra.mxu3 %vm267_vm0, %v1194_v37  ;;  %3694 = vmatmul.msk.f32.gmra.mxu2 %vm267_vm0, %v1190_v11 }
 0x244   :  { %3776 = vmatpush.msra.mxu1 %v4951_v24 }
 0x246   :  { %v1441_v61 = vpop.f32.mrf.mxu3  ;;  %v1613_v51 = vpop.f32.mrf.mxu2  ;;  %3777 = vmatpush.msra.mxu1 %v4976_v53 }
 0x247   :  { %v1442_v6 = vadd.f32 %v1441_v61, %v1352_v1  ;;  %v1614_v33 = vadd.f32 %v1613_v51, %v1524_v0  ;;  %v1355_v57 = vpop.f32.mrf.mxu1  ;;  %v1527_v30 = vpop.f32.mrf.mxu0 }
 0x248   :  { %3778 = vmatpush.msra.mxu1 %v5014_v45  ;;  %v3699_v45 = vld [vmem:[%s6695_s4 + $0x248] sm:$0xff] }
 0x249   :  { %v5269_v11 = vadd.f32 %v1442_v6, %v4755_v40  ;;  %v5272_v44 = vadd.f32 %v1614_v33, %v4757_v42  ;;  %v1748_v54 = vunpack.c.l.bf16 %v3699_v45  ;;  %v1749_v56 = vunpack.c.h.bf16 %v3699_v45 }
 0x24a   :  { %1402 = vmatmul.f32.gmra.mxu1 %v1195_v18  ;;  %1574 = vmatmul.f32.gmra.mxu0 %v1191_v38 }
 0x24b   :  { %3673 = vmatmul.msk.f32.gmra.mxu3 %vm267_vm0, %v1196_v8  ;;  %3695 = vmatmul.msk.f32.gmra.mxu2 %vm267_vm0, %v1192_v39 }
 0x24c   :  { %3779 = vmatpush.msra.mxu1 %v5039_v9 }
 0x24e   :  { %v1444_v52 = vpop.f32.mrf.mxu3  ;;  %v1616_v24 = vpop.f32.mrf.mxu2  ;;  %3780 = vmatpush.msra.mxu1 %v5077_v55  ;;  %v3700_v55 = vld [vmem:[%s6695_s4 + $0x250] sm:$0xff] }
 0x24f   :  { %v1445_v40 = vadd.f32 %v1444_v52, %v1355_v57  ;;  %v1617_v42 = vadd.f32 %v1616_v24, %v1527_v30  ;;  %v1358_v35 = vpop.f32.mrf.mxu1  ;;  %v1530_v38 = vpop.f32.mrf.mxu0  ;;  %v1750_v47 = vunpack.c.l.bf16 %v3700_v55  ;;  %v1751_v31 = vunpack.c.h.bf16 %v3700_v55  ;;  %v3702_v57 = vld [vmem:[%s6695_s4 + $0x260] sm:$0xff]  ;;  %v3704_v55 = vld [vmem:[%s6695_s4 + $0x270] sm:$0xff] }
 0x250   :  { %3781 = vmatpush.msra.mxu1 %v5102_v3  ;;  %v1754_v52 = vunpack.c.l.bf16 %v3702_v57 }
 0x251   :  { %v5283_v39 = vadd.f32 %v1445_v40, %v4776_v21  ;;  %v5286_v34 = vadd.f32 %v1617_v42, %v4778_v41 }
 0x252   :  { %1577 = vmatmul.f32.gmra.mxu0 %v1193_v63  ;;  %1930 = vmatmul.f32.vlgmr.msrb.gmra.mxu1 %v1746_v43 }
 0x253   :  { %3696 = vmatmul.msk.f32.gmra.mxu2 %vm267_vm0, %v1194_v37  ;;  %3722 = vmatmul.msk.f32.vlgmr.msrb.gmra.mxu3 %vm267_vm0, %v1747_v10 }
 0x254   :  { %3782 = vmatpush.msra.mxu1 %v5139_v13 }
 0x256   :  { %v1447_v53 = vpop.f32.mrf.mxu3  ;;  %v1619_v9 = vpop.f32.mrf.mxu2  ;;  %3783 = vmatpush.msra.mxu1 %v5161_v4  ;;  %v3701_v4 = vld [vmem:[%s6695_s4 + $0x258] sm:$0xff] }
 0x257   :  { %v1448_v21 = vadd.f32 %v1447_v53, %v1358_v35  ;;  %v1620_v41 = vadd.f32 %v1619_v9, %v1530_v38  ;;  %v1361_v29 = vpop.f32.mrf.mxu1  ;;  %v1533_v23 = vpop.f32.mrf.mxu0  ;;  %v1752_v51 = vunpack.c.l.bf16 %v3701_v4  ;;  %v3703_v35 = vld [vmem:[%s6695_s4 + $0x268] sm:$0xff] }
 0x258   :  { %3784 = vmatpush.msra.mxu1 %v5209_v20  ;;  %v1756_v53 = vunpack.c.l.bf16 %v3703_v35 }
 0x259   :  { %v5297_v26 = vadd.f32 %v1448_v21, %v4794_v27  ;;  %v5300_v63 = vadd.f32 %v1620_v41, %v4796_v49 }
 0x25a   :  { %1580 = vmatmul.f32.gmra.mxu0 %v1195_v18  ;;  %1933 = vmatmul.f32.gmra.mxu1 %v1748_v54 }
 0x25b   :  { %3697 = vmatmul.msk.f32.gmra.mxu2 %vm267_vm0, %v1196_v8  ;;  %3723 = vmatmul.msk.f32.gmra.mxu3 %vm267_vm0, %v1749_v56 }
 0x25c   :  { %3785 = vmatpush.msra.mxu1 %v5242_v17 }
 0x25e   :  { %v1450_v3 = vpop.f32.mrf.mxu3  ;;  %v1622_v13 = vpop.f32.mrf.mxu2 }
 0x25f   :  { %v1451_v27 = vadd.f32 %v1450_v3, %v1361_v29  ;;  %v1623_v49 = vadd.f32 %v1622_v13, %v1533_v23  ;;  %v1364_v37 = vpop.f32.mrf.mxu1  ;;  %v1536_v1 = vpop.f32.mrf.mxu0  ;;  %v6811_v29 = vld [vmem:[#allocation27_spill] sm:$0xff] }
 0x261   :  { %v5311_v0 = vadd.f32 %v1451_v27, %v4818_v60  ;;  %v5314_v2 = vadd.f32 %v1623_v49, %v4820_v7  ;;  %v1753_v60 = vunpack.c.h.bf16 %v3701_v4  ;;  %v6812_v4 = vld [vmem:[#allocation28_spill] sm:$0xff] }
 0x262   :  { %1936 = vmatmul.f32.gmra.mxu1 %v1750_v47  ;;  %2108 = vmatmul.f32.vlgmr.msrb.gmra.mxu0 %v1746_v43 }
 0x263   :  { %3724 = vmatmul.msk.f32.gmra.mxu3 %vm267_vm0, %v1751_v31  ;;  %3746 = vmatmul.msk.f32.vlgmr.msrb.gmra.mxu2 %vm267_vm0, %v1747_v10 }
 0x266   :  { %v1453_v20 = vpop.f32.mrf.mxu3  ;;  %v1625_v61 = vpop.f32.mrf.mxu2 }
 0x267   :  { %v1454_v17 = vadd.f32 %v1453_v20, %v1364_v37  ;;  %v1626_v18 = vadd.f32 %v1625_v61, %v1536_v1  ;;  %v1367_v6 = vpop.f32.mrf.mxu1  ;;  %v1539_v33 = vpop.f32.mrf.mxu0  ;;  %v6813_v61 = vld [vmem:[#allocation29_spill] sm:$0xff] }
 0x269   :  { %v5322_v7 = vadd.f32 %v1454_v17, %v4839_v50  ;;  %v5325_v8 = vadd.f32 %v1626_v18, %v4841_v58  ;;  %v1755_v50 = vunpack.c.h.bf16 %v3702_v57  ;;  %v3705_v17 = vld [vmem:[%s6695_s4 + $0x278] sm:$0xff] }
 0x26a   :  { %1939 = vmatmul.f32.gmra.mxu1 %v1752_v51  ;;  %2111 = vmatmul.f32.gmra.mxu0 %v1748_v54 }
 0x26b   :  { %3725 = vmatmul.msk.f32.gmra.mxu3 %vm267_vm0, %v1753_v60  ;;  %3747 = vmatmul.msk.f32.gmra.mxu2 %vm267_vm0, %v1749_v56 }
 0x26e   :  { %v1456_v30 = vpop.f32.mrf.mxu3  ;;  %v1628_v46 = vpop.f32.mrf.mxu2 }
 0x26f   :  { %v1457_v24 = vadd.f32 %v1456_v30, %v1367_v6  ;;  %v1629_v43 = vadd.f32 %v1628_v46, %v1539_v33  ;;  %v1370_v40 = vpop.f32.mrf.mxu1  ;;  %v1542_v42 = vpop.f32.mrf.mxu0  ;;  %v1760_v6 = vunpack.c.l.bf16 %v3705_v17  ;;  %v1761_v30 = vunpack.c.h.bf16 %v3705_v17 }
 0x271   :  { %v5333_v58 = vadd.f32 %v1457_v24, %v4857_v59  ;;  %v5336_v10 = vadd.f32 %v1629_v43, %v4859_v5  ;;  %v1757_v59 = vunpack.c.h.bf16 %v3703_v35  ;;  %v6810_v5 = vld [vmem:[#allocation26_spill] sm:$0xff] }
 0x272   :  { %1942 = vmatmul.f32.gmra.mxu1 %v1754_v52  ;;  %2114 = vmatmul.f32.gmra.mxu0 %v1750_v47  ;;  %v1758_v47 = vunpack.c.l.bf16 %v3704_v55  ;;  %v6814_v43 = vld [vmem:[#allocation30_spill] sm:$0xff] }
 0x273   :  { %3726 = vmatmul.msk.f32.gmra.mxu3 %vm267_vm0, %v1755_v50  ;;  %3748 = vmatmul.msk.f32.gmra.mxu2 %vm267_vm0, %v1751_v31  ;;  %v1759_v31 = vunpack.c.h.bf16 %v3704_v55 }
 0x276   :  { %v1459_v38 = vpop.f32.mrf.mxu3  ;;  %v1631_v45 = vpop.f32.mrf.mxu2 }
 0x277   :  { %v1460_v9 = vadd.f32 %v1459_v38, %v1370_v40  ;;  %v1632_v54 = vadd.f32 %v1631_v45, %v1542_v42  ;;  %v1373_v21 = vpop.f32.mrf.mxu1  ;;  %v1545_v41 = vpop.f32.mrf.mxu0 }
 0x279   :  { %v5344_v56 = vadd.f32 %v1460_v9, %v6810_v5  ;;  %v5347_v23 = vadd.f32 %v1632_v54, %v6811_v29  ;;  %v6816_v29 = vld [vmem:[#allocation2_spill] sm:$0xff] }
 0x27a   :  { %1945 = vmatmul.f32.gmra.mxu1 %v1756_v53  ;;  %2117 = vmatmul.f32.gmra.mxu0 %v1752_v51 }
 0x27b   :  { %3727 = vmatmul.msk.f32.gmra.mxu3 %vm267_vm0, %v1757_v59  ;;  %3749 = vmatmul.msk.f32.gmra.mxu2 %vm267_vm0, %v1753_v60 }
 0x27e   :  { %v1462_v3 = vpop.f32.mrf.mxu3  ;;  %v1634_v13 = vpop.f32.mrf.mxu2 }
 0x27f   :  { %v1463_v27 = vadd.f32 %v1462_v3, %v1373_v21  ;;  %v1635_v49 = vadd.f32 %v1634_v13, %v1545_v41  ;;  %v1376_v37 = vpop.f32.mrf.mxu1  ;;  %v1548_v1 = vpop.f32.mrf.mxu0 }
 0x281   :  { %v5355_v20 = vadd.f32 %v1463_v27, %v6812_v4  ;;  %v5358_v51 = vadd.f32 %v1635_v49, %v6813_v61 }
 0x282   :  { %1948 = vmatmul.f32.gmra.mxu1 %v1758_v47  ;;  %2120 = vmatmul.f32.gmra.mxu0 %v1754_v52  ;;  %v6815_v52 = vld [vmem:[#allocation31_spill] sm:$0xff] }
 0x283   :  { %3728 = vmatmul.msk.f32.gmra.mxu3 %vm267_vm0, %v1759_v31  ;;  %3750 = vmatmul.msk.f32.gmra.mxu2 %vm267_vm0, %v1755_v50  ;;  %v3706_v50 = vld [vmem:[%s6695_s4 + $0x280] sm:$0xff] }
 0x284   :  { %v1762_v45 = vunpack.c.l.bf16 %v3706_v50  ;;  %v1763_v21 = vunpack.c.h.bf16 %v3706_v50 }
 0x286   :  { %v1465_v18 = vpop.f32.mrf.mxu3  ;;  %v1637_v60 = vpop.f32.mrf.mxu2 }
 0x287   :  { %v1466_v33 = vadd.f32 %v1465_v18, %v1376_v37  ;;  %v1638_v57 = vadd.f32 %v1637_v60, %v1548_v1  ;;  %v1379_v46 = vpop.f32.mrf.mxu1  ;;  %v1551_v24 = vpop.f32.mrf.mxu0  ;;  %v6818_v18 = vld [vmem:[#allocation7_spill] sm:$0xff] }
 0x289   :  { %v5366_v40 = vadd.f32 %v1466_v33, %v6814_v43  ;;  %v5369_v42 = vadd.f32 %v1638_v57, %v6815_v52 }
 0x28a   :  { %1951 = vmatmul.f32.gmra.mxu1 %v1760_v6  ;;  %2123 = vmatmul.f32.gmra.mxu0 %v1756_v53  ;;  %v6817_v53 = vld [vmem:[#allocation32_spill] sm:$0xff] }
 0x28b   :  { %3729 = vmatmul.msk.f32.gmra.mxu3 %vm267_vm0, %v1761_v30  ;;  %3751 = vmatmul.msk.f32.gmra.mxu2 %vm267_vm0, %v1757_v59  ;;  %v3707_v59 = vld [vmem:[%s6695_s4 + $0x288] sm:$0xff] }
 0x28c   :  { %v1764_v49 = vunpack.c.l.bf16 %v3707_v59  ;;  %v1765_v4 = vunpack.c.h.bf16 %v3707_v59 }
 0x28e   :  { %v1468_v35 = vpop.f32.mrf.mxu3  ;;  %v1640_v38 = vpop.f32.mrf.mxu2 }
 0x28f   :  { %v1469_v9 = vadd.f32 %v1468_v35, %v1379_v46  ;;  %v1641_v54 = vadd.f32 %v1640_v38, %v1551_v24  ;;  %v1382_v41 = vpop.f32.mrf.mxu1  ;;  %v1554_v5 = vpop.f32.mrf.mxu0 }
 0x291   :  { %v5377_v55 = vadd.f32 %v1469_v9, %v6816_v29  ;;  %v5380_v3 = vadd.f32 %v1641_v54, %v6817_v53  ;;  %v6820_v9 = vld [vmem:[#allocation4_spill] sm:$0xff] }
 0x292   :  { %1954 = vmatmul.f32.gmra.mxu1 %v1762_v45  ;;  %2126 = vmatmul.f32.gmra.mxu0 %v1758_v47  ;;  %v6819_v47 = vld [vmem:[#allocation3_spill] sm:$0xff] }
 0x293   :  { %3730 = vmatmul.msk.f32.gmra.mxu3 %vm267_vm0, %v1763_v21  ;;  %3752 = vmatmul.msk.f32.gmra.mxu2 %vm267_vm0, %v1759_v31  ;;  %v3708_v31 = vld [vmem:[%s6695_s4 + $0x290] sm:$0xff] }
 0x294   :  { %v1766_v24 = vunpack.c.l.bf16 %v3708_v31  ;;  %v1767_v50 = vunpack.c.h.bf16 %v3708_v31 }
 0x296   :  { %v1471_v13 = vpop.f32.mrf.mxu3  ;;  %v1643_v27 = vpop.f32.mrf.mxu2 }
 0x297   :  { %v1472_v37 = vadd.f32 %v1471_v13, %v1382_v41  ;;  %v1644_v1 = vadd.f32 %v1643_v27, %v1554_v5  ;;  %v1385_v61 = vpop.f32.mrf.mxu1  ;;  %v1557_v17 = vpop.f32.mrf.mxu0 }
 0x299   :  { %v5388_v60 = vadd.f32 %v1472_v37, %v6818_v18  ;;  %v5391_v33 = vadd.f32 %v1644_v1, %v6819_v47 }
 0x29a   :  { %1957 = vmatmul.f32.gmra.mxu1 %v1764_v49  ;;  %2129 = vmatmul.f32.gmra.mxu0 %v1760_v6  ;;  %v6821_v6 = vld [vmem:[#allocation10_spill] sm:$0xff] }
 0x29b   :  { %3731 = vmatmul.msk.f32.gmra.mxu3 %vm267_vm0, %v1765_v4  ;;  %3753 = vmatmul.msk.f32.gmra.mxu2 %vm267_vm0, %v1761_v30  ;;  %v3709_v30 = vld [vmem:[%s6695_s4 + $0x298] sm:$0xff] }
 0x29c   :  { %v1768_v53 = vunpack.c.l.bf16 %v3709_v30  ;;  %v1769_v27 = vunpack.c.h.bf16 %v3709_v30 }
 0x29e   :  { %v1474_v57 = vpop.f32.mrf.mxu3  ;;  %v1646_v46 = vpop.f32.mrf.mxu2 }
 0x29f   :  { %v1475_v43 = vadd.f32 %v1474_v57, %v1385_v61  ;;  %v1647_v52 = vadd.f32 %v1646_v46, %v1557_v17  ;;  %v1388_v35 = vpop.f32.mrf.mxu1  ;;  %v1560_v38 = vpop.f32.mrf.mxu0  ;;  %v6822_v61 = vld [vmem:[#allocation5_spill] sm:$0xff] }
 0x2a1   :  { %v5399_v54 = vadd.f32 %v1475_v43, %v6820_v9  ;;  %v5402_v41 = vadd.f32 %v1647_v52, %v6821_v6  ;;  %v6824_v9 = vld [vmem:[#allocation13_spill] sm:$0xff] }
 0x2a2   :  { %1960 = vmatmul.f32.gmra.mxu1 %v1766_v24  ;;  %2132 = vmatmul.f32.gmra.mxu0 %v1762_v45  ;;  %v6823_v45 = vld [vmem:[#allocation6_spill] sm:$0xff] }
 0x2a3   :  { %3732 = vmatmul.msk.f32.gmra.mxu3 %vm267_vm0, %v1767_v50  ;;  %3754 = vmatmul.msk.f32.gmra.mxu2 %vm267_vm0, %v1763_v21  ;;  %v3710_v21 = vld [vmem:[%s6695_s4 + $0x2a0] sm:$0xff] }
 0x2a4   :  { %v1770_v57 = vunpack.c.l.bf16 %v3710_v21  ;;  %v1771_v52 = vunpack.c.h.bf16 %v3710_v21  ;;  %v6826_v21 = vld [vmem:[#allocation9_spill] sm:$0xff] }
 0x2a6   :  { %v1477_v5 = vpop.f32.mrf.mxu3  ;;  %v1649_v29 = vpop.f32.mrf.mxu2 }
 0x2a7   :  { %v1478_v59 = vadd.f32 %v1477_v5, %v1388_v35  ;;  %v1650_v13 = vadd.f32 %v1649_v29, %v1560_v38  ;;  %v1391_v37 = vpop.f32.mrf.mxu1  ;;  %v1563_v1 = vpop.f32.mrf.mxu0 }
 0x2a9   :  { %v5410_v17 = vadd.f32 %v1478_v59, %v6822_v61  ;;  %v5413_v18 = vadd.f32 %v1650_v13, %v6823_v45 }
 0x2aa   :  { %1963 = vmatmul.f32.gmra.mxu1 %v1768_v53  ;;  %2135 = vmatmul.f32.gmra.mxu0 %v1764_v49  ;;  %v6825_v49 = vld [vmem:[#allocation8_spill] sm:$0xff] }
 0x2ab   :  { %3733 = vmatmul.msk.f32.gmra.mxu3 %vm267_vm0, %v1769_v27  ;;  %3755 = vmatmul.msk.f32.gmra.mxu2 %vm267_vm0, %v1765_v4  ;;  %v3711_v4 = vld [vmem:[%s6695_s4 + $0x2a8] sm:$0xff] }
 0x2ac   :  { %v1772_v59 = vunpack.c.l.bf16 %v3711_v4 }
 0x2ae   :  { %v1480_v47 = vpop.f32.mrf.mxu3  ;;  %v1652_v31 = vpop.f32.mrf.mxu2 }
 0x2af   :  { %v1481_v46 = vadd.f32 %v1480_v47, %v1391_v37  ;;  %v1653_v43 = vadd.f32 %v1652_v31, %v1563_v1  ;;  %v1394_v35 = vpop.f32.mrf.mxu1  ;;  %v1566_v38 = vpop.f32.mrf.mxu0  ;;  %v1773_v1 = vunpack.c.h.bf16 %v3711_v4 }
 0x2b1   :  { %v5421_v6 = vadd.f32 %v1481_v46, %v6824_v9  ;;  %v5424_v30 = vadd.f32 %v1653_v43, %v6825_v49 }
 0x2b2   :  { %1966 = vmatmul.f32.gmra.mxu1 %v1770_v57  ;;  %2138 = vmatmul.f32.gmra.mxu0 %v1766_v24  ;;  %v6827_v24 = vld [vmem:[#allocation16_spill] sm:$0xff] }
 0x2b3   :  { %3734 = vmatmul.msk.f32.gmra.mxu3 %vm267_vm0, %v1771_v52  ;;  %3756 = vmatmul.msk.f32.gmra.mxu2 %vm267_vm0, %v1767_v50  ;;  %v3712_v50 = vld [vmem:[%s6695_s4 + $0x2b0] sm:$0xff] }
 0x2b4   :  { %v1775_v49 = vunpack.c.h.bf16 %v3712_v50 }
 0x2b6   :  { %v1483_v5 = vpop.f32.mrf.mxu3  ;;  %v1655_v29 = vpop.f32.mrf.mxu2 }
 0x2b7   :  { %v1484_v13 = vadd.f32 %v1483_v5, %v1394_v35  ;;  %v1656_v37 = vadd.f32 %v1655_v29, %v1566_v38  ;;  %v1397_v61 = vpop.f32.mrf.mxu1  ;;  %v1569_v45 = vpop.f32.mrf.mxu0  ;;  %v1774_v35 = vunpack.c.l.bf16 %v3712_v50  ;;  %v6828_v29 = vld [vmem:[#allocation11_spill] sm:$0xff] }
 0x2b9   :  { %v5432_v47 = vadd.f32 %v1484_v13, %v6826_v21  ;;  %v5435_v31 = vadd.f32 %v1656_v37, %v6827_v24 }
 0x2ba   :  { %1969 = vmatmul.f32.gmra.mxu1 %v1772_v59  ;;  %2141 = vmatmul.f32.gmra.mxu0 %v1768_v53  ;;  %v6830_v53 = vld [vmem:[#allocation12_spill] sm:$0xff] }
 0x2bb   :  { %3735 = vmatmul.msk.f32.gmra.mxu3 %vm267_vm0, %v1773_v1  ;;  %3757 = vmatmul.msk.f32.gmra.mxu2 %vm267_vm0, %v1769_v27  ;;  %v3713_v27 = vld [vmem:[%s6695_s4 + $0x2b8] sm:$0xff] }
 0x2bc   :  { %v1776_v21 = vunpack.c.l.bf16 %v3713_v27 }
 0x2be   :  { %v1486_v46 = vpop.f32.mrf.mxu3  ;;  %v1658_v43 = vpop.f32.mrf.mxu2 }
 0x2bf   :  { %v1487_v38 = vadd.f32 %v1486_v46, %v1397_v61  ;;  %v1659_v9 = vadd.f32 %v1658_v43, %v1569_v45  ;;  %v1400_v4 = vpop.f32.mrf.mxu1  ;;  %v1572_v5 = vpop.f32.mrf.mxu0  ;;  %v1777_v46 = vunpack.c.h.bf16 %v3713_v27 }
 0x2c1   :  { %v5443_v13 = vadd.f32 %v1487_v38, %v6828_v29  ;;  %v5446_v37 = vadd.f32 %v1659_v9, %v6830_v53 }
 0x2c2   :  { %1972 = vmatmul.f32.gmra.mxu1 %v1774_v35  ;;  %2144 = vmatmul.f32.gmra.mxu0 %v1770_v57 }
 0x2c3   :  { %6829 = vst [vmem:[#allocation17_spill] sm:$0xff] %v5443_v13  ;;  %3736 = vmatmul.msk.f32.gmra.mxu3 %vm267_vm0, %v1775_v49  ;;  %3758 = vmatmul.msk.f32.gmra.mxu2 %vm267_vm0, %v1771_v52  ;;  %v3714_v52 = vld [vmem:[%s6695_s4 + $0x2c0] sm:$0xff] }
 0x2c4   :  { %v1778_v29 = vunpack.c.l.bf16 %v3714_v52 }
 0x2c6   :  { %v1489_v61 = vpop.f32.mrf.mxu3  ;;  %v1661_v45 = vpop.f32.mrf.mxu2 }
 0x2c7   :  { %v1490_v24 = vadd.f32 %v1489_v61, %v1400_v4  ;;  %v1662_v50 = vadd.f32 %v1661_v45, %v1572_v5  ;;  %v1403_v43 = vpop.f32.mrf.mxu1  ;;  %v1575_v38 = vpop.f32.mrf.mxu0 }
 0x2c9   :  { %v5454_v9 = vadd.f32 %v1490_v24, %v5091_v15  ;;  %v5457_v57 = vadd.f32 %v1662_v50, %v5093_v12  ;;  %v1779_v15 = vunpack.c.h.bf16 %v3714_v52  ;;  %v6832_v12 = vld [vmem:[#allocation19_spill] sm:$0xff] }
 0x2ca   :  { %1975 = vmatmul.f32.gmra.mxu1 %v1776_v21  ;;  %2147 = vmatmul.f32.gmra.mxu0 %v1772_v59  ;;  %v6834_v59 = vld [vmem:[#allocation14_spill] sm:$0xff] }
 0x2cb   :  { %6831 = vst [vmem:[#allocation18_spill] sm:$0xff] %v5454_v9  ;;  %3737 = vmatmul.msk.f32.gmra.mxu3 %vm267_vm0, %v1777_v46  ;;  %3759 = vmatmul.msk.f32.gmra.mxu2 %vm267_vm0, %v1773_v1  ;;  %v3715_v1 = vld [vmem:[%s6695_s4 + $0x2c8] sm:$0xff] }
 0x2cc   :  { %v1780_v52 = vunpack.c.l.bf16 %v3715_v1 }
 0x2ce   :  { %v1492_v4 = vpop.f32.mrf.mxu3  ;;  %v1664_v5 = vpop.f32.mrf.mxu2 }
 0x2cf   :  { %v1493_v53 = vadd.f32 %v1492_v4, %v1403_v43  ;;  %v1665_v27 = vadd.f32 %v1664_v5, %v1575_v38  ;;  %v1578_v61 = vpop.f32.mrf.mxu0  ;;  %v1931_v45 = vpop.f32.mrf.mxu1  ;;  %v1781_v5 = vunpack.c.h.bf16 %v3715_v1 }
 0x2d1   :  { %v5465_v24 = vadd.f32 %v1493_v53, %v6832_v12  ;;  %v5468_v50 = vadd.f32 %v1665_v27, %v6834_v59 }
 0x2d2   :  { %1978 = vmatmul.f32.gmra.mxu1 %v1778_v29  ;;  %2150 = vmatmul.f32.gmra.mxu0 %v1774_v35  ;;  %v3716_v35 = vld [vmem:[%s6695_s4 + $0x2d0] sm:$0xff] }
 0x2d3   :  { %6833 = vst [vmem:[#allocation25_spill] sm:$0xff] %v5465_v24  ;;  %3738 = vmatmul.msk.f32.gmra.mxu3 %vm267_vm0, %v1779_v15  ;;  %3760 = vmatmul.msk.f32.gmra.mxu2 %vm267_vm0, %v1775_v49  ;;  %v1782_v9 = vunpack.c.l.bf16 %v3716_v35  ;;  %v1783_v1 = vunpack.c.h.bf16 %v3716_v35 }
 0x2d4   :  { %6835 = vst [vmem:[#allocation20_spill] sm:$0xff] %v5468_v50 }
 0x2d6   :  { %v1667_v43 = vpop.f32.mrf.mxu2  ;;  %v2020_v38 = vpop.f32.mrf.mxu3 }
 0x2d7   :  { %v1668_v4 = vadd.f32 %v1667_v43, %v1578_v61  ;;  %v1581_v53 = vpop.f32.mrf.mxu0  ;;  %v1934_v12 = vpop.f32.mrf.mxu1 }
 0x2d9   :  { %v5476_v27 = vadd.f32 %v1668_v4, %v5131_v36 }
 0x2da   :  { %1981 = vmatmul.f32.gmra.mxu1 %v1780_v52  ;;  %2153 = vmatmul.f32.gmra.mxu0 %v1776_v21  ;;  %v3717_v21 = vld [vmem:[%s6695_s4 + $0x2d8] sm:$0xff] }
 0x2db   :  { %6836 = vst [vmem:[#allocation21_spill] sm:$0xff] %v5476_v27  ;;  %3739 = vmatmul.msk.f32.gmra.mxu3 %vm267_vm0, %v1781_v5  ;;  %3761 = vmatmul.msk.f32.gmra.mxu2 %vm267_vm0, %v1777_v46  ;;  %v2021_v46 = vadd.f32 %v2020_v38, %v1931_v45 }
 0x2de   :  { %v1670_v49 = vpop.f32.mrf.mxu2  ;;  %v2023_v59 = vpop.f32.mrf.mxu3 }
 0x2df   :  { %v1671_v61 = vadd.f32 %v1670_v49, %v1581_v53  ;;  %v1937_v43 = vpop.f32.mrf.mxu1  ;;  %v2109_v24 = vpop.f32.mrf.mxu0  ;;  %v1784_v53 = vunpack.c.l.bf16 %v3717_v21  ;;  %v1785_v49 = vunpack.c.h.bf16 %v3717_v21  ;;  %v2024_v45 = vadd.f32 %v2023_v59, %v1934_v12  ;;  %v6840_v59 = vld [vmem:[#allocation15_spill] sm:$0xff] }
 0x2e1   :  { %v5484_v36 = vadd.f32 %v1671_v61, %v5151_v48 }
 0x2e2   :  { %1984 = vmatmul.f32.gmra.mxu1 %v1782_v9  ;;  %2156 = vmatmul.f32.gmra.mxu0 %v1778_v29  ;;  %v5495_v29 = vadd.f32 %v2021_v46, %v5134_v22  ;;  %v5512_v46 = vadd.f32 %v2024_v45, %v6840_v59 }
 0x2e3   :  { %6837 = vst [vmem:[#allocation23_spill] sm:$0xff] %v5484_v36  ;;  %3740 = vmatmul.msk.f32.gmra.mxu3 %vm267_vm0, %v1783_v1  ;;  %3762 = vmatmul.msk.f32.gmra.mxu2 %vm267_vm0, %v1779_v15 }
 0x2e4   :  { %6839 = vst [vmem:[#allocation26_spill] sm:$0xff] %v5495_v29 }
 0x2e5   :  { %6841 = vst [vmem:[#allocation27_spill] sm:$0xff] %v5512_v46 }
 0x2e6   :  { %v2026_v4 = vpop.f32.mrf.mxu3  ;;  %v2198_v27 = vpop.f32.mrf.mxu2 }
 0x2e7   :  { %v2199_v35 = vadd.f32 %v2198_v27, %v2109_v24  ;;  %v1940_v13 = vpop.f32.mrf.mxu1  ;;  %v2112_v50 = vpop.f32.mrf.mxu0 }
 0x2e9   :  { %v5492_v48 = vadd.f32 %v2199_v35, %v5175_v14  ;;  %v5505_v14 = vld [vmem:[%s6695_s4 + $0x2e0] sm:$0xff] }
 0x2ea   :  { %1987 = vmatmul.f32.gmra.mxu1 %v1784_v53  ;;  %2159 = vmatmul.f32.gmra.mxu0 %v1780_v52  ;;  %v1786_v27 = vunpack.c.l.bf16 %v5505_v14  ;;  %v1787_v61 = vunpack.c.h.bf16 %v5505_v14  ;;  %v5529_v14 = vld [vmem:[%s6695_s4 + $0x2e8] sm:$0xff] }
 0x2eb   :  { %6838 = vst [vmem:[#allocation24_spill] sm:$0xff] %v5492_v48  ;;  %3741 = vmatmul.msk.f32.gmra.mxu3 %vm267_vm0, %v1785_v49  ;;  %3763 = vmatmul.msk.f32.gmra.mxu2 %vm267_vm0, %v1781_v5  ;;  %v2319_v15 = vsel %vm2318_vm1, %v5492_v48, 0.0  ;;  %v2447_v22 = vmul.f32 %v5492_v48, %v5492_v48  ;;  %v2446_v48 = vmul.f32 %v5495_v29, %v5495_v29 }
 0x2ec   :  { %v2320_v24 = vadd.f32 %v2319_v15, %v5495_v29 }
 0x2ed   :  { %v2494_v15 = vsel %vm2318_vm1, %v2447_v22, 0.0 }
 0x2ee   :  { %v2029_v38 = vpop.f32.mrf.mxu3  ;;  %v2201_v52 = vpop.f32.mrf.mxu2  ;;  %2321 = vadd.xlane.f32.xlu0 %v2320_v24  ;;  %v2027_v24 = vadd.f32 %v2026_v4, %v1937_v43  ;;  %v2495_v45 = vadd.f32 %v2494_v15, %v2446_v48  ;;  %v1789_v43 = vunpack.c.h.bf16 %v5529_v14  ;;  %v6843_v15 = vld [vmem:[#allocation22_spill] sm:$0xff] }
 0x2ef   :  { %v2202_v5 = vadd.f32 %v2201_v52, %v2112_v50  ;;  %v1943_v21 = vpop.f32.mrf.mxu1  ;;  %v2115_v12 = vpop.f32.mrf.mxu0 }
 0x2f0   :  { %v5537_v29 = vadd.f32 %v2027_v24, %v6843_v15 }
 0x2f1   :  { %v5515_v35 = vadd.f32 %v2202_v5, %v5204_v62  ;;  %v2448_v62 = vmul.f32 %v5512_v46, %v5512_v46 }
 0x2f2   :  { %1990 = vmatmul.f32.gmra.mxu1 %v1786_v27  ;;  %2162 = vmatmul.f32.gmra.mxu0 %v1782_v9 }
 0x2f3   :  { %6842 = vst [vmem:[#allocation28_spill] sm:$0xff] %v5515_v35  ;;  %3742 = vmatmul.msk.f32.gmra.mxu3 %vm267_vm0, %v1787_v61  ;;  %3764 = vmatmul.msk.f32.gmra.mxu2 %vm267_vm0, %v1783_v1  ;;  %v2449_v50 = vmul.f32 %v5515_v35, %v5515_v35  ;;  %v1788_v1 = vunpack.c.l.bf16 %v5529_v14 }
 0x2f5   :  { %v2498_v22 = vsel %vm2318_vm1, %v2449_v50, 0.0  ;;  %v2323_v50 = vsel %vm2318_vm1, %v5515_v35, 0.0 }
 0x2f6   :  { %v2032_v9 = vpop.f32.mrf.mxu3  ;;  %v2204_v52 = vpop.f32.mrf.mxu2  ;;  %2496 = vadd.xlane.f32.xlu0 %v2495_v45  ;;  %v2499_v5 = vadd.f32 %v2498_v22, %v2448_v62  ;;  %v2030_v45 = vadd.f32 %v2029_v38, %v1940_v13  ;;  %v2324_v62 = vadd.f32 %v2323_v50, %v5512_v46 }
 0x2f7   :  { %v2205_v59 = vadd.f32 %v2204_v52, %v2115_v12  ;;  %v5534_v4 = vpop.f32.mrf.mxu1  ;;  %v2118_v48 = vpop.f32.mrf.mxu0 }
 0x2f8   :  { %2500 = vadd.xlane.f32.xlu1 %v2499_v5  ;;  %v5559_v35 = vadd.f32 %v2030_v45, %v5201_v32 }
 0x2f9   :  { %v5540_v36 = vadd.f32 %v2205_v59, %v5233_v28  ;;  %v2450_v28 = vmul.f32 %v5537_v29, %v5537_v29 }
 0x2fa   :  { %1993 = vmatmul.f32.gmra.mxu1 %v1788_v1  ;;  %2165 = vmatmul.f32.gmra.mxu0 %v1784_v53  ;;  %v3720_v53 = vld [vmem:[%s6695_s4 + $0x2f0] sm:$0xff]  ;;  %v2452_v32 = vmul.f32 %v5559_v35, %v5559_v35 }
 0x2fb   :  { %3743 = vmatmul.msk.f32.gmra.mxu3 %vm267_vm0, %v1789_v43  ;;  %3765 = vmatmul.msk.f32.gmra.mxu2 %vm267_vm0, %v1785_v49  ;;  %v2451_v12 = vmul.f32 %v5540_v36, %v5540_v36  ;;  %v2327_v24 = vsel %vm2318_vm1, %v5540_v36, 0.0  ;;  %v1790_v59 = vunpack.c.l.bf16 %v3720_v53  ;;  %v1791_v13 = vunpack.c.h.bf16 %v3720_v53 }
 0x2fc   :  { %v2328_v5 = vadd.f32 %v2327_v24, %v5537_v29  ;;  %v2033_v24 = vadd.f32 %v2032_v9, %v1943_v21 }
 0x2fd   :  { %v2502_v14 = vsel %vm2318_vm1, %v2451_v12, 0.0 }
 0x2fe   :  { %v2035_v22 = vpop.f32.mrf.mxu3  ;;  %v2207_v49 = vpop.f32.mrf.mxu2  ;;  %2325 = vadd.xlane.f32.xlu0 %v2324_v62  ;;  %v2503_v52 = vadd.f32 %v2502_v14, %v2450_v28  ;;  %v5578_v21 = vadd.f32 %v2033_v24, %v5230_v25 }
 0x2ff   :  { %v2208_v15 = vadd.f32 %v2207_v49, %v2118_v48  ;;  %v1949_v38 = vpop.f32.mrf.mxu1  ;;  %v2121_v50 = vpop.f32.mrf.mxu0 }
 0x300   :  { %2504 = vadd.xlane.f32.xlu2 %v2503_v52  ;;  %2329 = vadd.xlane.f32.xlu1 %v2328_v5  ;;  %6844 = vst [vmem:[#allocation29_spill] sm:$0xff] %v5578_v21 }
 0x301   :  { %v5562_v46 = vadd.f32 %v2208_v15, %v5257_v16  ;;  %v3721_v16 = vld [vmem:[%s6695_s4 + $0x2f8] sm:$0xff] }
 0x302   :  { %1996 = vmatmul.f32.gmra.mxu1 %v1790_v59  ;;  %2168 = vmatmul.f32.gmra.mxu0 %v1786_v27  ;;  %v1792_v53 = vunpack.c.l.bf16 %v3721_v16  ;;  %v1793_v49 = vunpack.c.h.bf16 %v3721_v16 }
 0x303   :  { %3744 = vmatmul.msk.f32.gmra.mxu3 %vm267_vm0, %v1791_v13  ;;  %3766 = vmatmul.msk.f32.gmra.mxu2 %vm267_vm0, %v1787_v61  ;;  %v2331_v48 = vsel %vm2318_vm1, %v5562_v46, 0.0  ;;  %v2453_v12 = vmul.f32 %v5562_v46, %v5562_v46 }
 0x304   :  { %v2332_v61 = vadd.f32 %v2331_v48, %v5559_v35  ;;  %v2454_v48 = vmul.f32 %v5578_v21, %v5578_v21 }
 0x305   :  { %v2506_v27 = vsel %vm2318_vm1, %v2453_v12, 0.0  ;;  %v2036_v12 = vadd.f32 %v2035_v22, %v5534_v4 }
 0x306   :  { %v2038_v45 = vpop.f32.mrf.mxu3  ;;  %v2210_v62 = vpop.f32.mrf.mxu2  ;;  %v2507_v28 = vadd.f32 %v2506_v27, %v2452_v32 }
 0x307   :  { %v2211_v14 = vadd.f32 %v2210_v62, %v2121_v50  ;;  %v1952_v52 = vpop.f32.mrf.mxu1  ;;  %v2124_v5 = vpop.f32.mrf.mxu0 }
 0x308   :  { %2333 = vadd.xlane.f32.xlu1 %v2332_v61  ;;  %2508 = vadd.xlane.f32.xlu0 %v2507_v28  ;;  %v5598_v61 = vadd.f32 %v2036_v12, %v5254_v19 }
 0x309   :  { %v5581_v9 = vadd.f32 %v2211_v14, %v5272_v44  ;;  %v2039_v14 = vadd.f32 %v2038_v45, %v1949_v38 }
 0x30a   :  { %1999 = vmatmul.f32.gmra.mxu1 %v1792_v53  ;;  %2171 = vmatmul.f32.gmra.mxu0 %v1788_v1 }
 0x30b   :  { %6845 = vst [vmem:[#allocation30_spill] sm:$0xff] %v5581_v9  ;;  %3745 = vmatmul.msk.f32.gmra.mxu3 %vm267_vm0, %v1793_v49  ;;  %3767 = vmatmul.msk.f32.gmra.mxu2 %vm267_vm0, %v1789_v43  ;;  %v2335_v15 = vsel %vm2318_vm1, %v5581_v9, 0.0  ;;  %v2455_v50 = vmul.f32 %v5581_v9, %v5581_v9 }
 0x30c   :  { %v2336_v25 = vadd.f32 %v2335_v15, %v5578_v21 }
 0x30d   :  { %v2510_v44 = vsel %vm2318_vm1, %v2455_v50, 0.0  ;;  %v2456_v50 = vmul.f32 %v5598_v61, %v5598_v61 }
 0x30e   :  { %v2041_v1 = vpop.f32.mrf.mxu3  ;;  %v2213_v24 = vpop.f32.mrf.mxu2  ;;  %2337 = vadd.xlane.f32.xlu2 %v2336_v25  ;;  %v2511_v32 = vadd.f32 %v2510_v44, %v2454_v48 }
 0x30f   :  { %v2214_v43 = vadd.f32 %v2213_v24, %v2124_v5  ;;  %v1955_v16 = vpop.f32.mrf.mxu1  ;;  %v2127_v27 = vpop.f32.mrf.mxu0  ;;  %v2042_v44 = vadd.f32 %v2041_v1, %v1952_v52 }
 0x310   :  { %2512 = vadd.xlane.f32.xlu1 %v2511_v32 }
 0x311   :  { %v5595_v62 = vadd.f32 %v2214_v43, %v5286_v34 }
 0x312   :  { %2174 = vmatmul.f32.gmra.mxu0 %v1790_v59  ;;  %2177 = vmatmul.f32.vlgmr.msra.gmra.mxu1 %v1792_v53 }
 0x313   :  { %3768 = vmatmul.msk.f32.gmra.mxu2 %vm267_vm0, %v1791_v13  ;;  %3769 = vmatmul.msk.f32.vlgmr.msra.gmra.mxu3 %vm267_vm0, %v1793_v49  ;;  %v2339_v4 = vsel %vm2318_vm1, %v5595_v62, 0.0  ;;  %v2457_v28 = vmul.f32 %v5595_v62, %v5595_v62  ;;  %v5612_v49 = vadd.f32 %v2039_v14, %v5269_v11 }
 0x314   :  { %v2340_v22 = vadd.f32 %v2339_v4, %v5598_v61  ;;  %v5626_v4 = vadd.f32 %v2042_v44, %v5283_v39 }
 0x315   :  { %v2514_v13 = vsel %vm2318_vm1, %v2457_v28, 0.0  ;;  %6847 = vst [vmem:[#allocation2_spill] sm:$0xff] %v5612_v49 }
 0x316   :  { %v2044_v34 = vpop.f32.mrf.mxu3  ;;  %v2216_v5 = vpop.f32.mrf.mxu2  ;;  %2341 = vadd.xlane.f32.xlu2 %v2340_v22  ;;  %v2515_v45 = vadd.f32 %v2514_v13, %v2456_v50  ;;  %v2458_v22 = vmul.f32 %v5612_v49, %v5612_v49 }
 0x317   :  { %v2217_v19 = vadd.f32 %v2216_v5, %v2127_v27  ;;  %v1958_v15 = vpop.f32.mrf.mxu1  ;;  %v2130_v59 = vpop.f32.mrf.mxu0  ;;  %v2045_v5 = vadd.f32 %v2044_v34, %v1955_v16 }
 0x319   :  { %v5608_v53 = vadd.f32 %v2217_v19, %v5300_v63 }
 0x31b   :  { %6846 = vst [vmem:[#allocation31_spill] sm:$0xff] %v5608_v53  ;;  %v2343_v38 = vsel %vm2318_vm1, %v5608_v53, 0.0  ;;  %v2459_v48 = vmul.f32 %v5608_v53, %v5608_v53 }
 0x31c   :  { %v2344_v25 = vadd.f32 %v2343_v38, %v5612_v49 }
 0x31d   :  { %v2518_v27 = vsel %vm2318_vm1, %v2459_v48, 0.0 }
 0x31e   :  { %v2047_v63 = vpop.f32.mrf.mxu3  ;;  %v2219_v12 = vpop.f32.mrf.mxu2  ;;  %2516 = vadd.xlane.f32.xlu2 %v2515_v45  ;;  %2345 = vadd.xlane.f32.xlu0 %v2344_v25  ;;  %v2519_v28 = vadd.f32 %v2518_v27, %v2458_v22  ;;  %v5640_v45 = vadd.f32 %v2045_v5, %v5297_v26  ;;  %v2460_v25 = vmul.f32 %v5626_v4, %v5626_v4 }
 0x31f   :  { %v2220_v24 = vadd.f32 %v2219_v12, %v2130_v59  ;;  %v1961_v11 = vpop.f32.mrf.mxu1  ;;  %v2133_v32 = vpop.f32.mrf.mxu0  ;;  %v2048_v12 = vadd.f32 %v2047_v63, %v1958_v15 }
 0x321   :  { %v5622_v43 = vadd.f32 %v2220_v24, %v5314_v2 }
 0x323   :  { %v2347_v52 = vsel %vm2318_vm1, %v5622_v43, 0.0  ;;  %v2461_v14 = vmul.f32 %v5622_v43, %v5622_v43 }
 0x324   :  { %v2348_v1 = vadd.f32 %v2347_v52, %v5626_v4  ;;  %v5654_v52 = vadd.f32 %v2048_v12, %v5311_v0 }
 0x325   :  { %v2522_v38 = vsel %vm2318_vm1, %v2461_v14, 0.0 }
 0x326   :  { %v2050_v2 = vpop.f32.mrf.mxu3  ;;  %v2222_v19 = vpop.f32.mrf.mxu2  ;;  %2349 = vadd.xlane.f32.xlu1 %v2348_v1  ;;  %2520 = vadd.xlane.f32.xlu0 %v2519_v28  ;;  %v2523_v48 = vadd.f32 %v2522_v38, %v2460_v25  ;;  %6850 = vst [vmem:[#allocation3_spill] sm:$0xff] %v5654_v52  ;;  %v2462_v28 = vmul.f32 %v5640_v45, %v5640_v45 }
 0x327   :  { %v2223_v59 = vadd.f32 %v2222_v19, %v2133_v32  ;;  %v2136_v39 = vpop.f32.mrf.mxu0  ;;  %v1964_v13 = vpop.f32.mrf.mxu1 }
 0x329   :  { %v5636_v50 = vadd.f32 %v2223_v59, %v5325_v8 }
 0x32b   :  { %6848 = vst [vmem:[#allocation32_spill] sm:$0xff] %v5636_v50  ;;  %v2351_v16 = vsel %vm2318_vm1, %v5636_v50, 0.0  ;;  %v2463_v44 = vmul.f32 %v5636_v50, %v5636_v50 }
 0x32c   :  { %v2352_v34 = vadd.f32 %v2351_v16, %v5640_v45 }
 0x32d   :  { %v2526_v22 = vsel %vm2318_vm1, %v2463_v44, 0.0 }
 0x32e   :  { %v2053_v8 = vpop.f32.mrf.mxu3  ;;  %v2225_v24 = vpop.f32.mrf.mxu2  ;;  %2353 = vadd.xlane.f32.xlu2 %v2352_v34  ;;  %2524 = vadd.xlane.f32.xlu1 %v2523_v48  ;;  %v2527_v63 = vadd.f32 %v2526_v22, %v2462_v28  ;;  %v2464_v34 = vmul.f32 %v5654_v52, %v5654_v52 }
 0x32f   :  { %v2226_v32 = vadd.f32 %v2225_v24, %v2136_v39  ;;  %v2139_v26 = vpop.f32.mrf.mxu0  ;;  %v1967_v1 = vpop.f32.mrf.mxu1 }
 0x331   :  { %v5650_v27 = vadd.f32 %v2226_v32, %v5336_v10  ;;  %v2051_v10 = vadd.f32 %v2050_v2, %v1961_v11 }
 0x333   :  { %6849 = vst [vmem:[#allocation7_spill] sm:$0xff] %v5650_v27  ;;  %v2355_v15 = vsel %vm2318_vm1, %v5650_v27, 0.0  ;;  %v2465_v5 = vmul.f32 %v5650_v27, %v5650_v27  ;;  %v5668_v16 = vadd.f32 %v2051_v10, %v5322_v7 }
 0x334   :  { %v2356_v14 = vadd.f32 %v2355_v15, %v5654_v52 }
 0x335   :  { %v2530_v25 = vsel %vm2318_vm1, %v2465_v5, 0.0 }
 0x336   :  { %v2056_v19 = vpop.f32.mrf.mxu3  ;;  %v2228_v59 = vpop.f32.mrf.mxu2  ;;  %2528 = vadd.xlane.f32.xlu2 %v2527_v63  ;;  %2357 = vadd.xlane.f32.xlu0 %v2356_v14  ;;  %v2531_v44 = vadd.f32 %v2530_v25, %v2464_v34  ;;  %v2466_v63 = vmul.f32 %v5668_v16, %v5668_v16 }
 0x337   :  { %v2229_v0 = vadd.f32 %v2228_v59, %v2139_v26  ;;  %v2142_v39 = vpop.f32.mrf.mxu0  ;;  %v1970_v2 = vpop.f32.mrf.mxu1  ;;  %v2057_v10 = vadd.f32 %v2056_v19, %v1967_v1 }
 0x339   :  { %v5664_v38 = vadd.f32 %v2229_v0, %v5347_v23  ;;  %v2054_v23 = vadd.f32 %v2053_v8, %v1964_v13 }
 0x33b   :  { %v2359_v11 = vsel %vm2318_vm1, %v5664_v38, 0.0  ;;  %v2467_v12 = vmul.f32 %v5664_v38, %v5664_v38  ;;  %v5682_v15 = vadd.f32 %v2054_v23, %v5333_v58 }
 0x33c   :  { %v2360_v48 = vadd.f32 %v2359_v11, %v5668_v16  ;;  %v5696_v11 = vadd.f32 %v2057_v10, %v5344_v56 }
 0x33d   :  { %v2534_v28 = vsel %vm2318_vm1, %v2467_v12, 0.0  ;;  %6852 = vst [vmem:[#allocation10_spill] sm:$0xff] %v5682_v15 }
 0x33e   :  { %v2059_v24 = vpop.f32.mrf.mxu3  ;;  %v2231_v32 = vpop.f32.mrf.mxu2  ;;  %2361 = vadd.xlane.f32.xlu1 %v2360_v48  ;;  %2532 = vadd.xlane.f32.xlu0 %v2531_v44  ;;  %v2535_v14 = vadd.f32 %v2534_v28, %v2466_v63  ;;  %6854 = vst [vmem:[#allocation6_spill] sm:$0xff] %v5696_v11  ;;  %v2468_v48 = vmul.f32 %v5682_v15, %v5682_v15  ;;  %v3849_v44 = vmov 144.0  }
 0x33f   :  { %v2232_v7 = vadd.f32 %v2231_v32, %v2142_v39  ;;  %v2145_v26 = vpop.f32.mrf.mxu0  ;;  %3799 = vrcp.f32 %v3849_v44  ;;  %v2060_v23 = vadd.f32 %v2059_v24, %v1970_v2 }
 0x341   :  { %v5678_v22 = vadd.f32 %v2232_v7, %v5358_v51  ;;  %v1973_v51 = vpop.f32.mrf.mxu1 }
 0x343   :  { %6851 = vst [vmem:[#allocation4_spill] sm:$0xff] %v5678_v22  ;;  %v2363_v13 = vsel %vm2318_vm1, %v5678_v22, 0.0  ;;  %v2469_v5 = vmul.f32 %v5678_v22, %v5678_v22 }
 0x344   :  { %v2364_v8 = vadd.f32 %v2363_v13, %v5682_v15 }
 0x345   :  { %v2538_v34 = vsel %vm2318_vm1, %v2469_v5, 0.0  ;;  %v2470_v5 = vmul.f32 %v5696_v11, %v5696_v11 }
 0x346   :  { %v2234_v59 = vpop.f32.mrf.mxu2  ;;  %2365 = vadd.xlane.f32.xlu2 %v2364_v8  ;;  %2536 = vadd.xlane.f32.xlu1 %v2535_v14  ;;  %v2062_v0 = vpop.f32.mrf.mxu3  ;;  %v2539_v19 = vadd.f32 %v2538_v34, %v2468_v48  ;;  %v5710_v14 = vadd.f32 %v2060_v23, %v5355_v20 }
 0x347   :  { %v2235_v58 = vadd.f32 %v2234_v59, %v2145_v26  ;;  %v2148_v39 = vpop.f32.mrf.mxu0  ;;  %v3800_v26 = vpop.eup %3799 }
 0x348   :  { %6856 = vst [vmem:[#allocation8_spill] sm:$0xff] %v5710_v14  ;;  %v2416_v24 = vmul.f32 144.0, %v3800_v26  ;;  %vm2420_vm2 = vweird.f32 %v3800_v26 }
 0x349   :  { %v5692_v25 = vadd.f32 %v2235_v58, %v5369_v42  ;;  %v1976_v28 = vpop.f32.mrf.mxu1 }
 0x34a   :  { %v2417_v48 = vsub.f32 1.0, %v2416_v24 }
 0x34b   :  { %6853 = vst [vmem:[#allocation5_spill] sm:$0xff] %v5692_v25  ;;  %v2367_v1 = vsel %vm2318_vm1, %v5692_v25, 0.0  ;;  %v2471_v42 = vmul.f32 %v5692_v25, %v5692_v25 }
 0x34c   :  { %v2368_v12 = vadd.f32 %v2367_v1, %v5696_v11 }
 0x34d   :  { %v2542_v8 = vsel %vm2318_vm1, %v2471_v42, 0.0 }
 0x34e   :  { %v2237_v32 = vpop.f32.mrf.mxu2  ;;  %2540 = vadd.xlane.f32.xlu2 %v2539_v19  ;;  %2369 = vadd.xlane.f32.xlu0 %v2368_v12  ;;  %v2065_v63 = vpop.f32.mrf.mxu3  ;;  %v2543_v59 = vadd.f32 %v2542_v8, %v2470_v5  ;;  %v2472_v12 = vmul.f32 %v5710_v14, %v5710_v14 }
 0x34f   :  { %v2238_v56 = vadd.f32 %v2237_v32, %v2148_v39  ;;  %v2151_v7 = vpop.f32.mrf.mxu0 }
 0x351   :  { %v5706_v13 = vadd.f32 %v2238_v56, %v5380_v3  ;;  %v2063_v3 = vadd.f32 %v2062_v0, %v1973_v51  ;;  %v1979_v42 = vpop.f32.mrf.mxu1  ;;  %v2418_v0 = vmul.f32 %v3800_v26, %v2417_v48 }
 0x353   :  { %6855 = vst [vmem:[#allocation13_spill] sm:$0xff] %v5706_v13  ;;  %v2371_v2 = vsel %vm2318_vm1, %v5706_v13, 0.0  ;;  %v2473_v58 = vmul.f32 %v5706_v13, %v5706_v13  ;;  %v5724_v19 = vadd.f32 %v2063_v3, %v5366_v40  ;;  %v2419_v5 = vadd.f32 %v3800_v26, %v2418_v0 }
 0x354   :  { %v2372_v10 = vadd.f32 %v2371_v2, %v5710_v14 }
 0x355   :  { %v2546_v1 = vsel %vm2318_vm1, %v2473_v58, 0.0  ;;  %6858 = vst [vmem:[#allocation16_spill] sm:$0xff] %v5724_v19  ;;  %v2474_v3 = vmul.f32 %v5724_v19, %v5724_v19 }
 0x356   :  { %v2240_v39 = vpop.f32.mrf.mxu2  ;;  %2373 = vadd.xlane.f32.xlu1 %v2372_v10  ;;  %2544 = vadd.xlane.f32.xlu0 %v2543_v59  ;;  %v2068_v23 = vpop.f32.mrf.mxu3  ;;  %v2547_v56 = vadd.f32 %v2546_v1, %v2472_v12 }
 0x357   :  { %v2241_v34 = vadd.f32 %v2240_v39, %v2151_v7  ;;  %v2154_v20 = vpop.f32.mrf.mxu0  ;;  %v2066_v7 = vadd.f32 %v2065_v63, %v1976_v28  ;;  %v5742_v28 = vsel %vm2420_vm2, %v3800_v26, %v2419_v5  ;;  %v2069_v1 = vadd.f32 %v2068_v23, %v1979_v42 }
 0x359   :  { %v5720_v44 = vadd.f32 %v2241_v34, %v5391_v33  ;;  %v5738_v58 = vadd.f32 %v2066_v7, %v5377_v55 }
 0x35b   :  { %6857 = vst [vmem:[#allocation9_spill] sm:$0xff] %v5720_v44  ;;  %v2375_v51 = vsel %vm2318_vm1, %v5720_v44, 0.0  ;;  %v2475_v33 = vmul.f32 %v5720_v44, %v5720_v44  ;;  %v2476_v7 = vmul.f32 %v5738_v58, %v5738_v58 }
 0x35c   :  { %v2376_v32 = vadd.f32 %v2375_v51, %v5724_v19  ;;  %6860 = vst [vmem:[#allocation12_spill] sm:$0xff] %v5738_v58 }
 0x35d   :  { %v2550_v59 = vsel %vm2318_vm1, %v2475_v33, 0.0  ;;  %v5757_v33 = vadd.f32 %v2069_v1, %v5388_v60 }
 0x35e   :  { %v2243_v8 = vpop.f32.mrf.mxu2  ;;  %2377 = vadd.xlane.f32.xlu2 %v2376_v32  ;;  %2548 = vadd.xlane.f32.xlu1 %v2547_v56  ;;  %v2551_v39 = vadd.f32 %v2550_v59, %v2474_v3 }
 0x35f   :  { %v2244_v40 = vadd.f32 %v2243_v8, %v2154_v20  ;;  %v2157_v2 = vpop.f32.mrf.mxu0  ;;  %v1982_v20 = vpop.f32.mrf.mxu1  ;;  %6862 = vst [vmem:[#allocation14_spill] sm:$0xff] %v5757_v33 }
 0x361   :  { %v5734_v24 = vadd.f32 %v2244_v40, %v5402_v41  ;;  %v2322_v10 = vpop.xlane.xlu0 %2321  ;;  %v2071_v41 = vpop.f32.mrf.mxu3 }
 0x362   :  { %v5750_v55 = vmul.f32 %v5742_v28, %v2322_v10  ;;  %v2072_v10 = vadd.f32 %v2071_v41, %v1982_v20 }
 0x363   :  { %6859 = vst [vmem:[#allocation11_spill] sm:$0xff] %v5734_v24  ;;  %v2379_v63 = vsel %vm2318_vm1, %v5734_v24, 0.0  ;;  %v2477_v48 = vmul.f32 %v5734_v24, %v5734_v24 }
 0x364   :  { %v2380_v34 = vadd.f32 %v2379_v63, %v5738_v58  ;;  %v2614_v42 = vmul.f32 %v5750_v55, %v5750_v55  ;;  %v5774_v20 = vadd.f32 %v2072_v10, %v5399_v54 }
 0x365   :  { %v2554_v56 = vsel %vm2318_vm1, %v2477_v48, 0.0  ;;  %v3850_v48 = vmov 0  }
 0x366   :  { %v2246_v12 = vpop.f32.mrf.mxu2  ;;  %2552 = vadd.xlane.f32.xlu2 %v2551_v39  ;;  %2381 = vadd.xlane.f32.xlu0 %v2380_v34  ;;  %6864 = vst [vmem:[#allocation22_spill] sm:$0xff] %v5774_v20 }
 0x367   :  { %v2247_v26 = vadd.f32 %v2246_v12, %v2157_v2  ;;  %v2160_v51 = vpop.f32.mrf.mxu0  ;;  %v2555_v2 = vadd.f32 %v2554_v56, %v2476_v7  ;;  %v1985_v63 = vpop.f32.mrf.mxu1  ;;  %3797 = vset.pattern.permute.xlu1 %v3850_v48  ;;  %3796 = vset.pattern.permute.xlu0 %v3850_v48 }
 0x368   :  { %3798 = vset.pattern.permute.xlu2 %v3850_v48 }
 0x369   :  { %v5753_v0 = vadd.f32 %v2247_v26, %v5413_v18  ;;  %v2497_v32 = vpop.xlane.xlu0 %2496  ;;  %v2074_v39 = vpop.f32.mrf.mxu3 }
 0x36a   :  { %v2590_v23 = vmul.f32 %v2497_v32, %v5742_v28 }
 0x36b   :  { %6861 = vst [vmem:[#allocation19_spill] sm:$0xff] %v5753_v0  ;;  %v2501_v8 = vpop.xlane.xlu1 %2500  ;;  %v2383_v40 = vsel %vm2318_vm1, %v5753_v0, 0.0  ;;  %v2479_v60 = vmul.f32 %v5753_v0, %v5753_v0 }
 0x36c   :  { %v2638_v18 = vsub.f32 %v2590_v23, %v2614_v42  ;;  %v2384_v5 = vadd.f32 %v2383_v40, %v5757_v33  ;;  %v2591_v23 = vmul.f32 %v2501_v8, %v5742_v28 }
 0x36d   :  { %v2558_v56 = vsel %vm2318_vm1, %v2479_v60, 0.0  ;;  %v2075_v60 = vadd.f32 %v2074_v39, %v1985_v63  ;;  %v2480_v63 = vmul.f32 %v5774_v20, %v5774_v20 }
 0x36e   :  { %v2662_v59 = vmax.f32 %v2638_v18, 0.0  ;;  %v2249_v3 = vpop.f32.mrf.mxu2  ;;  %2385 = vadd.xlane.f32.xlu1 %v2384_v5  ;;  %2556 = vadd.xlane.f32.xlu0 %v2555_v2 }
 0x36f   :  { %v2250_v34 = vadd.f32 %v2249_v3, %v2160_v51  ;;  %v2163_v12 = vpop.f32.mrf.mxu0  ;;  %v2478_v51 = vmul.f32 %v5757_v33, %v5757_v33  ;;  %v5792_v48 = vpop.f32.mrf.mxu1  ;;  %v5807_v39 = vadd.f32 %v2075_v60, %v5410_v17 }
 0x370   :  { %v2686_v1 = vadd.f32 0.001, %v2662_v59 }
 0x371   :  { %v5770_v26 = vadd.f32 %v2250_v34, %v5424_v30  ;;  %v2326_v32 = vpop.xlane.xlu0 %2325  ;;  %v2559_v40 = vadd.f32 %v2558_v56, %v2478_v51  ;;  %6866 = vst [vmem:[#allocation34_spill] sm:$0xff] %v5807_v39 }
 0x372   :  { %3801 = vrsqrt.f32 %v2686_v1  ;;  %v5777_v41 = vmul.f32 %v5742_v28, %v2326_v32  ;;  %v5794_v32 = vpop.f32.mrf.mxu3  ;;  %vm2716_vm4 = vweird.f32 %v2686_v1 }
 0x373   :  { %6863 = vst [vmem:[#allocation15_spill] sm:$0xff] %v5770_v26  ;;  %v2387_v42 = vsel %vm2318_vm1, %v5770_v26, 0.0  ;;  %v2330_v54 = vpop.xlane.xlu1 %2329  ;;  %v2481_v18 = vmul.f32 %v5770_v26, %v5770_v26 }
 0x374   :  { %v2615_v30 = vmul.f32 %v5777_v41, %v5777_v41  ;;  %v2388_v7 = vadd.f32 %v2387_v42, %v5774_v20  ;;  %v5790_v8 = vmul.f32 %v5742_v28, %v2330_v54 }
 0x375   :  { %v2562_v51 = vsel %vm2318_vm1, %v2481_v18, 0.0 }
 0x376   :  { %v2639_v5 = vsub.f32 %v2591_v23, %v2615_v30  ;;  %v2252_v2 = vpop.f32.mrf.mxu2  ;;  %2389 = vadd.xlane.f32.xlu2 %v2388_v7  ;;  %2560 = vadd.xlane.f32.xlu1 %v2559_v40  ;;  %v2505_v30 = vpop.xlane.xlu2 %2504  ;;  %v2563_v40 = vadd.f32 %v2562_v51, %v2480_v63  ;;  %v2950_v63 = vld [vmem:[%s6699_s5] sm:$0xff] }
 0x377   :  { %v2253_v10 = vadd.f32 %v2252_v2, %v2163_v12  ;;  %v5802_v23 = vpop.f32.mrf.mxu0 }
 0x378   :  { %v3802_v59 = vpop.eup %3801  ;;  %v2663_v3 = vmax.f32 %v2639_v5, 0.0  ;;  %v2592_v5 = vmul.f32 %v2505_v30, %v5742_v28  ;;  %v1991_v30 = vpop.f32.mrf.mxu1 }
 0x379   :  { %v2711_v34 = vmul.f32 %v3802_v59, %v2686_v1  ;;  %v5797_v56 = vadd.f32 %v2253_v10, %v5435_v31  ;;  %v2616_v31 = vmul.f32 %v5790_v8, %v5790_v8  ;;  %vm2717_vm3 = vweird.f32 %v3802_v59 }
 0x37a   :  { %v5800_v42 = vadd.f32 0.001, %v2663_v3  ;;  %vm2718_vm5 = vmor %vm2716_vm4, %vm2717_vm3 }
 0x37b   :  { %6865 = vst [vmem:[#allocation33_spill] sm:$0xff] %v5797_v56  ;;  %v2712_v12 = vmul.f32 %v3802_v59, %v2711_v34  ;;  %v2391_v7 = vsel %vm2318_vm1, %v5797_v56, 0.0  ;;  %v2483_v17 = vmul.f32 %v5797_v56, %v5797_v56  ;;  %v2640_v10 = vsub.f32 %v2592_v5, %v2616_v31  ;;  %v2334_v5 = vpop.xlane.xlu1 %2333  ;;  %v2509_v27 = vpop.xlane.xlu0 %2508 }
 0x37c   :  { %3803 = vrsqrt.f32 %v5800_v42  ;;  %v2392_v18 = vadd.f32 %v2391_v7, %v5807_v39  ;;  %v2080_v7 = vpop.f32.mrf.mxu3  ;;  %v5828_v11 = vmul.f32 %v5742_v28, %v2334_v5  ;;  %vm2726_vm7 = vweird.f32 %v5800_v42 }
 0x37d   :  { %v2713_v54 = vmul.f32 0.5, %v2712_v12  ;;  %v2566_v51 = vsel %vm2318_vm1, %v2483_v17, 0.0  ;;  %v2081_v24 = vadd.f32 %v2080_v7, %v1991_v30 }
 0x37e   :  { %v5816_v2 = vpop.f32.mrf.mxu2  ;;  %2564 = vadd.xlane.f32.xlu2 %v2563_v40  ;;  %2393 = vadd.xlane.f32.xlu0 %v2392_v18  ;;  %v2482_v40 = vmul.f32 %v5807_v39, %v5807_v39  ;;  %v2664_v18 = vmax.f32 %v2640_v10, 0.0 }
 0x37f   :  { %v2714_v60 = vsub.f32 1.5, %v2713_v54  ;;  %v2169_v31 = vpop.f32.mrf.mxu0 }
 0x380   :  { %v2567_v1 = vadd.f32 %v2566_v51, %v2482_v40  ;;  %v2688_v25 = vadd.f32 0.001, %v2664_v18  ;;  %v2998_v51 = vld [vmem:[%s6700_s6] sm:$0xff] }
 0x381   :  { %v2715_v3 = vmul.f32 %v3802_v59, %v2714_v60 }
 0x382   :  { %v3804_v34 = vpop.eup %3803  ;;  %3805 = vrsqrt.f32 %v2688_v25  ;;  %vm2736_vm10 = vweird.f32 %v2688_v25 }
 0x383   :  { %v2721_v12 = vmul.f32 %v3804_v34, %v5800_v42  ;;  %v2719_v54 = vsel %vm2718_vm5, %v3802_v59, %v2715_v3  ;;  %v5835_v3 = vadd.f32 %v2081_v24, %v5432_v47  ;;  %v2593_v47 = vmul.f32 %v2509_v27, %v5742_v28  ;;  %v2951_v27 = vld [vmem:[%s6699_s5 + $0x8] sm:$0xff] }
 0x384   :  { %v2974_v60 = vmul.f32 %v2950_v63, %v2719_v54  ;;  %vm2727_vm6 = vweird.f32 %v3804_v34 }
 0x385   :  { %v2722_v56 = vmul.f32 %v3804_v34, %v2721_v12  ;;  %6868 = vst [vmem:[#allocation36_spill] sm:$0xff] %v5835_v3  ;;  %v2617_v12 = vmul.f32 %v5828_v11, %v5828_v11  ;;  %v2486_v18 = vmul.f32 %v5835_v3, %v5835_v3  ;;  %vm2728_vm8 = vmor %vm2726_vm7, %vm2727_vm6 }
 0x386   :  { %v2258_v17 = vpop.f32.mrf.mxu2  ;;  %2568 = vadd.xlane.f32.xlu0 %v2567_v1  ;;  %v3022_v59 = vmul.f32 %v2974_v60, %v5750_v55 }
 0x387   :  { %v2259_v58 = vadd.f32 %v2258_v17, %v2169_v31  ;;  %v2723_v10 = vmul.f32 0.5, %v2722_v56  ;;  %v2641_v24 = vsub.f32 %v2593_v47, %v2617_v12 }
 0x388   :  { %v3806_v40 = vpop.eup %3805 }
 0x389   :  { %v5831_v52 = vadd.f32 %v2259_v58, %v5457_v57  ;;  %v3046_v58 = vsub.f32 %v2998_v51, %v3022_v59  ;;  %v2724_v56 = vsub.f32 1.5, %v2723_v10  ;;  %v2665_v31 = vmax.f32 %v2641_v24, 0.0  ;;  %v2999_v24 = vld [vmem:[%s6700_s6 + $0x8] sm:$0xff] }
 0x38a   :  { %v2731_v1 = vmul.f32 %v3806_v40, %v2688_v25  ;;  %vm2737_vm9 = vweird.f32 %v3806_v40  ;;  %v2256_v25 = vadd.f32 %v5816_v2, %v5802_v23  ;;  %v2078_v23 = vadd.f32 %v5794_v32, %v5792_v48 }
 0x38b   :  { %6867 = vst [vmem:[#allocation35_spill] sm:$0xff] %v5831_v52  ;;  %v2399_v63 = vsel %vm2318_vm1, %v5831_v52, 0.0  ;;  %v2487_v55 = vmul.f32 %v5831_v52, %v5831_v52  ;;  %v2725_v54 = vmul.f32 %v3804_v34, %v2724_v56  ;;  %v5858_v10 = vadd.f32 0.001, %v2665_v31  ;;  %v2338_v56 = vpop.xlane.xlu2 %2337  ;;  %vm2738_vm11 = vmor %vm2736_vm10, %vm2737_vm9 }
 0x38c   :  { %v2400_v57 = vadd.f32 %v2399_v63, %v5835_v3  ;;  %v2732_v63 = vmul.f32 %v3806_v40, %v2731_v1 }
 0x38d   :  { %v2574_v7 = vsel %vm2318_vm1, %v2487_v55, 0.0  ;;  %v2729_v17 = vsel %vm2728_vm8, %v3804_v34, %v2725_v54  ;;  %3807 = vrsqrt.f32 %v5858_v10  ;;  %vm2746_vm0 = vweird.f32 %v5858_v10 }
 0x38e   :  { %2401 = vadd.xlane.f32.xlu2 %v2400_v57  ;;  %v2575_v5 = vadd.f32 %v2574_v7, %v2486_v18  ;;  %v5860_v51 = vmul.f32 %v2951_v27, %v2729_v17  ;;  %v2733_v55 = vmul.f32 0.5, %v2732_v63  ;;  %v2952_v27 = vld [vmem:[%s6699_s5 + $0x10] sm:$0xff] }
 0x38f   :  { %3240 = vperm.xlu1 %3797, %v3046_v58  }
 0x390   :  { %v3023_v34 = vmul.f32 %v5860_v51, %v5777_v41  ;;  %v2734_v7 = vsub.f32 1.5, %v2733_v55 }
 0x391   :  { %v2346_v30 = vpop.xlane.xlu0 %2345 }
 0x392   :  { %v5856_v59 = vmul.f32 %v5742_v28, %v2346_v30  ;;  %v3047_v54 = vsub.f32 %v2999_v24, %v3023_v34  ;;  %v2735_v31 = vmul.f32 %v3806_v40, %v2734_v7 }
 0x393   :  { %v5871_v18 = vpop.eup %3807 }
 0x394   :  { %v2620_v42 = vmul.f32 %v5856_v59, %v5856_v59  ;;  %v2741_v41 = vmul.f32 %v5871_v18, %v5858_v10  ;;  %v2739_v17 = vsel %vm2738_vm11, %v3806_v40, %v2735_v31  ;;  %vm2747_vm15 = vweird.f32 %v5871_v18 }
 0x395   :  { %v2976_v34 = vmul.f32 %v2952_v27, %v2739_v17  ;;  %vm2748_vm2 = vmor %vm2746_vm0, %vm2747_vm15 }
 0x396   :  { %2576 = vadd.xlane.f32.xlu2 %v2575_v5  ;;  %v5875_v5 = vpop.xlane.xlu2 %2341  ;;  %v2742_v63 = vmul.f32 %v5871_v18, %v2741_v41  ;;  %v5894_v41 = vadd.f32 %v2256_v25, %v5446_v37  ;;  %v5914_v25 = vadd.f32 %v2078_v23, %v5421_v6  ;;  %v2083_v23 = vpop.f32.mrf.mxu3 }
 0x398   :  { %6869 = vst [vmem:[#allocation37_spill] sm:$0xff] %v5894_v41  ;;  %v2485_v6 = vmul.f32 %v5894_v41, %v5894_v41 }
 0x399   :  { %v2521_v12 = vpop.xlane.xlu0 %2520  ;;  %6870 = vst [vmem:[#allocation38_spill] sm:$0xff] %v5914_v25 }
 0x39a   :  { %v2596_v57 = vmul.f32 %v2521_v12, %v5742_v28  ;;  %3072 = vperm.xlu0 %3796, %v2974_v60   ;;  %v2513_v60 = vpop.xlane.xlu1 %2512 }
 0x39b   :  { %v2594_v40 = vmul.f32 %v2513_v60, %v5742_v28  ;;  %v3000_v60 = vld [vmem:[%s6700_s6 + $0x10] sm:$0xff] }
 0x39c   :  { %v2644_v58 = vsub.f32 %v2596_v57, %v2620_v42  ;;  %v5882_v57 = vmul.f32 %v5742_v28, %v2338_v56  ;;  %v3024_v56 = vmul.f32 %v2976_v34, %v5790_v8  ;;  %v2956_v8 = vld [vmem:[%s6699_s5 + $0x30] sm:$0xff] }
 0x39e   :  { %v2668_v47 = vmax.f32 %v2644_v58, 0.0  ;;  %v2618_v7 = vmul.f32 %v5882_v57, %v5882_v57  ;;  %v5898_v27 = vpop.xlane.xlu2 %2516 }
 0x3a0   :  { %v2692_v30 = vadd.f32 0.001, %v2668_v47  ;;  %v2743_v47 = vmul.f32 0.5, %v2742_v63 }
 0x3a2   :  { %3809 = vrsqrt.f32 %v2692_v30  ;;  %3245 = vperm.xlu0 %3796, %v3047_v54   ;;  %v2350_v55 = vpop.xlane.xlu1 %2349  ;;  %v2744_v2 = vsub.f32 1.5, %v2743_v47  ;;  %vm2776_vm13 = vweird.f32 %v2692_v30 }
 0x3a3   :  { %v5935_v10 = vmul.f32 %v5742_v28, %v2350_v55 }
 0x3a4   :  { %v2745_v47 = vmul.f32 %v5871_v18, %v2744_v2 }
 0x3a5   :  { %v2621_v55 = vmul.f32 %v5935_v10, %v5935_v10 }
 0x3a6   :  { %v5926_v2 = vpop.xlane.xlu2 %2353 }
 0x3a8   :  { %v3810_v1 = vpop.eup %3809 }
 0x3a9   :  { %v2771_v12 = vmul.f32 %v3810_v1, %v2692_v30  ;;  %v2358_v42 = vpop.xlane.xlu0 %2357  ;;  %vm2777_vm12 = vweird.f32 %v3810_v1  ;;  %v3048_v30 = vsub.f32 %v3000_v60, %v3024_v56  ;;  %v1994_v56 = vpop.f32.mrf.mxu1  ;;  %v2749_v60 = vsel %vm2748_vm2, %v5871_v18, %v2745_v47 }
 0x3aa   :  { %v5890_v54 = vmul.f32 %v5742_v28, %v2358_v42  ;;  %vm2778_vm14 = vmor %vm2776_vm13, %vm2777_vm12  ;;  %v2484_v18 = vmul.f32 %v5914_v25, %v5914_v25  ;;  %v2084_v52 = vadd.f32 %v2083_v23, %v1994_v56 }
 0x3ab   :  { %v2772_v58 = vmul.f32 %v3810_v1, %v2771_v12  ;;  %v2642_v12 = vsub.f32 %v2594_v40, %v2618_v7  ;;  %v2525_v7 = vpop.xlane.xlu1 %2524 }
 0x3ac   :  { %v2623_v37 = vmul.f32 %v5890_v54, %v5890_v54 }
 0x3ad   :  { %v2773_v24 = vmul.f32 0.5, %v2772_v58  ;;  %v2395_v58 = vsel %vm2318_vm1, %v5894_v41, 0.0  ;;  %v6871_v41 = vld [vmem:[#allocation20_spill] sm:$0xff] }
 0x3ae   :  { %3082 = vperm.xlu2 %3798, %v2976_v34  }
 0x3af   :  { %v2774_v31 = vsub.f32 1.5, %v2773_v24  ;;  %v2666_v24 = vmax.f32 %v2642_v12, 0.0  ;;  %v2570_v12 = vsel %vm2318_vm1, %v2485_v6, 0.0 }
 0x3b1   :  { %v2533_v17 = vpop.xlane.xlu0 %2532  ;;  %v2775_v63 = vmul.f32 %v3810_v1, %v2774_v31  ;;  %v2396_v31 = vadd.f32 %v2395_v58, %v5914_v25  ;;  %v5947_v6 = vpop.f32.mrf.mxu1 }
 0x3b2   :  { %v2599_v48 = vmul.f32 %v2533_v17, %v5742_v28 }
 0x3b3   :  { %v2779_v32 = vsel %vm2778_vm14, %v3810_v1, %v2775_v63  ;;  %v5932_v63 = vadd.f32 0.001, %v2666_v24 }
 0x3b4   :  { %v2647_v42 = vsub.f32 %v2599_v48, %v2623_v37  ;;  %v5911_v34 = vmul.f32 %v2956_v8, %v2779_v32  ;;  %v2172_v37 = vpop.f32.mrf.mxu0  ;;  %v2261_v48 = vpop.f32.mrf.mxu2  ;;  %v2597_v32 = vmul.f32 %v2525_v7, %v5742_v28 }
 0x3b5   :  { %v2262_v47 = vadd.f32 %v2261_v48, %v2172_v37  ;;  %v5949_v7 = vpop.f32.mrf.mxu3  ;;  %vm2756_vm7 = vweird.f32 %v5932_v63 }
 0x3b6   :  { %v2671_v40 = vmax.f32 %v2647_v42, 0.0  ;;  %3250 = vperm.xlu2 %3798, %v3048_v30   ;;  %v5920_v1 = vmul.f32 %v5911_v34, %v5856_v59  ;;  %v2953_v59 = vld [vmem:[%s6699_s5 + $0x18] sm:$0xff]  ;;  %v2362_v42 = vpop.xlane.xlu1 %2361  ;;  %v2571_v30 = vadd.f32 %v2570_v12, %v2484_v18  ;;  %v2645_v24 = vsub.f32 %v2597_v32, %v2621_v55 }
 0x3b7   :  { %v5937_v8 = vmul.f32 %v2953_v59, %v2749_v60  ;;  %v5951_v60 = vpop.xlane.xlu2 %2528  ;;  %v5956_v25 = vadd.f32 %v2262_v47, %v6871_v41  ;;  %v2959_v47 = vld [vmem:[%s6699_s5 + $0x48] sm:$0xff] }
 0x3b8   :  { %v2695_v17 = vadd.f32 0.001, %v2671_v40  ;;  %v2669_v12 = vmax.f32 %v2645_v24, 0.0 }
 0x3b9   :  { %2397 = vadd.xlane.f32.xlu1 %v2396_v31  ;;  %6872 = vst [vmem:[#allocation20_spill] sm:$0xff] %v5956_v25  ;;  %v2000_v26 = vpop.f32.mrf.mxu1 }
 0x3ba   :  { %3811 = vrsqrt.f32 %v2695_v17  ;;  %v5968_v41 = vadd.f32 0.001, %v2669_v12  ;;  %vm2806_vm4 = vweird.f32 %v2695_v17 }
 0x3bb   :  { %3813 = vrsqrt.f32 %v5932_v63 }
 0x3bc   :  { %3815 = vrsqrt.f32 %v5968_v41  ;;  %vm2786_vm13 = vweird.f32 %v5968_v41 }
 0x3bd   :  { %v2089_v20 = vpop.f32.mrf.mxu3 }
 0x3be   :  { %3087 = vperm.xlu2 %3798, %v5937_v8   ;;  %v2537_v55 = vpop.xlane.xlu1 %2536 }
 0x3c0   :  { %v3812_v58 = vpop.eup %3811 }
 0x3c1   :  { %v2801_v40 = vmul.f32 %v3812_v58, %v2695_v17  ;;  %2572 = vadd.xlane.f32.xlu1 %v2571_v30  ;;  %v2370_v31 = vpop.xlane.xlu0 %2369  ;;  %v5953_v39 = vpop.eup %3813  ;;  %vm2807_vm3 = vweird.f32 %v3812_v58  ;;  %v2403_v30 = vsel %vm2318_vm1, %v5956_v25, 0.0 }
 0x3c2   :  { %v5959_v37 = vmul.f32 %v5742_v28, %v2370_v31  ;;  %v2751_v48 = vmul.f32 %v5953_v39, %v5932_v63  ;;  %vm2808_vm5 = vmor %vm2806_vm4, %vm2807_vm3  ;;  %vm2757_vm6 = vweird.f32 %v5953_v39 }
 0x3c3   :  { %v2802_v59 = vmul.f32 %v3812_v58, %v2801_v40  ;;  %v6873_v40 = vld [vmem:[#allocation17_spill] sm:$0xff]  ;;  %vm6019_vm8 = vmor %vm2756_vm7, %vm2757_vm6 }
 0x3c4   :  { %v5966_v3 = vadd.f32 %v2084_v52, %v6873_v40  ;;  %v2626_v24 = vmul.f32 %v5959_v37, %v5959_v37 }
 0x3c5   :  { %v2803_v18 = vmul.f32 0.5, %v2802_v59  ;;  %v2752_v59 = vmul.f32 %v5953_v39, %v2751_v48 }
 0x3c6   :  { %6874 = vst [vmem:[#allocation17_spill] sm:$0xff] %v5966_v3  ;;  %v2404_v52 = vadd.f32 %v2403_v30, %v5966_v3  ;;  %v2600_v30 = vmul.f32 %v2537_v55, %v5742_v28 }
 0x3c7   :  { %v2804_v32 = vsub.f32 1.5, %v2803_v18  ;;  %v5977_v18 = vpop.xlane.xlu2 %2365 }
 0x3c9   :  { %v2545_v56 = vpop.xlane.xlu0 %2544  ;;  %v2805_v23 = vmul.f32 %v3812_v58, %v2804_v32  ;;  %v2489_v32 = vmul.f32 %v5956_v25, %v5956_v25 }
 0x3ca   :  { %v2602_v31 = vmul.f32 %v2545_v56, %v5742_v28  ;;  %v5986_v56 = vmul.f32 %v5742_v28, %v2362_v42  ;;  %v2488_v42 = vmul.f32 %v5966_v3, %v5966_v3  ;;  %v2267_v3 = vpop.f32.mrf.mxu3 }
 0x3cb   :  { %v2809_v12 = vsel %vm2808_vm5, %v3812_v58, %v2805_v23  ;;  %v2753_v58 = vmul.f32 0.5, %v2752_v59  ;;  %v2374_v23 = vpop.xlane.xlu1 %2373  ;;  %v6005_v59 = vmul.f32 %v5742_v28, %v5875_v5  ;;  %v2178_v5 = vpop.f32.mrf.mxu1 }
 0x3cc   :  { %v2650_v17 = vsub.f32 %v2602_v31, %v2626_v24  ;;  %v5982_v40 = vmul.f32 %v2959_v47, %v2809_v12  ;;  %2405 = vadd.xlane.f32.xlu0 %v2404_v52  ;;  %v2578_v47 = vsel %vm2318_vm1, %v2489_v32, 0.0  ;;  %v2624_v31 = vmul.f32 %v5986_v56, %v5986_v56  ;;  %v6001_v52 = vpop.eup %3815 }
 0x3cd   :  { %v2579_v12 = vadd.f32 %v2578_v47, %v2488_v42  ;;  %vm2787_vm12 = vweird.f32 %v6001_v52 }
 0x3ce   :  { %v2674_v48 = vmax.f32 %v2650_v17, 0.0  ;;  %v5990_v53 = vmul.f32 %v5982_v40, %v5890_v54  ;;  %v2754_v54 = vsub.f32 1.5, %v2753_v58  ;;  %v2648_v55 = vsub.f32 %v2600_v30, %v2624_v31  ;;  %vm2788_vm14 = vmor %vm2786_vm13, %vm2787_vm12 }
 0x3cf   :  { %v2595_v17 = vmul.f32 %v5898_v27, %v5742_v28  ;;  %v6009_v32 = vpop.xlane.xlu2 %2540  ;;  %v2619_v58 = vmul.f32 %v6005_v59, %v6005_v59 }
 0x3d0   :  { %v5993_v24 = vadd.f32 0.001, %v2674_v48  ;;  %v2781_v48 = vmul.f32 %v6001_v52, %v5968_v41  ;;  %v2755_v25 = vmul.f32 %v5953_v39, %v2754_v54  ;;  %v2672_v30 = vmax.f32 %v2648_v55, 0.0 }
 0x3d1   :  { %v2643_v27 = vsub.f32 %v2595_v17, %v2619_v58  ;;  %v2268_v54 = vadd.f32 %v2267_v3, %v2178_v5  ;;  %v2954_v17 = vld [vmem:[%s6699_s5 + $0x20] sm:$0xff]  ;;  %v2090_v58 = vadd.f32 %v2089_v20, %v2000_v26  ;;  %v3025_v3 = vmul.f32 %v5937_v8, %v5828_v11 }
 0x3d2   :  { %3817 = vrsqrt.f32 %v5993_v24  ;;  %v2782_v49 = vmul.f32 %v6001_v52, %v2781_v48  ;;  %v6025_v19 = vadd.f32 0.001, %v2672_v30  ;;  %v2759_v63 = vsel %vm6019_vm8, %v5953_v39, %v2755_v25  ;;  %v6877_v39 = vld [vmem:[#allocation23_spill] sm:$0xff] }
 0x3d3   :  { %v2549_v44 = vpop.xlane.xlu1 %2548  ;;  %v2667_v5 = vmax.f32 %v2643_v27, 0.0  ;;  %v6036_v48 = vmul.f32 %v5742_v28, %v2374_v23  ;;  %v6044_v25 = vadd.f32 %v2268_v54, %v6877_v39  ;;  %v6049_v20 = vmul.f32 %v2954_v17, %v2759_v63  ;;  %v6879_v23 = vld [vmem:[#allocation25_spill] sm:$0xff]  ;;  %v2962_v63 = vld [vmem:[%s6699_s5 + $0x60] sm:$0xff] }
 0x3d4   :  { %2580 = vadd.xlane.f32.xlu0 %v2579_v12  ;;  %v2783_v12 = vmul.f32 0.5, %v2782_v49  ;;  %3819 = vrsqrt.f32 %v6025_v19  ;;  %v2603_v8 = vmul.f32 %v2549_v44, %v5742_v28  ;;  %v6054_v27 = vadd.f32 %v2090_v58, %v6879_v23  ;;  %v3002_v23 = vld [vmem:[%s6700_s6 + $0x20] sm:$0xff] }
 0x3d5   :  { %6878 = vst [vmem:[#allocation23_spill] sm:$0xff] %v6044_v25  ;;  %v6056_v9 = vadd.f32 0.001, %v2667_v5  ;;  %v2627_v49 = vmul.f32 %v6036_v48, %v6036_v48  ;;  %vm2836_vm10 = vweird.f32 %v5993_v24  ;;  %v6066_v44 = vmul.f32 %v5742_v28, %v5926_v2 }
 0x3d6   :  { %6880 = vst [vmem:[#allocation25_spill] sm:$0xff] %v6054_v27  ;;  %v2784_v5 = vsub.f32 1.5, %v2783_v12  ;;  %v2598_v2 = vmul.f32 %v5951_v60, %v5742_v28  ;;  %v2493_v60 = vmul.f32 %v6044_v25, %v6044_v25  ;;  %vm2816_vm3 = vweird.f32 %v6025_v19 }
 0x3d7   :  { %v6038_v30 = vpop.xlane.xlu2 %2377  ;;  %3821 = vrsqrt.f32 %v6056_v9  ;;  %vm2766_vm7 = vweird.f32 %v6056_v9 }
 0x3d8   :  { %v3818_v47 = vpop.eup %3817 }
 0x3d9   :  { %v2831_v31 = vmul.f32 %v3818_v47, %v5993_v24  ;;  %v2382_v42 = vpop.xlane.xlu0 %2381  ;;  %vm2837_vm9 = vweird.f32 %v3818_v47  ;;  %v2411_v24 = vsel %vm2318_vm1, %v6044_v25, 0.0 }
 0x3da   :  { %3077 = vperm.xlu1 %3797, %v5860_v51   ;;  %v6047_v26 = vmul.f32 %v5742_v28, %v2382_v42  ;;  %vm2838_vm11 = vmor %vm2836_vm10, %vm2837_vm9  ;;  %v2412_v12 = vadd.f32 %v2411_v24, %v6054_v27 }
 0x3db   :  { %v2832_v55 = vmul.f32 %v3818_v47, %v2831_v31  ;;  %v3001_v31 = vld [vmem:[%s6700_s6 + $0x18] sm:$0xff] }
 0x3dc   :  { %v2629_v17 = vmul.f32 %v6047_v26, %v6047_v26 }
 0x3dd   :  { %v2833_v51 = vmul.f32 0.5, %v2832_v55  ;;  %v3049_v55 = vsub.f32 %v3001_v31, %v3025_v3  ;;  %v3026_v31 = vmul.f32 %v6049_v20, %v5882_v57  ;;  %v2622_v57 = vmul.f32 %v6066_v44, %v6066_v44 }
 0x3df   :  { %v2834_v11 = vsub.f32 1.5, %v2833_v51  ;;  %v2651_v51 = vsub.f32 %v2603_v8, %v2627_v49 }
 0x3e1   :  { %v2557_v42 = vpop.xlane.xlu0 %2556  ;;  %v2835_v54 = vmul.f32 %v3818_v47, %v2834_v11  ;;  %v2386_v58 = vpop.xlane.xlu1 %2385  ;;  %v2675_v49 = vmax.f32 %v2651_v51, 0.0 }
 0x3e2   :  { %v2605_v3 = vmul.f32 %v2557_v42, %v5742_v28  ;;  %3255 = vperm.xlu1 %3797, %v3049_v55   ;;  %v6083_v42 = vpop.eup %3819 }
 0x3e3   :  { %v2839_v39 = vsel %vm2838_vm11, %v3818_v47, %v2835_v54  ;;  %v6095_v54 = vpop.xlane.xlu2 %2552  ;;  %v2811_v24 = vmul.f32 %v6083_v42, %v6025_v19  ;;  %v6103_v51 = vpop.eup %3821  ;;  %vm2817_vm0 = vweird.f32 %v6083_v42 }
 0x3e4   :  { %v2653_v11 = vsub.f32 %v2605_v3, %v2629_v17  ;;  %v6081_v55 = vmul.f32 %v2962_v63, %v2839_v39  ;;  %v3050_v63 = vsub.f32 %v3002_v23, %v3026_v31  ;;  %v2785_v17 = vmul.f32 %v6001_v52, %v2784_v5  ;;  %vm6165_vm5 = vmor %vm2816_vm3, %vm2817_vm0 }
 0x3e5   :  { %v2646_v3 = vsub.f32 %v2598_v2, %v2622_v57  ;;  %v2492_v5 = vmul.f32 %v6054_v27, %v6054_v27  ;;  %v2957_v2 = vld [vmem:[%s6699_s5 + $0x38] sm:$0xff]  ;;  %v2812_v41 = vmul.f32 %v6083_v42, %v2811_v24  ;;  %v6115_v57 = vmul.f32 %v5742_v28, %v2386_v58 }
 0x3e6   :  { %v2677_v47 = vmax.f32 %v2653_v11, 0.0  ;;  %v6093_v8 = vmul.f32 %v6081_v55, %v5959_v37  ;;  %v2586_v37 = vsel %vm2318_vm1, %v2493_v60, 0.0  ;;  %v6105_v11 = vadd.f32 0.001, %v2675_v49 }
 0x3e7   :  { %2413 = vadd.xlane.f32.xlu2 %v2412_v12  ;;  %v2789_v31 = vsel %vm2788_vm14, %v6001_v52, %v2785_v17  ;;  %v2670_v23 = vmax.f32 %v2646_v3, 0.0  ;;  %v2761_v60 = vmul.f32 %v6103_v51, %v6056_v9  ;;  %v2813_v24 = vmul.f32 0.5, %v2812_v41  ;;  %v2955_v9 = vld [vmem:[%s6699_s5 + $0x28] sm:$0xff] }
 0x3e8   :  { %v2701_v39 = vadd.f32 0.001, %v2677_v47  ;;  %3260 = vperm.xlu0 %3796, %v3050_v63   ;;  %v2587_v47 = vadd.f32 %v2586_v37, %v2492_v5  ;;  %v2981_v49 = vmul.f32 %v2957_v2, %v2789_v31  ;;  %v2630_v58 = vmul.f32 %v6115_v57, %v6115_v57 }
 0x3e9   :  { %v2561_v12 = vpop.xlane.xlu1 %2560  ;;  %v6123_v3 = vadd.f32 0.001, %v2670_v23  ;;  %v2762_v37 = vmul.f32 %v6103_v51, %v2761_v60  ;;  %v6130_v5 = vmul.f32 %v5742_v28, %v5977_v18  ;;  %v3005_v23 = vld [vmem:[%s6700_s6 + $0x38] sm:$0xff]  ;;  %v2814_v41 = vsub.f32 1.5, %v2813_v24 }
 0x3ea   :  { %3823 = vrsqrt.f32 %v2701_v39  ;;  %v2606_v52 = vmul.f32 %v2561_v12, %v5742_v28  ;;  %v3029_v2 = vmul.f32 %v2981_v49, %v5935_v10  ;;  %v2601_v60 = vmul.f32 %v6009_v32, %v5742_v28 }
 0x3eb   :  { %3825 = vrsqrt.f32 %v6105_v11  ;;  %v6120_v63 = vpop.xlane.xlu2 %2389  ;;  %v2763_v18 = vmul.f32 0.5, %v2762_v37  ;;  %v2625_v0 = vmul.f32 %v6130_v5, %v6130_v5  ;;  %vm2866_vm2 = vweird.f32 %v2701_v39 }
 0x3ec   :  { %3827 = vrsqrt.f32 %v6123_v3  ;;  %v3053_v10 = vsub.f32 %v3005_v23, %v3029_v2  ;;  %vm2767_vm6 = vweird.f32 %v6103_v51  ;;  %vm2846_vm10 = vweird.f32 %v6105_v11 }
 0x3ed   :  { %v2649_v32 = vsub.f32 %v2601_v60, %v2625_v0  ;;  %v2764_v2 = vsub.f32 1.5, %v2763_v18  ;;  %v2264_v18 = vpop.f32.mrf.mxu2  ;;  %vm2768_vm8 = vmor %vm2766_vm7, %vm2767_vm6  ;;  %vm2796_vm13 = vweird.f32 %v6123_v3 }
 0x3ef   :  { %2588 = vadd.xlane.f32.xlu2 %v2587_v47  ;;  %v2654_v47 = vsub.f32 %v2606_v52, %v2630_v58  ;;  %v2815_v58 = vmul.f32 %v6083_v42, %v2814_v41  ;;  %v2673_v22 = vmax.f32 %v2649_v32, 0.0 }
 0x3f0   :  { %v3824_v17 = vpop.eup %3823  ;;  %3107 = vperm.xlu0 %3796, %v2981_v49  }
 0x3f1   :  { %v2861_v25 = vmul.f32 %v3824_v17, %v2701_v39  ;;  %v2394_v31 = vpop.xlane.xlu0 %2393  ;;  %v6137_v27 = vpop.eup %3825  ;;  %v2678_v49 = vmax.f32 %v2654_v47, 0.0  ;;  %vm2867_vm15 = vweird.f32 %v3824_v17  ;;  %v6189_v32 = vadd.f32 0.001, %v2673_v22 }
 0x3f2   :  { %v6144_v52 = vmul.f32 %v5742_v28, %v2394_v31  ;;  %v2841_v24 = vmul.f32 %v6137_v27, %v6105_v11  ;;  %v6155_v31 = vpop.eup %3827  ;;  %vm2868_vm4 = vmor %vm2866_vm2, %vm2867_vm15  ;;  %v6206_v22 = vmul.f32 %v5742_v28, %v6038_v30  ;;  %v6885_v30 = vld [vmem:[#allocation18_spill] sm:$0xff]  ;;  %vm2847_vm9 = vweird.f32 %v6137_v27 }
 0x3f3   :  { %v2862_v12 = vmul.f32 %v3824_v17, %v2861_v25  ;;  %v6150_v37 = vpop.xlane.xlu2 %2564  ;;  %v6158_v23 = vadd.f32 0.001, %v2678_v49  ;;  %v2960_v49 = vld [vmem:[%s6699_s5 + $0x50] sm:$0xff]  ;;  %v2791_v33 = vmul.f32 %v6155_v31, %v6123_v3  ;;  %vm6245_vm11 = vmor %vm2846_vm10, %vm2847_vm9  ;;  %vm2797_vm12 = vweird.f32 %v6155_v31 }
 0x3f4   :  { %v2632_v0 = vmul.f32 %v6144_v52, %v6144_v52  ;;  %v2842_v19 = vmul.f32 %v6137_v27, %v2841_v24  ;;  %vm6271_vm14 = vmor %vm2796_vm13, %vm2797_vm12  ;;  %vm2826_vm7 = vweird.f32 %v6189_v32 }
 0x3f5   :  { %v2863_v21 = vmul.f32 0.5, %v2862_v12  ;;  %3829 = vrsqrt.f32 %v6158_v23  ;;  %v2792_v41 = vmul.f32 %v6155_v31, %v2791_v33 }
 0x3f7   :  { %v2864_v25 = vsub.f32 1.5, %v2863_v21  ;;  %v2965_v21 = vld [vmem:[%s6699_s5 + $0x78] sm:$0xff] }
 0x3f8   :  { %3275 = vperm.xlu0 %3796, %v3053_v10   ;;  %v2175_v10 = vpop.f32.mrf.mxu0 }
 0x3f9   :  { %v2865_v12 = vmul.f32 %v3824_v17, %v2864_v25  ;;  %v2569_v47 = vpop.xlane.xlu0 %2568  ;;  %v2819_v25 = vsel %vm6165_vm5, %v6083_v42, %v2815_v58  ;;  %v2265_v42 = vadd.f32 %v2264_v18, %v2175_v10  ;;  %v2604_v18 = vmul.f32 %v6095_v54, %v5742_v28 }
 0x3fa   :  { %v2608_v39 = vmul.f32 %v2569_v47, %v5742_v28 }
 0x3fb   :  { %v2869_v60 = vsel %vm2868_vm4, %v3824_v17, %v2865_v12  ;;  %v2765_v17 = vmul.f32 %v6103_v51, %v2764_v2  ;;  %v2984_v12 = vmul.f32 %v2960_v49, %v2819_v25  ;;  %vm2876_vm4 = vweird.f32 %v6158_v23 }
 0x3fc   :  { %v6176_v47 = vmul.f32 %v2965_v21, %v2869_v60  ;;  %v2656_v15 = vsub.f32 %v2608_v39, %v2632_v0  ;;  %v2843_v21 = vmul.f32 0.5, %v2842_v19 }
 0x3fd   :  { %v2769_v39 = vsel %vm2768_vm8, %v6103_v51, %v2765_v17  ;;  %v3032_v33 = vmul.f32 %v2984_v12, %v5986_v56  ;;  %v2793_v51 = vmul.f32 0.5, %v2792_v41  ;;  %v2628_v56 = vmul.f32 %v6206_v22, %v6206_v22 }
 0x3fe   :  { %v6184_v24 = vmul.f32 %v6176_v47, %v6047_v26  ;;  %v2680_v58 = vmax.f32 %v2656_v15, 0.0  ;;  %v2087_v26 = vadd.f32 %v5949_v7, %v5947_v6  ;;  %v6883_v15 = vld [vmem:[#allocation21_spill] sm:$0xff]  ;;  %v2844_v10 = vsub.f32 1.5, %v2843_v21  ;;  %v3008_v6 = vld [vmem:[%s6700_s6 + $0x50] sm:$0xff]  ;;  %v6213_v7 = vpop.eup %3829 }
 0x3ff   :  { %v6202_v60 = vadd.f32 %v2265_v42, %v6883_v15  ;;  %v2979_v19 = vmul.f32 %v2955_v9, %v2769_v39  ;;  %v3056_v49 = vsub.f32 %v3008_v6, %v3032_v33  ;;  %v2871_v42 = vmul.f32 %v6213_v7, %v6158_v23  ;;  %v3003_v33 = vld [vmem:[%s6700_s6 + $0x28] sm:$0xff] }
 0x400   :  { %v6191_v0 = vadd.f32 0.001, %v2680_v58  ;;  %3122 = vperm.xlu0 %3796, %v2984_v12   ;;  %v6219_v25 = vadd.f32 %v2087_v26, %v6885_v30  ;;  %v2845_v58 = vmul.f32 %v6137_v27, %v2844_v10  ;;  %v2794_v21 = vsub.f32 1.5, %v2793_v51 }
 0x401   :  { %v6193_v2 = vpop.xlane.xlu2 %2401  ;;  %6884 = vst [vmem:[#allocation21_spill] sm:$0xff] %v6202_v60  ;;  %v2407_v17 = vsel %vm2318_vm1, %v6202_v60, 0.0  ;;  %v2491_v54 = vmul.f32 %v6202_v60, %v6202_v60  ;;  %v2652_v41 = vsub.f32 %v2604_v18, %v2628_v56  ;;  %v3027_v39 = vmul.f32 %v2979_v19, %v6005_v59  ;;  %v2963_v18 = vld [vmem:[%s6699_s5 + $0x68] sm:$0xff]  ;;  %v3241_v60 = vpop.permute.xlu1 %3240 }
 0x402   :  { %3831 = vrsqrt.f32 %v6191_v0  ;;  %v2408_v15 = vadd.f32 %v2407_v17, %v6219_v25  ;;  %v2872_v51 = vmul.f32 %v6213_v7, %v2871_v42  ;;  %v2849_v11 = vsel %vm6245_vm11, %v6137_v27, %v2845_v58  ;;  %v6889_v27 = vld [vmem:[#allocation24_spill] sm:$0xff] }
 0x403   :  { %3833 = vrsqrt.f32 %v6189_v32  ;;  %v2676_v30 = vmax.f32 %v2652_v41, 0.0  ;;  %v2795_v17 = vmul.f32 %v6155_v31, %v2794_v21  ;;  %v2490_v41 = vmul.f32 %v6219_v25, %v6219_v25 }
 0x404   :  { %vm2896_vm0 = vweird.f32 %v6191_v0  ;;  %vm2877_vm3 = vweird.f32 %v6213_v7 }
 0x405   :  { %v6267_v14 = vadd.f32 0.001, %v2676_v30  ;;  %vm2878_vm5 = vmor %vm2876_vm4, %vm2877_vm3 }
 0x407   :  { %3097 = vperm.xlu2 %3798, %v2979_v19   ;;  %v2582_v19 = vsel %vm2318_vm1, %v2491_v54, 0.0  ;;  %v2987_v54 = vmul.f32 %v2963_v18, %v2849_v11  ;;  %v2958_v18 = vld [vmem:[%s6699_s5 + $0x40] sm:$0xff]  ;;  %3835 = vrsqrt.f32 %v6267_v14  ;;  %vm2856_vm10 = vweird.f32 %v6267_v14 }
 0x408   :  { %v6231_v12 = vpop.eup %3831  ;;  %3290 = vperm.xlu0 %3796, %v3056_v49   ;;  %v3051_v49 = vsub.f32 %v3003_v33, %v3027_v39  ;;  %v2873_v39 = vmul.f32 0.5, %v2872_v51  ;;  %v2583_v50 = vadd.f32 %v2582_v19, %v2490_v41  ;;  %v6285_v19 = vmul.f32 %v5742_v28, %v6120_v63  ;;  %v3011_v63 = vld [vmem:[%s6700_s6 + $0x68] sm:$0xff] }
 0x409   :  { %v6233_v26 = vpop.xlane.xlu2 %2576  ;;  %v2891_v9 = vmul.f32 %v6231_v12, %v6191_v0  ;;  %v6243_v10 = vpop.eup %3833  ;;  %vm2897_vm15 = vweird.f32 %v6231_v12  ;;  %v3035_v30 = vmul.f32 %v2987_v54, %v6036_v48  ;;  %v2607_v48 = vmul.f32 %v6150_v37, %v5742_v28 }
 0x40a   :  { %v2821_v42 = vmul.f32 %v6243_v10, %v6189_v32  ;;  %vm2898_vm2 = vmor %vm2896_vm0, %vm2897_vm15  ;;  %vm2827_vm6 = vweird.f32 %v6243_v10  ;;  %v3014_v32 = vld [vmem:[%s6700_s6 + $0x80] sm:$0xff] }
 0x40b   :  { %v2892_v59 = vmul.f32 %v6231_v12, %v2891_v9  ;;  %vm2828_vm8 = vmor %vm2826_vm7, %vm2827_vm6 }
 0x40c   :  { %2409 = vadd.xlane.f32.xlu1 %v2408_v15  ;;  %v3073_v56 = vpop.permute.xlu0 %3072  ;;  %v6888_v15 = vld [vmem:[#allocation26_spill] sm:$0xff]  ;;  %v2822_v3 = vmul.f32 %v6243_v10, %v2821_v42  ;;  %v2874_v42 = vsub.f32 1.5, %v2873_v39 }
 0x40d   :  { %v2893_v9 = vmul.f32 0.5, %v2892_v59  ;;  %v3190_v6 = vmul.f32 %v3073_v56, %v6888_v15  ;;  %v3191_v58 = vmul.f32 %v3073_v56, %v6889_v27  ;;  %v3059_v15 = vsub.f32 %v3011_v63, %v3035_v30 }
 0x40e   :  { %v2823_v0 = vmul.f32 0.5, %v2822_v3  ;;  %v2875_v27 = vmul.f32 %v6213_v7, %v2874_v42  ;;  %v2610_v63 = vmul.f32 %v6233_v26, %v5742_v28 }
 0x40f   :  { %3265 = vperm.xlu2 %3798, %v3051_v49   ;;  %v2894_v21 = vsub.f32 1.5, %v2893_v9  ;;  %v3358_v33 = vadd.f32 %v3241_v60, %v3190_v6  ;;  %v3359_v13 = vadd.f32 %v3241_v60, %v3191_v58  ;;  %v2799_v60 = vsel %vm6271_vm14, %v6155_v31, %v2795_v17 }
 0x410   :  { %3137 = vperm.xlu0 %3796, %v2987_v54   ;;  %v2982_v31 = vmul.f32 %v2958_v18, %v2799_v60  ;;  %v2631_v9 = vmul.f32 %v6285_v19, %v6285_v19  ;;  %v2824_v39 = vsub.f32 1.5, %v2823_v0  ;;  %v2879_v56 = vsel %vm2878_vm5, %v6213_v7, %v2875_v27 }
 0x411   :  { %v3083_v59 = vpop.permute.xlu2 %3082  ;;  %v3406_v11 = vmax.f32 %v3358_v33, 0.0  ;;  %v3407_v51 = vmax.f32 %v3359_v13, 0.0  ;;  %v2895_v49 = vmul.f32 %v6231_v12, %v2894_v21  ;;  %v2968_v13 = vld [vmem:[%s6699_s5 + $0x90] sm:$0xff] }
 0x412   :  { %v3194_v37 = vmul.f32 %v3083_v59, %v5537_v29  ;;  %v3195_v6 = vmul.f32 %v3083_v59, %v5540_v36  ;;  %v3030_v41 = vmul.f32 %v2982_v31, %v6066_v44  ;;  %v3006_v36 = vld [vmem:[%s6700_s6 + $0x40] sm:$0xff]  ;;  %v3836_v29 = vpop.eup %3835 }
 0x413   :  { %3454 = vst [vmem:[%s6701_s7] sm:$0xff] %v3406_v11  ;;  %v2966_v44 = vld [vmem:[%s6699_s5 + $0x80] sm:$0xff]  ;;  %v2851_v11 = vmul.f32 %v3836_v29, %v6267_v14  ;;  %vm2857_vm9 = vweird.f32 %v3836_v29 }
 0x414   :  { %2584 = vadd.xlane.f32.xlu1 %v2583_v50  ;;  %3455 = vst.msk [vmem:[%s6701_s7 + $0x8] sm:$0xff] %vm2318_vm1, %v3407_v51  ;;  %v2899_v50 = vsel %vm2898_vm2, %v6231_v12, %v2895_v49  ;;  %v2655_v12 = vsub.f32 %v2607_v48, %v2631_v9  ;;  %v3054_v23 = vsub.f32 %v3006_v36, %v3030_v41  ;;  %v2961_v49 = vld [vmem:[%s6699_s5 + $0x58] sm:$0xff]  ;;  %vm2858_vm11 = vmor %vm2856_vm10, %vm2857_vm9 }
 0x415   :  { %v6309_v17 = vmul.f32 %v2968_v13, %v2899_v50  ;;  %v2825_v51 = vmul.f32 %v6243_v10, %v2824_v39  ;;  %v2990_v7 = vmul.f32 %v2966_v44, %v2879_v56  ;;  %v2852_v18 = vmul.f32 %v3836_v29, %v2851_v11  ;;  %v3009_v9 = vld [vmem:[%s6700_s6 + $0x58] sm:$0xff] }
 0x416   :  { %v2679_v3 = vmax.f32 %v2655_v12, 0.0  ;;  %v6351_v13 = vmul.f32 %v5742_v28, %v6193_v2 }
 0x417   :  { %3112 = vperm.xlu2 %3798, %v2982_v31   ;;  %v6319_v58 = vmul.f32 %v6309_v17, %v6144_v52  ;;  %v2829_v30 = vsel %vm2828_vm8, %v6243_v10, %v2825_v51  ;;  %v3038_v42 = vmul.f32 %v2990_v7, %v6115_v57  ;;  %v2853_v48 = vmul.f32 0.5, %v2852_v18 }
 0x418   :  { %3305 = vperm.xlu0 %3796, %v3059_v15   ;;  %v6343_v60 = vadd.f32 0.001, %v2679_v3  ;;  %v2985_v10 = vmul.f32 %v2961_v49, %v2829_v30  ;;  %v2634_v31 = vmul.f32 %v6351_v13, %v6351_v13  ;;  %v3246_v30 = vpop.permute.xlu0 %3245 }
 0x419   :  { %v3251_v54 = vpop.permute.xlu2 %3250  ;;  %v3062_v50 = vsub.f32 %v3014_v32, %v3038_v42  ;;  %v2854_v0 = vsub.f32 1.5, %v2853_v48 }
 0x41a   :  { %v3362_v21 = vadd.f32 %v3251_v54, %v3194_v37  ;;  %v3363_v33 = vadd.f32 %v3251_v54, %v3195_v6  ;;  %3837 = vrsqrt.f32 %v6343_v60  ;;  %v2658_v2 = vsub.f32 %v2610_v63, %v2634_v31 }
 0x41b   :  { %v3033_v57 = vmul.f32 %v2985_v10, %v6130_v5  ;;  %v2855_v12 = vmul.f32 %v3836_v29, %v2854_v0  ;;  %vm2886_vm13 = vweird.f32 %v6343_v60 }
 0x41c   :  { %v3410_v52 = vmax.f32 %v3362_v21, 0.0  ;;  %v3411_v59 = vmax.f32 %v3363_v33, 0.0  ;;  %v2682_v6 = vmax.f32 %v2658_v2, 0.0 }
 0x41d   :  { %v3057_v26 = vsub.f32 %v3009_v9, %v3033_v57  ;;  %v2859_v39 = vsel %vm2858_vm11, %v3836_v29, %v2855_v12  ;;  %v3004_v29 = vld [vmem:[%s6700_s6 + $0x30] sm:$0xff] }
 0x41e   :  { %3458 = vst [vmem:[%s6701_s7 + $0x20] sm:$0xff] %v3410_v52  ;;  %v6369_v54 = vadd.f32 0.001, %v2682_v6 }
 0x41f   :  { %3459 = vst.msk [vmem:[%s6701_s7 + $0x28] sm:$0xff] %vm2318_vm1, %v3411_v59  ;;  %3280 = vperm.xlu2 %3798, %v3054_v23   ;;  %v3012_v23 = vld [vmem:[%s6700_s6 + $0x70] sm:$0xff] }
 0x420   :  { %3152 = vperm.xlu0 %3796, %v2990_v7   ;;  %v3838_v15 = vpop.eup %3837  ;;  %3839 = vrsqrt.f32 %v6369_v54  ;;  %vm2916_vm4 = vweird.f32 %v6369_v54 }
 0x421   :  { %v2881_v27 = vmul.f32 %v3838_v15, %v6343_v60  ;;  %vm2887_vm12 = vweird.f32 %v3838_v15  ;;  %v3007_v60 = vld [vmem:[%s6700_s6 + $0x48] sm:$0xff] }
 0x422   :  { %vm2888_vm14 = vmor %vm2886_vm13, %vm2887_vm12 }
 0x423   :  { %v2882_v41 = vmul.f32 %v3838_v15, %v2881_v27  ;;  %v6892_v27 = vld [vmem:[#allocation27_spill] sm:$0xff] }
 0x425   :  { %v2883_v52 = vmul.f32 0.5, %v2882_v41  ;;  %v6893_v41 = vld [vmem:[#allocation28_spill] sm:$0xff] }
 0x426   :  { %v6389_v11 = vpop.eup %3839 }
 0x427   :  { %3127 = vperm.xlu2 %3798, %v2985_v10   ;;  %v2884_v3 = vsub.f32 1.5, %v2883_v52  ;;  %v2911_v18 = vmul.f32 %v6389_v11, %v6369_v54  ;;  %vm2917_vm3 = vweird.f32 %v6389_v11 }
 0x428   :  { %3320 = vperm.xlu0 %3796, %v3062_v50   ;;  %vm2918_vm5 = vmor %vm2916_vm4, %vm2917_vm3 }
 0x429   :  { %v2885_v49 = vmul.f32 %v3838_v15, %v2884_v3  ;;  %v2970_v3 = vld [vmem:[%s6699_s5 + $0xa0] sm:$0xff] }
 0x42b   :  { %v2889_v42 = vsel %vm2888_vm14, %v3838_v15, %v2885_v49  ;;  %v3015_v15 = vld [vmem:[%s6700_s6 + $0x88] sm:$0xff] }
 0x42c   :  { %v2398_v37 = vpop.xlane.xlu1 %2397 }
 0x42d   :  { %3092 = vperm.xlu1 %3797, %v6049_v20   ;;  %v6372_v5 = vmul.f32 %v5742_v28, %v2398_v37  ;;  %v2964_v20 = vld [vmem:[%s6699_s5 + $0x70] sm:$0xff] }
 0x42e   :  { %v2988_v36 = vmul.f32 %v2964_v20, %v2859_v39 }
 0x42f   :  { %3295 = vperm.xlu2 %3798, %v3057_v26   ;;  %v2633_v33 = vmul.f32 %v6372_v5, %v6372_v5  ;;  %v2969_v26 = vld [vmem:[%s6699_s5 + $0x98] sm:$0xff] }
 0x430   :  { %v3036_v44 = vmul.f32 %v2988_v36, %v6206_v22  ;;  %v2912_v22 = vmul.f32 %v6389_v11, %v2911_v18 }
 0x432   :  { %v3060_v7 = vsub.f32 %v3012_v23, %v3036_v44  ;;  %v2913_v48 = vmul.f32 0.5, %v2912_v22 }
 0x434   :  { %v2573_v21 = vpop.xlane.xlu1 %2572  ;;  %v2914_v0 = vsub.f32 1.5, %v2913_v48 }
 0x435   :  { %v2609_v14 = vmul.f32 %v2573_v21, %v5742_v28  ;;  %3102 = vperm.xlu1 %3797, %v5911_v34   ;;  %v3052_v34 = vsub.f32 %v3004_v29, %v5920_v1  ;;  %v2967_v1 = vld [vmem:[%s6699_s5 + $0x88] sm:$0xff] }
 0x436   :  { %v2991_v10 = vmul.f32 %v2967_v1, %v2889_v42  ;;  %v2915_v21 = vmul.f32 %v6389_v11, %v2914_v0  ;;  %v3010_v1 = vld [vmem:[%s6700_s6 + $0x60] sm:$0xff] }
 0x437   :  { %v2657_v59 = vsub.f32 %v2609_v14, %v2633_v33  ;;  %3142 = vperm.xlu2 %3798, %v2988_v36   ;;  %v3088_v36 = vpop.permute.xlu2 %3087 }
 0x438   :  { %v3039_v57 = vmul.f32 %v2991_v10, %v6285_v19  ;;  %v2919_v44 = vsel %vm2918_vm5, %v6389_v11, %v2915_v21  ;;  %v3196_v23 = vmul.f32 %v3088_v36, %v5559_v35  ;;  %v3017_v35 = vld [vmem:[%s6700_s6 + $0x98] sm:$0xff] }
 0x439   :  { %v2681_v56 = vmax.f32 %v2657_v59, 0.0 }
 0x43a   :  { %v3063_v39 = vsub.f32 %v3015_v15, %v3039_v57 }
 0x43b   :  { %v2705_v51 = vadd.f32 0.001, %v2681_v56 }
 0x43d   :  { %3841 = vrsqrt.f32 %v2705_v51  ;;  %3270 = vperm.xlu1 %3797, %v3052_v34   ;;  %vm2906_vm0 = vweird.f32 %v2705_v51 }
 0x43f   :  { %3310 = vperm.xlu2 %3798, %v3060_v7   ;;  %v2406_v50 = vpop.xlane.xlu0 %2405 }
 0x440   :  { %v6417_v59 = vmul.f32 %v5742_v28, %v2406_v50 }
 0x443   :  { %v3842_v32 = vpop.eup %3841 }
 0x444   :  { %v2901_v63 = vmul.f32 %v3842_v32, %v2705_v51  ;;  %vm2907_vm15 = vweird.f32 %v3842_v32  ;;  %v3197_v51 = vmul.f32 %v3088_v36, %v5562_v46  ;;  %v2635_v46 = vmul.f32 %v6417_v59, %v6417_v59 }
 0x445   :  { %3117 = vperm.xlu1 %3797, %v5982_v40   ;;  %v3055_v40 = vsub.f32 %v3007_v60, %v5990_v53  ;;  %vm2908_vm2 = vmor %vm2906_vm0, %vm2907_vm15 }
 0x446   :  { %v2902_v31 = vmul.f32 %v3842_v32, %v2901_v63  ;;  %v3018_v63 = vld [vmem:[%s6700_s6 + $0xa0] sm:$0xff] }
 0x447   :  { %3157 = vperm.xlu2 %3798, %v2991_v10   ;;  %v2581_v52 = vpop.xlane.xlu0 %2580 }
 0x448   :  { %v2903_v2 = vmul.f32 0.5, %v2902_v31  ;;  %v2611_v54 = vmul.f32 %v2581_v52, %v5742_v28  ;;  %v3058_v31 = vsub.f32 %v3010_v1, %v6093_v8 }
 0x44a   :  { %v2904_v9 = vsub.f32 1.5, %v2903_v2  ;;  %v2659_v49 = vsub.f32 %v2611_v54, %v2635_v46 }
 0x44c   :  { %v3078_v37 = vpop.permute.xlu1 %3077  ;;  %v2905_v6 = vmul.f32 %v3842_v32, %v2904_v9  ;;  %v2683_v10 = vmax.f32 %v2659_v49, 0.0 }
 0x44d   :  { %v3192_v12 = vmul.f32 %v3078_v37, %v6892_v27  ;;  %v3193_v19 = vmul.f32 %v3078_v37, %v6893_v41  ;;  %3285 = vperm.xlu1 %3797, %v3055_v40   ;;  %v3013_v40 = vld [vmem:[%s6700_s6 + $0x78] sm:$0xff] }
 0x44e   :  { %v2909_v20 = vsel %vm2908_vm2, %v3842_v32, %v2905_v6  ;;  %v6457_v2 = vadd.f32 0.001, %v2683_v10  ;;  %v6894_v10 = vld [vmem:[#allocation32_spill] sm:$0xff] }
 0x44f   :  { %v3360_v53 = vadd.f32 %v3246_v30, %v3192_v12  ;;  %v3361_v33 = vadd.f32 %v3246_v30, %v3193_v19  ;;  %3325 = vperm.xlu2 %3798, %v3063_v39   ;;  %v2993_v14 = vmul.f32 %v2969_v26, %v2909_v20  ;;  %v2994_v30 = vmul.f32 %v2970_v3, %v2919_v44 }
 0x450   :  { %3843 = vrsqrt.f32 %v6457_v2  ;;  %v3061_v19 = vsub.f32 %v3013_v40, %v6184_v24  ;;  %vm2926_vm10 = vweird.f32 %v6457_v2 }
 0x451   :  { %v3408_v29 = vmax.f32 %v3360_v53, 0.0  ;;  %v3409_v56 = vmax.f32 %v3361_v33, 0.0  ;;  %3167 = vperm.xlu0 %3796, %v2993_v14   ;;  %v3041_v34 = vmul.f32 %v2993_v14, %v6372_v5  ;;  %v3042_v32 = vmul.f32 %v2994_v30, %v6351_v13 }
 0x453   :  { %3456 = vst [vmem:[%s6701_s7 + $0x10] sm:$0xff] %v3408_v29  ;;  %v3065_v42 = vsub.f32 %v3017_v35, %v3041_v34  ;;  %v3066_v50 = vsub.f32 %v3018_v63, %v3042_v32  ;;  %v3016_v34 = vld [vmem:[%s6700_s6 + $0x90] sm:$0xff] }
 0x454   :  { %3457 = vst.msk [vmem:[%s6701_s7 + $0x18] sm:$0xff] %vm2318_vm1, %v3409_v56  ;;  %v3256_v11 = vpop.permute.xlu1 %3255 }
 0x455   :  { %v3364_v7 = vadd.f32 %v3256_v11, %v3196_v23  ;;  %v3365_v18 = vadd.f32 %v3256_v11, %v3197_v51  ;;  %3132 = vperm.xlu1 %3797, %v6081_v55  }
 0x456   :  { %v6470_v37 = vpop.eup %3843 }
 0x457   :  { %v3412_v5 = vmax.f32 %v3364_v7, 0.0  ;;  %v3413_v22 = vmax.f32 %v3365_v18, 0.0  ;;  %3172 = vperm.xlu2 %3798, %v2994_v30   ;;  %v2973_v7 = vld [vmem:[%s6699_s5 + $0xb8] sm:$0xff]  ;;  %v3064_v30 = vsub.f32 %v3016_v34, %v6319_v58  ;;  %vm2927_vm9 = vweird.f32 %v6470_v37 }
 0x458   :  { %vm2928_vm11 = vmor %vm2926_vm10, %vm2927_vm9 }
 0x459   :  { %3460 = vst [vmem:[%s6701_s7 + $0x30] sm:$0xff] %v3412_v5  ;;  %3335 = vperm.xlu0 %3796, %v3065_v42  }
 0x45a   :  { %3461 = vst.msk [vmem:[%s6701_s7 + $0x38] sm:$0xff] %vm2318_vm1, %v3413_v22  ;;  %v2414_v55 = vpop.xlane.xlu2 %2413  ;;  %v6454_v48 = vpop.permute.xlu0 %3260 }
 0x45b   :  { %v6460_v13 = vmul.f32 %v5742_v28, %v2414_v55  ;;  %v2971_v55 = vld [vmem:[%s6699_s5 + $0xa8] sm:$0xff] }
 0x45d   :  { %3300 = vperm.xlu1 %3797, %v3058_v31   ;;  %v2637_v57 = vmul.f32 %v6460_v13, %v6460_v13 }
 0x45f   :  { %3340 = vperm.xlu2 %3798, %v3066_v50  }
 0x462   :  { %v2589_v60 = vpop.xlane.xlu2 %2588  ;;  %v3108_v9 = vpop.permute.xlu0 %3107 }
 0x463   :  { %v2613_v0 = vmul.f32 %v2589_v60, %v5742_v28  ;;  %v3204_v26 = vmul.f32 %v3108_v9, %v5626_v4  ;;  %v3205_v27 = vmul.f32 %v3108_v9, %v5622_v43  ;;  %v3021_v60 = vld [vmem:[%s6700_s6 + $0xb8] sm:$0xff] }
 0x465   :  { %v2661_v15 = vsub.f32 %v2613_v0, %v2637_v57  ;;  %3147 = vperm.xlu1 %3797, %v6176_v47   ;;  %v2921_v47 = vmul.f32 %v6470_v37, %v6457_v2 }
 0x467   :  { %v2685_v8 = vmax.f32 %v2661_v15, 0.0  ;;  %v2922_v33 = vmul.f32 %v6470_v37, %v2921_v47  ;;  %v6896_v47 = vld [vmem:[#allocation13_spill] sm:$0xff] }
 0x469   :  { %v2709_v6 = vadd.f32 0.001, %v2685_v8  ;;  %v2923_v44 = vmul.f32 0.5, %v2922_v33 }
 0x46a   :  { %v3098_v12 = vpop.permute.xlu2 %3097  ;;  %v3276_v41 = vpop.permute.xlu0 %3275 }
 0x46b   :  { %3845 = vrsqrt.f32 %v2709_v6  ;;  %v3372_v39 = vadd.f32 %v3276_v41, %v3204_v26  ;;  %v3373_v20 = vadd.f32 %v3276_v41, %v3205_v27  ;;  %v3200_v4 = vmul.f32 %v3098_v12, %v5598_v61  ;;  %v6895_v41 = vld [vmem:[#allocation8_spill] sm:$0xff] }
 0x46c   :  { %v3201_v14 = vmul.f32 %v3098_v12, %v5595_v62  ;;  %v2924_v62 = vsub.f32 1.5, %v2923_v44  ;;  %vm2946_vm7 = vweird.f32 %v2709_v6  ;;  %v3019_v12 = vld [vmem:[%s6700_s6 + $0xa8] sm:$0xff] }
 0x46d   :  { %3315 = vperm.xlu1 %3797, %v3061_v19   ;;  %v3420_v21 = vmax.f32 %v3372_v39, 0.0  ;;  %v3421_v53 = vmax.f32 %v3373_v20, 0.0 }
 0x46e   :  { %v2925_v42 = vmul.f32 %v6470_v37, %v2924_v62 }
 0x46f   :  { %3468 = vst [vmem:[%s6701_s7 + $0x70] sm:$0xff] %v3420_v21 }
 0x470   :  { %3469 = vst.msk [vmem:[%s6701_s7 + $0x78] sm:$0xff] %vm2318_vm1, %v3421_v53  ;;  %v2929_v58 = vsel %vm2928_vm11, %v6470_v37, %v2925_v42 }
 0x471   :  { %v3846_v43 = vpop.eup %3845  ;;  %v2995_v15 = vmul.f32 %v2971_v55, %v2929_v58  ;;  %v2972_v58 = vld [vmem:[%s6699_s5 + $0xb0] sm:$0xff]  ;;  %v6901_v55 = vld [vmem:[#allocation29_spill] sm:$0xff] }
 0x472   :  { %v2941_v24 = vmul.f32 %v3846_v43, %v2709_v6  ;;  %v3266_v36 = vpop.permute.xlu2 %3265  ;;  %v3123_v56 = vpop.permute.xlu0 %3122  ;;  %vm2947_vm6 = vweird.f32 %v3846_v43 }
 0x473   :  { %v3368_v52 = vadd.f32 %v3266_v36, %v3200_v4  ;;  %v3369_v29 = vadd.f32 %v3266_v36, %v3201_v14  ;;  %v3211_v11 = vmul.f32 %v3123_v56, %v5664_v38  ;;  %vm2948_vm8 = vmor %vm2946_vm7, %vm2947_vm6  ;;  %v3043_v6 = vmul.f32 %v2995_v15, %v6417_v59 }
 0x474   :  { %v2942_v3 = vmul.f32 %v3846_v43, %v2941_v24 }
 0x475   :  { %v3416_v23 = vmax.f32 %v3368_v52, 0.0  ;;  %v3417_v51 = vmax.f32 %v3369_v29, 0.0  ;;  %3162 = vperm.xlu1 %3797, %v6309_v17   ;;  %v3210_v17 = vmul.f32 %v3123_v56, %v5668_v16  ;;  %v3067_v53 = vsub.f32 %v3019_v12, %v3043_v6  ;;  %v6898_v29 = vld [vmem:[#allocation4_spill] sm:$0xff] }
 0x476   :  { %v2943_v54 = vmul.f32 0.5, %v2942_v3 }
 0x477   :  { %3464 = vst [vmem:[%s6701_s7 + $0x50] sm:$0xff] %v3416_v23 }
 0x478   :  { %v2944_v61 = vsub.f32 1.5, %v2943_v54  ;;  %3465 = vst.msk [vmem:[%s6701_s7 + $0x58] sm:$0xff] %vm2318_vm1, %v3417_v51 }
 0x47a   :  { %v3113_v35 = vpop.permute.xlu2 %3112  ;;  %v2945_v46 = vmul.f32 %v3846_v43, %v2944_v61  ;;  %v3291_v18 = vpop.permute.xlu0 %3290 }
 0x47b   :  { %v3378_v49 = vadd.f32 %v3291_v18, %v3210_v17  ;;  %v3379_v5 = vadd.f32 %v3291_v18, %v3211_v11  ;;  %v3206_v63 = vmul.f32 %v3113_v35, %v5640_v45  ;;  %v3207_v31 = vmul.f32 %v3113_v35, %v6894_v10  ;;  %v6899_v11 = vld [vmem:[#allocation14_spill] sm:$0xff] }
 0x47c   :  { %v2949_v22 = vsel %vm2948_vm8, %v3846_v43, %v2945_v46  ;;  %v6900_v46 = vld [vmem:[#allocation19_spill] sm:$0xff]  ;;  %v6902_v10 = vld [vmem:[#allocation30_spill] sm:$0xff] }
 0x47d   :  { %3330 = vperm.xlu1 %3797, %v3064_v30   ;;  %v2997_v16 = vmul.f32 %v2973_v7, %v2949_v22  ;;  %v3426_v38 = vmax.f32 %v3378_v49, 0.0  ;;  %v3427_v1 = vmax.f32 %v3379_v5, 0.0 }
 0x47f   :  { %3187 = vperm.xlu2 %3798, %v2997_v16   ;;  %v2410_v32 = vpop.xlane.xlu1 %2409  ;;  %3474 = vst [vmem:[%s6701_s7 + $0xa0] sm:$0xff] %v3426_v38  ;;  %v3045_v50 = vmul.f32 %v2997_v16, %v6460_v13 }
 0x480   :  { %3475 = vst.msk [vmem:[%s6701_s7 + $0xa8] sm:$0xff] %vm2318_vm1, %v3427_v1  ;;  %v6525_v45 = vmul.f32 %v5742_v28, %v2410_v32 }
 0x481   :  { %v3069_v37 = vsub.f32 %v3021_v60, %v3045_v50  ;;  %v6903_v50 = vld [vmem:[#allocation16_spill] sm:$0xff]  ;;  %v6904_v60 = vld [vmem:[#allocation9_spill] sm:$0xff] }
 0x482   :  { %v3281_v2 = vpop.permute.xlu2 %3280  ;;  %v3138_v9 = vpop.permute.xlu0 %3137  ;;  %v2636_v26 = vmul.f32 %v6525_v45, %v6525_v45 }
 0x483   :  { %v3374_v57 = vadd.f32 %v3281_v2, %v3206_v63  ;;  %v3375_v0 = vadd.f32 %v3281_v2, %v3207_v31  ;;  %v3216_v19 = vmul.f32 %v3138_v9, %v6895_v41  ;;  %v3217_v39 = vmul.f32 %v3138_v9, %v6896_v47 }
 0x485   :  { %v3422_v8 = vmax.f32 %v3374_v57, 0.0  ;;  %v3423_v40 = vmax.f32 %v3375_v0, 0.0  ;;  %3177 = vperm.xlu1 %3797, %v2995_v15  }
 0x487   :  { %3470 = vst [vmem:[%s6701_s7 + $0x80] sm:$0xff] %v3422_v8  ;;  %3355 = vperm.xlu2 %3798, %v3069_v37   ;;  %v2585_v13 = vpop.xlane.xlu1 %2584 }
 0x488   :  { %3471 = vst.msk [vmem:[%s6701_s7 + $0x88] sm:$0xff] %vm2318_vm1, %v3423_v40  ;;  %v2612_v27 = vmul.f32 %v2585_v13, %v5742_v28  ;;  %v6897_v28 = vld [vmem:[#allocation10_spill] sm:$0xff] }
 0x48a   :  { %v2660_v20 = vsub.f32 %v2612_v27, %v2636_v26  ;;  %v3128_v59 = vpop.permute.xlu2 %3127  ;;  %v3306_v21 = vpop.permute.xlu0 %3305 }
 0x48b   :  { %v3384_v43 = vadd.f32 %v3306_v21, %v3216_v19  ;;  %v3385_v4 = vadd.f32 %v3306_v21, %v3217_v39  ;;  %v3212_v52 = vmul.f32 %v3128_v59, %v6897_v28  ;;  %v3213_v56 = vmul.f32 %v3128_v59, %v6898_v29  ;;  %v3020_v19 = vld [vmem:[%s6700_s6 + $0xb0] sm:$0xff]  ;;  %v6905_v39 = vld [vmem:[#allocation2_spill] sm:$0xff]  ;;  %v6906_v59 = vld [vmem:[#allocation31_spill] sm:$0xff] }
 0x48c   :  { %v2684_v33 = vmax.f32 %v2660_v20, 0.0 }
 0x48d   :  { %3345 = vperm.xlu1 %3797, %v3067_v53   ;;  %v3432_v24 = vmax.f32 %v3384_v43, 0.0  ;;  %v3433_v36 = vmax.f32 %v3385_v4, 0.0  ;;  %v6907_v4 = vld [vmem:[#allocation22_spill] sm:$0xff] }
 0x48e   :  { %v2708_v14 = vadd.f32 0.001, %v2684_v33 }
 0x48f   :  { %3480 = vst [vmem:[%s6701_s7 + $0xd0] sm:$0xff] %v3432_v24  ;;  %v6908_v24 = vld [vmem:[#allocation15_spill] sm:$0xff] }
 0x490   :  { %3847 = vrsqrt.f32 %v2708_v14  ;;  %3481 = vst.msk [vmem:[%s6701_s7 + $0xd8] sm:$0xff] %vm2318_vm1, %v3433_v36  ;;  %vm2936_vm13 = vweird.f32 %v2708_v14 }
 0x492   :  { %v3296_v44 = vpop.permute.xlu2 %3295  ;;  %v3153_v51 = vpop.permute.xlu0 %3152 }
 0x493   :  { %v3380_v3 = vadd.f32 %v3296_v44, %v3212_v52  ;;  %v3381_v23 = vadd.f32 %v3296_v44, %v3213_v56  ;;  %v3222_v35 = vmul.f32 %v3153_v51, %v6899_v11  ;;  %v3223_v7 = vmul.f32 %v3153_v51, %v6900_v46 }
 0x495   :  { %v3428_v54 = vmax.f32 %v3380_v3, 0.0  ;;  %v3429_v62 = vmax.f32 %v3381_v23, 0.0 }
 0x496   :  { %v3848_v61 = vpop.eup %3847 }
 0x497   :  { %v2931_v34 = vmul.f32 %v3848_v61, %v2708_v14  ;;  %3476 = vst [vmem:[%s6701_s7 + $0xb0] sm:$0xff] %v3428_v54  ;;  %vm2937_vm12 = vweird.f32 %v3848_v61 }
 0x498   :  { %3477 = vst.msk [vmem:[%s6701_s7 + $0xb8] sm:$0xff] %vm2318_vm1, %v3429_v62  ;;  %vm2938_vm14 = vmor %vm2936_vm13, %vm2937_vm12  ;;  %v6909_v62 = vld [vmem:[#allocation3_spill] sm:$0xff] }
 0x499   :  { %v2932_v17 = vmul.f32 %v3848_v61, %v2931_v34  ;;  %v6910_v34 = vld [vmem:[#allocation7_spill] sm:$0xff] }
 0x49a   :  { %v3143_v18 = vpop.permute.xlu2 %3142  ;;  %v3321_v49 = vpop.permute.xlu0 %3320 }
 0x49b   :  { %v2933_v30 = vmul.f32 0.5, %v2932_v17  ;;  %v3390_v5 = vadd.f32 %v3321_v49, %v3222_v35  ;;  %v3391_v22 = vadd.f32 %v3321_v49, %v3223_v7  ;;  %v3218_v2 = vmul.f32 %v3143_v18, %v6903_v50  ;;  %v6911_v7 = vld [vmem:[#allocation36_spill] sm:$0xff] }
 0x49c   :  { %v3219_v57 = vmul.f32 %v3143_v18, %v6904_v60 }
 0x49d   :  { %v2934_v42 = vsub.f32 1.5, %v2933_v30  ;;  %v3438_v16 = vmax.f32 %v3390_v5, 0.0  ;;  %v3439_v38 = vmax.f32 %v3391_v22, 0.0  ;;  %v6912_v30 = vld [vmem:[#allocation35_spill] sm:$0xff] }
 0x49f   :  { %v3093_v1 = vpop.permute.xlu1 %3092  ;;  %v2935_v32 = vmul.f32 %v3848_v61, %v2934_v42  ;;  %3486 = vst [vmem:[%s6701_s7 + $0x100] sm:$0xff] %v3438_v16 }
 0x4a0   :  { %v3198_v63 = vmul.f32 %v3093_v1, %v6901_v55  ;;  %v3199_v31 = vmul.f32 %v3093_v1, %v6902_v10  ;;  %3487 = vst.msk [vmem:[%s6701_s7 + $0x108] sm:$0xff] %vm2318_vm1, %v3439_v38 }
 0x4a1   :  { %v2939_v0 = vsel %vm2938_vm14, %v3848_v61, %v2935_v32 }
 0x4a2   :  { %v3366_v9 = vadd.f32 %v6454_v48, %v3198_v63  ;;  %v3367_v15 = vadd.f32 %v6454_v48, %v3199_v31  ;;  %v3311_v8 = vpop.permute.xlu2 %3310  ;;  %v2996_v40 = vmul.f32 %v2972_v58, %v2939_v0  ;;  %v6913_v63 = vld [vmem:[#allocation38_spill] sm:$0xff]  ;;  %v6914_v31 = vld [vmem:[#allocation37_spill] sm:$0xff] }
 0x4a3   :  { %v3386_v37 = vadd.f32 %v3311_v8, %v3218_v2  ;;  %v3387_v13 = vadd.f32 %v3311_v8, %v3219_v57  ;;  %v6915_v0 = vld [vmem:[#allocation6_spill] sm:$0xff] }
 0x4a4   :  { %v3414_v6 = vmax.f32 %v3366_v9, 0.0  ;;  %v3415_v26 = vmax.f32 %v3367_v15, 0.0  ;;  %3182 = vperm.xlu0 %3796, %v2996_v40   ;;  %v3044_v41 = vmul.f32 %v2996_v40, %v6525_v45  ;;  %v6916_v15 = vld [vmem:[#allocation5_spill] sm:$0xff] }
 0x4a5   :  { %v3434_v27 = vmax.f32 %v3386_v37, 0.0  ;;  %v3435_v12 = vmax.f32 %v3387_v13, 0.0 }
 0x4a6   :  { %3462 = vst [vmem:[%s6701_s7 + $0x40] sm:$0xff] %v3414_v6  ;;  %v3068_v47 = vsub.f32 %v3020_v19, %v3044_v41  ;;  %v6917_v19 = vld [vmem:[#allocation12_spill] sm:$0xff] }
 0x4a7   :  { %3463 = vst.msk [vmem:[%s6701_s7 + $0x48] sm:$0xff] %vm2318_vm1, %v3415_v26  ;;  %v3103_v48 = vpop.permute.xlu1 %3102 }
 0x4a8   :  { %3482 = vst [vmem:[%s6701_s7 + $0xe0] sm:$0xff] %v3434_v27  ;;  %v3202_v20 = vmul.f32 %v3103_v48, %v6905_v39  ;;  %v3203_v21 = vmul.f32 %v3103_v48, %v6906_v59  ;;  %v6919_v59 = vld [vmem:[#allocation25_spill] sm:$0xff] }
 0x4a9   :  { %3483 = vst.msk [vmem:[%s6701_s7 + $0xe8] sm:$0xff] %vm2318_vm1, %v3435_v12 }
 0x4aa   :  { %v3158_v45 = vpop.permute.xlu2 %3157 }
 0x4ab   :  { %v3224_v14 = vmul.f32 %v3158_v45, %v6907_v4  ;;  %v3225_v36 = vmul.f32 %v3158_v45, %v6908_v24 }
 0x4ac   :  { %3350 = vperm.xlu0 %3796, %v3068_v47   ;;  %v6918_v47 = vld [vmem:[#allocation11_spill] sm:$0xff] }
 0x4af   :  { %v3271_v53 = vpop.permute.xlu1 %3270 }
 0x4b0   :  { %v3370_v33 = vadd.f32 %v3271_v53, %v3202_v20  ;;  %v3371_v43 = vadd.f32 %v3271_v53, %v3203_v21  ;;  %v6920_v53 = vld [vmem:[#allocation23_spill] sm:$0xff] }
 0x4b2   :  { %v3418_v28 = vmax.f32 %v3370_v33, 0.0  ;;  %v3419_v52 = vmax.f32 %v3371_v43, 0.0  ;;  %v3326_v29 = vpop.permute.xlu2 %3325 }
 0x4b3   :  { %v3392_v56 = vadd.f32 %v3326_v29, %v3224_v14  ;;  %v3393_v44 = vadd.f32 %v3326_v29, %v3225_v36 }
 0x4b4   :  { %3466 = vst [vmem:[%s6701_s7 + $0x60] sm:$0xff] %v3418_v28 }
 0x4b5   :  { %3467 = vst.msk [vmem:[%s6701_s7 + $0x68] sm:$0xff] %vm2318_vm1, %v3419_v52  ;;  %v3440_v3 = vmax.f32 %v3392_v56, 0.0  ;;  %v3441_v23 = vmax.f32 %v3393_v44, 0.0 }
 0x4b7   :  { %3488 = vst [vmem:[%s6701_s7 + $0x110] sm:$0xff] %v3440_v3  ;;  %v3118_v51 = vpop.permute.xlu1 %3117  ;;  %v6921_v3 = vld [vmem:[#allocation34_spill] sm:$0xff] }
 0x4b8   :  { %3489 = vst.msk [vmem:[%s6701_s7 + $0x118] sm:$0xff] %vm2318_vm1, %v3441_v23  ;;  %v3208_v61 = vmul.f32 %v3118_v51, %v6909_v62  ;;  %v3209_v17 = vmul.f32 %v3118_v51, %v6910_v34  ;;  %v6922_v51 = vld [vmem:[#allocation33_spill] sm:$0xff] }
 0x4ba   :  { %v3173_v54 = vpop.permute.xlu2 %3172 }
 0x4bb   :  { %v3230_v18 = vmul.f32 %v3173_v54, %v6911_v7  ;;  %v3231_v49 = vmul.f32 %v3173_v54, %v6912_v30 }
 0x4bf   :  { %v3286_v11 = vpop.permute.xlu1 %3285 }
 0x4c0   :  { %v3376_v35 = vadd.f32 %v3286_v11, %v3208_v61  ;;  %v3377_v46 = vadd.f32 %v3286_v11, %v3209_v17 }
 0x4c2   :  { %v3424_v5 = vmax.f32 %v3376_v35, 0.0  ;;  %v3425_v22 = vmax.f32 %v3377_v46, 0.0  ;;  %v3341_v42 = vpop.permute.xlu2 %3340  ;;  %v6923_v46 = vld [vmem:[#allocation17_spill] sm:$0xff] }
 0x4c3   :  { %v3398_v16 = vadd.f32 %v3341_v42, %v3230_v18  ;;  %v3399_v38 = vadd.f32 %v3341_v42, %v3231_v49  ;;  %v3168_v1 = vpop.permute.xlu0 %3167  ;;  %v6924_v18 = vld [vmem:[#allocation20_spill] sm:$0xff] }
 0x4c4   :  { %3472 = vst [vmem:[%s6701_s7 + $0x90] sm:$0xff] %v3424_v5  ;;  %v3228_v10 = vmul.f32 %v3168_v1, %v6913_v63  ;;  %v3229_v50 = vmul.f32 %v3168_v1, %v6914_v31 }
 0x4c5   :  { %3473 = vst.msk [vmem:[%s6701_s7 + $0x98] sm:$0xff] %vm2318_vm1, %v3425_v22  ;;  %v3446_v32 = vmax.f32 %v3398_v16, 0.0  ;;  %v3447_v58 = vmax.f32 %v3399_v38, 0.0 }
 0x4c7   :  { %3494 = vst [vmem:[%s6701_s7 + $0x140] sm:$0xff] %v3446_v32  ;;  %v3133_v55 = vpop.permute.xlu1 %3132  ;;  %v6925_v32 = vld [vmem:[#allocation21_spill] sm:$0xff] }
 0x4c8   :  { %3495 = vst.msk [vmem:[%s6701_s7 + $0x148] sm:$0xff] %vm2318_vm1, %v3447_v58  ;;  %v3214_v9 = vmul.f32 %v3133_v55, %v6915_v0  ;;  %v3215_v8 = vmul.f32 %v3133_v55, %v6916_v15 }
 0x4cb   :  { %v3336_v2 = vpop.permute.xlu0 %3335 }
 0x4cc   :  { %v3396_v60 = vadd.f32 %v3336_v2, %v3228_v10  ;;  %v3397_v57 = vadd.f32 %v3336_v2, %v3229_v50 }
 0x4ce   :  { %v3444_v40 = vmax.f32 %v3396_v60, 0.0  ;;  %v3445_v37 = vmax.f32 %v3397_v57, 0.0 }
 0x4cf   :  { %v3301_v13 = vpop.permute.xlu1 %3300 }
 0x4d0   :  { %3492 = vst [vmem:[%s6701_s7 + $0x130] sm:$0xff] %v3444_v40  ;;  %v3382_v6 = vadd.f32 %v3301_v13, %v3214_v9  ;;  %v3383_v26 = vadd.f32 %v3301_v13, %v3215_v8 }
 0x4d1   :  { %3493 = vst.msk [vmem:[%s6701_s7 + $0x138] sm:$0xff] %vm2318_vm1, %v3445_v37 }
 0x4d2   :  { %v3430_v27 = vmax.f32 %v3382_v6, 0.0  ;;  %v3431_v12 = vmax.f32 %v3383_v26, 0.0 }
 0x4d4   :  { %3478 = vst [vmem:[%s6701_s7 + $0xc0] sm:$0xff] %v3430_v27 }
 0x4d5   :  { %3479 = vst.msk [vmem:[%s6701_s7 + $0xc8] sm:$0xff] %vm2318_vm1, %v3431_v12 }
 0x4d7   :  { %v3148_v41 = vpop.permute.xlu1 %3147 }
 0x4d8   :  { %v3220_v45 = vmul.f32 %v3148_v41, %v6917_v19  ;;  %v3221_v39 = vmul.f32 %v3148_v41, %v6918_v47 }
 0x4d9   :  { %v3188_v48 = vpop.permute.xlu2 %3187 }
 0x4da   :  { %v3236_v21 = vmul.f32 %v3188_v48, %v6919_v59  ;;  %v3237_v33 = vmul.f32 %v3188_v48, %v6920_v53 }
 0x4df   :  { %v3316_v20 = vpop.permute.xlu1 %3315 }
 0x4e0   :  { %v3388_v43 = vadd.f32 %v3316_v20, %v3220_v45  ;;  %v3389_v4 = vadd.f32 %v3316_v20, %v3221_v39 }
 0x4e1   :  { %v3356_v14 = vpop.permute.xlu2 %3355 }
 0x4e2   :  { %v3436_v24 = vmax.f32 %v3388_v43, 0.0  ;;  %v3437_v36 = vmax.f32 %v3389_v4, 0.0  ;;  %v3404_v28 = vadd.f32 %v3356_v14, %v3236_v21  ;;  %v3405_v52 = vadd.f32 %v3356_v14, %v3237_v33 }
 0x4e4   :  { %3484 = vst [vmem:[%s6701_s7 + $0xf0] sm:$0xff] %v3436_v24  ;;  %v3452_v29 = vmax.f32 %v3404_v28, 0.0  ;;  %v3453_v56 = vmax.f32 %v3405_v52, 0.0 }
 0x4e5   :  { %3485 = vst.msk [vmem:[%s6701_s7 + $0xf8] sm:$0xff] %vm2318_vm1, %v3437_v36 }
 0x4e6   :  { %3500 = vst [vmem:[%s6701_s7 + $0x170] sm:$0xff] %v3452_v29 }
 0x4e7   :  { %3501 = vst.msk [vmem:[%s6701_s7 + $0x178] sm:$0xff] %vm2318_vm1, %v3453_v56  ;;  %v3163_v44 = vpop.permute.xlu1 %3162 }
 0x4e8   :  { %v3226_v23 = vmul.f32 %v3163_v44, %v6921_v3  ;;  %v3227_v54 = vmul.f32 %v3163_v44, %v6922_v51 }
 0x4ef   :  { %v3331_v62 = vpop.permute.xlu1 %3330 }
 0x4f0   :  { %v3394_v61 = vadd.f32 %v3331_v62, %v3226_v23  ;;  %v3395_v34 = vadd.f32 %v3331_v62, %v3227_v54 }
 0x4f2   :  { %v3442_v17 = vmax.f32 %v3394_v61, 0.0  ;;  %v3443_v11 = vmax.f32 %v3395_v34, 0.0 }
 0x4f4   :  { %3490 = vst [vmem:[%s6701_s7 + $0x120] sm:$0xff] %v3442_v17 }
 0x4f5   :  { %3491 = vst.msk [vmem:[%s6701_s7 + $0x128] sm:$0xff] %vm2318_vm1, %v3443_v11 }
 0x4f7   :  { %v3178_v35 = vpop.permute.xlu1 %3177 }
 0x4f8   :  { %v3232_v7 = vmul.f32 %v3178_v35, %v6923_v46  ;;  %v3233_v30 = vmul.f32 %v3178_v35, %v6924_v18 }
 0x4ff   :  { %v3346_v49 = vpop.permute.xlu1 %3345 }
 0x500   :  { %v3400_v5 = vadd.f32 %v3346_v49, %v3232_v7  ;;  %v3401_v22 = vadd.f32 %v3346_v49, %v3233_v30 }
 0x502   :  { %v3448_v42 = vmax.f32 %v3400_v5, 0.0  ;;  %v3449_v16 = vmax.f32 %v3401_v22, 0.0 }
 0x504   :  { %3496 = vst [vmem:[%s6701_s7 + $0x150] sm:$0xff] %v3448_v42 }
 0x505   :  { %3497 = vst.msk [vmem:[%s6701_s7 + $0x158] sm:$0xff] %vm2318_vm1, %v3449_v16 }
 0x516   :  { %v3183_v38 = vpop.permute.xlu0 %3182 }
 0x517   :  { %v3234_v1 = vmul.f32 %v3183_v38, %v6219_v25  ;;  %v3235_v58 = vmul.f32 %v3183_v38, %v6925_v32 }
 0x51e   :  { %v3351_v55 = vpop.permute.xlu0 %3350 }
 0x51f   :  { %v3402_v63 = vadd.f32 %v3351_v55, %v3234_v1  ;;  %v3403_v10 = vadd.f32 %v3351_v55, %v3235_v58 }
 0x521   :  { %v3450_v31 = vmax.f32 %v3402_v63, 0.0  ;;  %v3451_v50 = vmax.f32 %v3403_v10, 0.0 }
 0x523   :  { %3498 = vst [vmem:[%s6701_s7 + $0x160] sm:$0xff] %v3450_v31 }
 0x524   :  { %3499 = vst.msk [vmem:[%s6701_s7 + $0x168] sm:$0xff] %vm2318_vm1, %v3451_v50 }

</bundles_post_ra>
